<compile_context>
chip_gen: v5e
topology: v5e:2x2
jax: 0.10.0
libtpu: 0.0.40
codegen_flags: <defaults>
</compile_context>

<pallas_src>
import functools

import jax
import jax.numpy as jnp
from jax.experimental import pallas as pl
from jax.experimental.pallas import tpu as pltpu


# -----------------------------------------------------------------------------
# In-kernel helper: 3x3 / stride-1 conv of a zero-padded (H+2, W+2, cin) VMEM
# scratch, as a single im2col matmul  (H*W, 9*cin) @ (9*cin, cout)  + bias.
# Column order of the patch matrix is tap-major (dy*3+dx), channel-minor, which
# matches the (kh, kw, cin, cout) -> (9*cin, cout) weight reshape done at init.
# -----------------------------------------------------------------------------
def _conv3x3_im2col(pad_ref, w_ref, b_ref, *, H, W, cin, cout):
    patches = []
    for dy in range(3):
        for dx in range(3):
            patches.append(pad_ref[dy:dy + H, dx:dx + W, :].reshape(H * W, cin))
    p = jnp.concatenate(patches, axis=-1)                         # (H*W, 9*cin)
    acc = jnp.dot(p, w_ref[...], preferred_element_type=jnp.float32)
    acc = acc + b_ref[...]                                        # (H*W, cout)
    return acc.reshape(H, W, cout)


# -----------------------------------------------------------------------------
# Fused kernel: one batch element per grid step.
#   conv(cin->cout) -> maxpool(5,4,2) -> residual block -> residual block
# -----------------------------------------------------------------------------
def _impala_block_kernel(x_ref,
                         w0, b0, w1a, b1a, w1b, b1b, w2a, b2a, w2b, b2b,
                         o_ref,
                         pad0, padmp, rowmax, pool, padr,
                         *, H, W, cin, cout):
    Ho = (H - 1) // 4 + 1          # maxpool(k=5, s=4, p=2) output height
    Wo = (W - 1) // 4 + 1
    neg = jnp.finfo(jnp.float32).min

    # -------- conv (cin -> cout), 3x3, stride 1, padding 1 --------
    pad0[...] = jnp.zeros_like(pad0)
    pad0[1:H + 1, 1:W + 1, :] = x_ref[0]
    y = _conv3x3_im2col(pad0, w0, b0, H=H, W=W, cin=cin, cout=cout)

    # -------- MaxPool2d(kernel_size=5, stride=4, padding=2) --------
    # Pad with finfo.min (robust vs -inf), then 5-tap row maxes followed by
    # 5-tap column maxes; every window at these shapes contains real data.
    padmp[...] = jnp.full(padmp.shape, neg, jnp.float32)
    padmp[2:H + 2, 2:W + 2, :] = y
    for i in range(Ho):            # row-wise windowed max, stride 4
        rowmax[i:i + 1] = jnp.max(padmp[4 * i:4 * i + 5, :, :], axis=0,
                                  keepdims=True)
    for j in range(Wo):            # column-wise windowed max, stride 4
        pool[:, j:j + 1, :] = jnp.max(rowmax[:, 4 * j:4 * j + 5, :], axis=1,
                                      keepdims=True)
    x0 = pool[...]                                               # (Ho, Wo, cout)

    # -------- two residual blocks: x + conv2(relu(conv1(relu(x)))) --------
    def conv_res(v, w_ref, b_ref):
        # zero-padded conv3x3 of relu(v); the border of padr stays zero, so this
        # is exactly conv(relu(v)) with padding=1.
        padr[1:Ho + 1, 1:Wo + 1, :] = jnp.maximum(v, 0.0)
        return _conv3x3_im2col(padr, w_ref, b_ref, H=Ho, W=Wo, cin=cout, cout=cout)

    padr[...] = jnp.zeros_like(padr)
    h = conv_res(x0, w1a, b1a)
    x1 = conv_res(h, w1b, b1b) + x0

    h = conv_res(x1, w2a, b2a)
    x2 = conv_res(h, w2b, b2b) + x1

    o_ref[0] = x2.astype(o_ref.dtype)


# -----------------------------------------------------------------------------
# Wrapper: single pallas_call over the batch.
# -----------------------------------------------------------------------------
def impala_block_small_pallas(x_nhwc, params):
    N, H, W, cin = x_nhwc.shape
    cout = params["conv_w"].shape[-1]
    Ho = (H - 1) // 4 + 1
    Wo = (W - 1) // 4 + 1

    weights = [
        params["conv_w"], params["conv_b"],
        params["res1_c1_w"], params["res1_c1_b"],
        params["res1_c2_w"], params["res1_c2_b"],
        params["res2_c1_w"], params["res2_c1_b"],
        params["res2_c2_w"], params["res2_c2_b"],
    ]

    in_specs = [pl.BlockSpec((1, H, W, cin), lambda n: (n, 0, 0, 0))]
    for wb in weights:
        # Same (full) block every step -> fetched once, stays VMEM-resident.
        in_specs.append(pl.BlockSpec(wb.shape, lambda n: (0, 0)))

    kernel = functools.partial(_impala_block_kernel, H=H, W=W, cin=cin, cout=cout)

    return pl.pallas_call(
        kernel,
        out_shape=jax.ShapeDtypeStruct((N, Ho, Wo, cout), jnp.float32),
        grid=(N,),
        in_specs=in_specs,
        out_specs=pl.BlockSpec((1, Ho, Wo, cout), lambda n: (n, 0, 0, 0)),
        scratch_shapes=[
            pltpu.VMEM((H + 2, W + 2, cin), jnp.float32),     # conv1 zero-padded input
            pltpu.VMEM((H + 4, W + 4, cout), jnp.float32),    # maxpool padded input
            pltpu.VMEM((Ho, W + 4, cout), jnp.float32),       # maxpool row maxes
            pltpu.VMEM((Ho, Wo, cout), jnp.float32),          # maxpool output
            pltpu.VMEM((Ho + 2, Wo + 2, cout), jnp.float32),  # residual-conv pad buffer
        ],
        compiler_params=pltpu.CompilerParams(
            dimension_semantics=("parallel",)),               # both v7x TCs get a step
    )(x_nhwc, *weights)


# -----------------------------------------------------------------------------
# Parameter init (xavier_uniform weights, zero bias — matches the module init).
# Weights stored as (9*cin, cout) im2col matrices, biases as (1, cout).
# -----------------------------------------------------------------------------
def _xavier_conv3x3(key, cin, cout):
    fan_in, fan_out = cin * 9, cout * 9
    bound = (6.0 / (fan_in + fan_out)) ** 0.5
    w = jax.random.uniform(key, (cout, cin, 3, 3), jnp.float32, -bound, bound)
    # (cout, cin, kh, kw) -> (kh, kw, cin, cout) -> (9*cin, cout); row-major flatten
    # gives column index (dy*3 + dx)*cin + c, matching the kernel's im2col order.
    return jnp.transpose(w, (2, 3, 1, 0)).reshape(9 * cin, cout)


def init_impala_block_small(key, in_channels, out_channels):
    ks = jax.random.split(key, 5)
    zb = lambda c: jnp.zeros((1, c), jnp.float32)
    return {
        "conv_w": _xavier_conv3x3(ks[0], in_channels, out_channels),
        "conv_b": zb(out_channels),
        "res1_c1_w": _xavier_conv3x3(ks[1], out_channels, out_channels),
        "res1_c1_b": zb(out_channels),
        "res1_c2_w": _xavier_conv3x3(ks[2], out_channels, out_channels),
        "res1_c2_b": zb(out_channels),
        "res2_c1_w": _xavier_conv3x3(ks[3], out_channels, out_channels),
        "res2_c1_b": zb(out_channels),
        "res2_c2_w": _xavier_conv3x3(ks[4], out_channels, out_channels),
        "res2_c2_b": zb(out_channels),
    }


# -----------------------------------------------------------------------------
# Public forward: NCHW in / NCHW out (PyTorch convention), single fused kernel.
# -----------------------------------------------------------------------------
@jax.jit
def impala_block_small_forward(x_nchw, params):
    x = jnp.transpose(x_nchw, (0, 2, 3, 1))                   # NCHW -> NHWC
    y = impala_block_small_pallas(x, params)                  # (N, Ho, Wo, cout)
    return jnp.transpose(y, (0, 3, 1, 2))                     # NHWC -> NCHW


if __name__ == "__main__":
    key = jax.random.PRNGKey(0)
    k_x, k_p = jax.random.split(key)

    in_channels, out_channels = 4, 8
    N, H, W = 2, 16, 16
    x = jax.random.normal(k_x, (N, in_channels, H, W), dtype=jnp.float32)
    params = init_impala_block_small(k_p, in_channels, out_channels)

    out = impala_block_small_forward(x, params)
    out = jax.block_until_ready(out)

    expected_shape = (N, out_channels, 4, 4)   # H,W: 16 -> maxpool(5,4,2) -> 4
    assert out.shape == expected_shape, (out.shape, expected_shape)
    assert bool(jnp.all(jnp.isfinite(out)))
    print("KERNEL_OK")
</pallas_src>

<mosaic_0001>
module attributes {stable_mosaic.version = 11 : i64} {
  func.func @_impala_block_kernel(%arg0: i32, %arg1: memref<1x16x16x4xf32, #tpu.memory_space<vmem>>, %arg2: memref<36x8xf32, #tpu.memory_space<vmem>>, %arg3: memref<1x8xf32, #tpu.memory_space<vmem>>, %arg4: memref<72x8xf32, #tpu.memory_space<vmem>>, %arg5: memref<1x8xf32, #tpu.memory_space<vmem>>, %arg6: memref<72x8xf32, #tpu.memory_space<vmem>>, %arg7: memref<1x8xf32, #tpu.memory_space<vmem>>, %arg8: memref<72x8xf32, #tpu.memory_space<vmem>>, %arg9: memref<1x8xf32, #tpu.memory_space<vmem>>, %arg10: memref<72x8xf32, #tpu.memory_space<vmem>>, %arg11: memref<1x8xf32, #tpu.memory_space<vmem>>, %arg12: memref<1x4x4x8xf32, #tpu.memory_space<vmem>>, %arg13: memref<18x18x4xf32, #tpu.memory_space<vmem>>, %arg14: memref<20x20x8xf32, #tpu.memory_space<vmem>>, %arg15: memref<4x20x8xf32, #tpu.memory_space<vmem>>, %arg16: memref<4x4x8xf32, #tpu.memory_space<vmem>>, %arg17: memref<6x6x8xf32, #tpu.memory_space<vmem>>) attributes {dimension_semantics = [#tpu.dimension_semantics<parallel>], iteration_bounds = array<i64: 2>, scalar_prefetch = 0 : i64, scratch_operands = 5 : i64, tpu.core_type = #tpu.core_type<tc>, window_params = [{transform_indices = @transform_0, window_bounds = array<i64: 1, 16, 16, 4>}, {pipeline_mode = #tpu.pipeline_mode<synchronous>, transform_indices = @transform_1, window_bounds = array<i64: 36, 8>}, {pipeline_mode = #tpu.pipeline_mode<synchronous>, transform_indices = @transform_2, window_bounds = array<i64: 1, 8>}, {pipeline_mode = #tpu.pipeline_mode<synchronous>, transform_indices = @transform_3, window_bounds = array<i64: 72, 8>}, {pipeline_mode = #tpu.pipeline_mode<synchronous>, transform_indices = @transform_4, window_bounds = array<i64: 1, 8>}, {pipeline_mode = #tpu.pipeline_mode<synchronous>, transform_indices = @transform_5, window_bounds = array<i64: 72, 8>}, {pipeline_mode = #tpu.pipeline_mode<synchronous>, transform_indices = @transform_6, window_bounds = array<i64: 1, 8>}, {pipeline_mode = #tpu.pipeline_mode<synchronous>, transform_indices = @transform_7, window_bounds = array<i64: 72, 8>}, {pipeline_mode = #tpu.pipeline_mode<synchronous>, transform_indices = @transform_8, window_bounds = array<i64: 1, 8>}, {pipeline_mode = #tpu.pipeline_mode<synchronous>, transform_indices = @transform_9, window_bounds = array<i64: 72, 8>}, {pipeline_mode = #tpu.pipeline_mode<synchronous>, transform_indices = @transform_10, window_bounds = array<i64: 1, 8>}, {transform_indices = @transform_11, window_bounds = array<i64: 1, 4, 4, 8>}]} {
    %cst = arith.constant 0.000000e+00 : f32
    %0 = vector.broadcast %cst : f32 to vector<18x18x4xf32>
    %c0 = arith.constant 0 : index
    %c0_0 = arith.constant 0 : index
    %c0_1 = arith.constant 0 : index
    %1 = vector.load %arg13[%c0, %c0_0, %c0_1] : memref<18x18x4xf32, #tpu.memory_space<vmem>>, vector<18x18x4xf32>
    tpu.vector_store %arg13[%c0, %c0_0, %c0_1], %0 {strides = array<i32>} : memref<18x18x4xf32, #tpu.memory_space<vmem>>, vector<18x18x4xf32>,
    %c0_2 = arith.constant 0 : index
    %c0_3 = arith.constant 0 : index
    %c0_4 = arith.constant 0 : index
    %c0_5 = arith.constant 0 : index
    %2 = vector.load %arg1[%c0_2, %c0_3, %c0_4, %c0_5] : memref<1x16x16x4xf32, #tpu.memory_space<vmem>>, vector<1x16x16x4xf32>
    %3 = vector.shape_cast %2 : vector<1x16x16x4xf32> to vector<16x16x4xf32>
    %c1 = arith.constant 1 : index
    %c1_6 = arith.constant 1 : index
    %c0_7 = arith.constant 0 : index
    %4 = vector.load %arg13[%c1, %c1_6, %c0_7] : memref<18x18x4xf32, #tpu.memory_space<vmem>>, vector<16x16x4xf32>
    tpu.vector_store %arg13[%c1, %c1_6, %c0_7], %3 {strides = array<i32>} : memref<18x18x4xf32, #tpu.memory_space<vmem>>, vector<16x16x4xf32>,
    %c0_8 = arith.constant 0 : index
    %c0_9 = arith.constant 0 : index
    %c0_10 = arith.constant 0 : index
    %5 = vector.load %arg13[%c0_8, %c0_9, %c0_10] : memref<18x18x4xf32, #tpu.memory_space<vmem>>, vector<16x16x4xf32>
    %6 = vector.shape_cast %5 : vector<16x16x4xf32> to vector<256x4xf32>
    %c0_11 = arith.constant 0 : index
    %c1_12 = arith.constant 1 : index
    %c0_13 = arith.constant 0 : index
    %7 = vector.load %arg13[%c0_11, %c1_12, %c0_13] : memref<18x18x4xf32, #tpu.memory_space<vmem>>, vector<16x16x4xf32>
    %8 = vector.shape_cast %7 : vector<16x16x4xf32> to vector<256x4xf32>
    %c0_14 = arith.constant 0 : index
    %c2 = arith.constant 2 : index
    %c0_15 = arith.constant 0 : index
    %9 = vector.load %arg13[%c0_14, %c2, %c0_15] : memref<18x18x4xf32, #tpu.memory_space<vmem>>, vector<16x16x4xf32>
    %10 = vector.shape_cast %9 : vector<16x16x4xf32> to vector<256x4xf32>
    %c1_16 = arith.constant 1 : index
    %c0_17 = arith.constant 0 : index
    %c0_18 = arith.constant 0 : index
    %11 = vector.load %arg13[%c1_16, %c0_17, %c0_18] : memref<18x18x4xf32, #tpu.memory_space<vmem>>, vector<16x16x4xf32>
    %12 = vector.shape_cast %11 : vector<16x16x4xf32> to vector<256x4xf32>
    %c1_19 = arith.constant 1 : index
    %c1_20 = arith.constant 1 : index
    %c0_21 = arith.constant 0 : index
    %13 = vector.load %arg13[%c1_19, %c1_20, %c0_21] : memref<18x18x4xf32, #tpu.memory_space<vmem>>, vector<16x16x4xf32>
    %14 = vector.shape_cast %13 : vector<16x16x4xf32> to vector<256x4xf32>
    %c1_22 = arith.constant 1 : index
    %c2_23 = arith.constant 2 : index
    %c0_24 = arith.constant 0 : index
    %15 = vector.load %arg13[%c1_22, %c2_23, %c0_24] : memref<18x18x4xf32, #tpu.memory_space<vmem>>, vector<16x16x4xf32>
    %16 = vector.shape_cast %15 : vector<16x16x4xf32> to vector<256x4xf32>
    %c2_25 = arith.constant 2 : index
    %c0_26 = arith.constant 0 : index
    %c0_27 = arith.constant 0 : index
    %17 = vector.load %arg13[%c2_25, %c0_26, %c0_27] : memref<18x18x4xf32, #tpu.memory_space<vmem>>, vector<16x16x4xf32>
    %18 = vector.shape_cast %17 : vector<16x16x4xf32> to vector<256x4xf32>
    %c2_28 = arith.constant 2 : index
    %c1_29 = arith.constant 1 : index
    %c0_30 = arith.constant 0 : index
    %19 = vector.load %arg13[%c2_28, %c1_29, %c0_30] : memref<18x18x4xf32, #tpu.memory_space<vmem>>, vector<16x16x4xf32>
    %20 = vector.shape_cast %19 : vector<16x16x4xf32> to vector<256x4xf32>
    %c2_31 = arith.constant 2 : index
    %c2_32 = arith.constant 2 : index
    %c0_33 = arith.constant 0 : index
    %21 = vector.load %arg13[%c2_31, %c2_32, %c0_33] : memref<18x18x4xf32, #tpu.memory_space<vmem>>, vector<16x16x4xf32>
    %22 = vector.shape_cast %21 : vector<16x16x4xf32> to vector<256x4xf32>
    %23 = tpu.concatenate %6, %8, %10, %12, %14, %16, %18, %20, %22 in 1 : vector<256x4xf32>, vector<256x4xf32>, vector<256x4xf32>, vector<256x4xf32>, vector<256x4xf32>, vector<256x4xf32>, vector<256x4xf32>, vector<256x4xf32>, vector<256x4xf32> -> vector<256x36xf32>
    %c0_34 = arith.constant 0 : index
    %c0_35 = arith.constant 0 : index
    %24 = vector.load %arg2[%c0_34, %c0_35] : memref<36x8xf32, #tpu.memory_space<vmem>>, vector<36x8xf32>
    %cst_36 = arith.constant dense<0.000000e+00> : vector<256x8xf32>
    %25 = tpu.matmul %23, %24, %cst_36 {dimension_numbers = #tpu.dot_dimension_numbers<[1], [0], [0], [1], [0, 0, 1, 1], [], []>} : vector<256x36xf32>, vector<36x8xf32>, vector<256x8xf32> -> vector<256x8xf32>
    %c0_37 = arith.constant 0 : index
    %c0_38 = arith.constant 0 : index
    %26 = vector.load %arg3[%c0_37, %c0_38] : memref<1x8xf32, #tpu.memory_space<vmem>>, vector<1x8xf32>
    %27 = vector.broadcast %26 : vector<1x8xf32> to vector<256x8xf32>
    %28 = arith.addf %25, %27 : vector<256x8xf32>
    %29 = vector.shape_cast %28 : vector<256x8xf32> to vector<16x16x8xf32>
    %cst_39 = arith.constant -3.40282347E+38 : f32
    %30 = vector.broadcast %cst_39 : f32 to vector<20x20x8xf32>
    %c0_40 = arith.constant 0 : index
    %c0_41 = arith.constant 0 : index
    %c0_42 = arith.constant 0 : index
    %31 = vector.load %arg14[%c0_40, %c0_41, %c0_42] : memref<20x20x8xf32, #tpu.memory_space<vmem>>, vector<20x20x8xf32>
    tpu.vector_store %arg14[%c0_40, %c0_41, %c0_42], %30 {strides = array<i32>} : memref<20x20x8xf32, #tpu.memory_space<vmem>>, vector<20x20x8xf32>,
    %c2_43 = arith.constant 2 : index
    %c2_44 = arith.constant 2 : index
    %c0_45 = arith.constant 0 : index
    %32 = vector.load %arg14[%c2_43, %c2_44, %c0_45] : memref<20x20x8xf32, #tpu.memory_space<vmem>>, vector<16x16x8xf32>
    tpu.vector_store %arg14[%c2_43, %c2_44, %c0_45], %29 {strides = array<i32>} : memref<20x20x8xf32, #tpu.memory_space<vmem>>, vector<16x16x8xf32>,
    %c0_46 = arith.constant 0 : index
    %c0_47 = arith.constant 0 : index
    %c0_48 = arith.constant 0 : index
    %33 = vector.load %arg14[%c0_46, %c0_47, %c0_48] : memref<20x20x8xf32, #tpu.memory_space<vmem>>, vector<5x20x8xf32>
    %cst_49 = arith.constant dense<0xFF800000> : vector<20x8xf32>
    %34 = vector.multi_reduction <maximumf>, %33, %cst_49 [0] : vector<5x20x8xf32> to vector<20x8xf32>
    %35 = vector.shape_cast %34 : vector<20x8xf32> to vector<1x20x8xf32>
    %c0_50 = arith.constant 0 : index
    %c0_51 = arith.constant 0 : index
    %c0_52 = arith.constant 0 : index
    %36 = vector.load %arg15[%c0_50, %c0_51, %c0_52] : memref<4x20x8xf32, #tpu.memory_space<vmem>>, vector<1x20x8xf32>
    tpu.vector_store %arg15[%c0_50, %c0_51, %c0_52], %35 {strides = array<i32>} : memref<4x20x8xf32, #tpu.memory_space<vmem>>, vector<1x20x8xf32>,
    %c4 = arith.constant 4 : index
    %c0_53 = arith.constant 0 : index
    %c0_54 = arith.constant 0 : index
    %37 = vector.load %arg14[%c4, %c0_53, %c0_54] : memref<20x20x8xf32, #tpu.memory_space<vmem>>, vector<5x20x8xf32>
    %cst_55 = arith.constant dense<0xFF800000> : vector<20x8xf32>
    %38 = vector.multi_reduction <maximumf>, %37, %cst_55 [0] : vector<5x20x8xf32> to vector<20x8xf32>
    %39 = vector.shape_cast %38 : vector<20x8xf32> to vector<1x20x8xf32>
    %c1_56 = arith.constant 1 : index
    %c0_57 = arith.constant 0 : index
    %c0_58 = arith.constant 0 : index
    %40 = vector.load %arg15[%c1_56, %c0_57, %c0_58] : memref<4x20x8xf32, #tpu.memory_space<vmem>>, vector<1x20x8xf32>
    tpu.vector_store %arg15[%c1_56, %c0_57, %c0_58], %39 {strides = array<i32>} : memref<4x20x8xf32, #tpu.memory_space<vmem>>, vector<1x20x8xf32>,
    %c8 = arith.constant 8 : index
    %c0_59 = arith.constant 0 : index
    %c0_60 = arith.constant 0 : index
    %41 = vector.load %arg14[%c8, %c0_59, %c0_60] : memref<20x20x8xf32, #tpu.memory_space<vmem>>, vector<5x20x8xf32>
    %cst_61 = arith.constant dense<0xFF800000> : vector<20x8xf32>
    %42 = vector.multi_reduction <maximumf>, %41, %cst_61 [0] : vector<5x20x8xf32> to vector<20x8xf32>
    %43 = vector.shape_cast %42 : vector<20x8xf32> to vector<1x20x8xf32>
    %c2_62 = arith.constant 2 : index
    %c0_63 = arith.constant 0 : index
    %c0_64 = arith.constant 0 : index
    %44 = vector.load %arg15[%c2_62, %c0_63, %c0_64] : memref<4x20x8xf32, #tpu.memory_space<vmem>>, vector<1x20x8xf32>
    tpu.vector_store %arg15[%c2_62, %c0_63, %c0_64], %43 {strides = array<i32>} : memref<4x20x8xf32, #tpu.memory_space<vmem>>, vector<1x20x8xf32>,
    %c12 = arith.constant 12 : index
    %c0_65 = arith.constant 0 : index
    %c0_66 = arith.constant 0 : index
    %45 = vector.load %arg14[%c12, %c0_65, %c0_66] : memref<20x20x8xf32, #tpu.memory_space<vmem>>, vector<5x20x8xf32>
    %cst_67 = arith.constant dense<0xFF800000> : vector<20x8xf32>
    %46 = vector.multi_reduction <maximumf>, %45, %cst_67 [0] : vector<5x20x8xf32> to vector<20x8xf32>
    %47 = vector.shape_cast %46 : vector<20x8xf32> to vector<1x20x8xf32>
    %c3 = arith.constant 3 : index
    %c0_68 = arith.constant 0 : index
    %c0_69 = arith.constant 0 : index
    %48 = vector.load %arg15[%c3, %c0_68, %c0_69] : memref<4x20x8xf32, #tpu.memory_space<vmem>>, vector<1x20x8xf32>
    tpu.vector_store %arg15[%c3, %c0_68, %c0_69], %47 {strides = array<i32>} : memref<4x20x8xf32, #tpu.memory_space<vmem>>, vector<1x20x8xf32>,
    %c0_70 = arith.constant 0 : index
    %c0_71 = arith.constant 0 : index
    %c0_72 = arith.constant 0 : index
    %49 = vector.load %arg15[%c0_70, %c0_71, %c0_72] : memref<4x20x8xf32, #tpu.memory_space<vmem>>, vector<4x5x8xf32>
    %cst_73 = arith.constant dense<0xFF800000> : vector<4x8xf32>
    %50 = vector.multi_reduction <maximumf>, %49, %cst_73 [1] : vector<4x5x8xf32> to vector<4x8xf32>
    %51 = vector.shape_cast %50 : vector<4x8xf32> to vector<4x1x8xf32>
    %c0_74 = arith.constant 0 : index
    %c0_75 = arith.constant 0 : index
    %c0_76 = arith.constant 0 : index
    %52 = vector.load %arg16[%c0_74, %c0_75, %c0_76] : memref<4x4x8xf32, #tpu.memory_space<vmem>>, vector<4x1x8xf32>
    tpu.vector_store %arg16[%c0_74, %c0_75, %c0_76], %51 {strides = array<i32>} : memref<4x4x8xf32, #tpu.memory_space<vmem>>, vector<4x1x8xf32>,
    %c0_77 = arith.constant 0 : index
    %c4_78 = arith.constant 4 : index
    %c0_79 = arith.constant 0 : index
    %53 = vector.load %arg15[%c0_77, %c4_78, %c0_79] : memref<4x20x8xf32, #tpu.memory_space<vmem>>, vector<4x5x8xf32>
    %cst_80 = arith.constant dense<0xFF800000> : vector<4x8xf32>
    %54 = vector.multi_reduction <maximumf>, %53, %cst_80 [1] : vector<4x5x8xf32> to vector<4x8xf32>
    %55 = vector.shape_cast %54 : vector<4x8xf32> to vector<4x1x8xf32>
    %c0_81 = arith.constant 0 : index
    %c1_82 = arith.constant 1 : index
    %c0_83 = arith.constant 0 : index
    %56 = vector.load %arg16[%c0_81, %c1_82, %c0_83] : memref<4x4x8xf32, #tpu.memory_space<vmem>>, vector<4x1x8xf32>
    tpu.vector_store %arg16[%c0_81, %c1_82, %c0_83], %55 {strides = array<i32>} : memref<4x4x8xf32, #tpu.memory_space<vmem>>, vector<4x1x8xf32>,
    %c0_84 = arith.constant 0 : index
    %c8_85 = arith.constant 8 : index
    %c0_86 = arith.constant 0 : index
    %57 = vector.load %arg15[%c0_84, %c8_85, %c0_86] : memref<4x20x8xf32, #tpu.memory_space<vmem>>, vector<4x5x8xf32>
    %cst_87 = arith.constant dense<0xFF800000> : vector<4x8xf32>
    %58 = vector.multi_reduction <maximumf>, %57, %cst_87 [1] : vector<4x5x8xf32> to vector<4x8xf32>
    %59 = vector.shape_cast %58 : vector<4x8xf32> to vector<4x1x8xf32>
    %c0_88 = arith.constant 0 : index
    %c2_89 = arith.constant 2 : index
    %c0_90 = arith.constant 0 : index
    %60 = vector.load %arg16[%c0_88, %c2_89, %c0_90] : memref<4x4x8xf32, #tpu.memory_space<vmem>>, vector<4x1x8xf32>
    tpu.vector_store %arg16[%c0_88, %c2_89, %c0_90], %59 {strides = array<i32>} : memref<4x4x8xf32, #tpu.memory_space<vmem>>, vector<4x1x8xf32>,
    %c0_91 = arith.constant 0 : index
    %c12_92 = arith.constant 12 : index
    %c0_93 = arith.constant 0 : index
    %61 = vector.load %arg15[%c0_91, %c12_92, %c0_93] : memref<4x20x8xf32, #tpu.memory_space<vmem>>, vector<4x5x8xf32>
    %cst_94 = arith.constant dense<0xFF800000> : vector<4x8xf32>
    %62 = vector.multi_reduction <maximumf>, %61, %cst_94 [1] : vector<4x5x8xf32> to vector<4x8xf32>
    %63 = vector.shape_cast %62 : vector<4x8xf32> to vector<4x1x8xf32>
    %c0_95 = arith.constant 0 : index
    %c3_96 = arith.constant 3 : index
    %c0_97 = arith.constant 0 : index
    %64 = vector.load %arg16[%c0_95, %c3_96, %c0_97] : memref<4x4x8xf32, #tpu.memory_space<vmem>>, vector<4x1x8xf32>
    tpu.vector_store %arg16[%c0_95, %c3_96, %c0_97], %63 {strides = array<i32>} : memref<4x4x8xf32, #tpu.memory_space<vmem>>, vector<4x1x8xf32>,
    %c0_98 = arith.constant 0 : index
    %c0_99 = arith.constant 0 : index
    %c0_100 = arith.constant 0 : index
    %65 = vector.load %arg16[%c0_98, %c0_99, %c0_100] : memref<4x4x8xf32, #tpu.memory_space<vmem>>, vector<4x4x8xf32>
    %cst_101 = arith.constant 0.000000e+00 : f32
    %66 = vector.broadcast %cst_101 : f32 to vector<6x6x8xf32>
    %c0_102 = arith.constant 0 : index
    %c0_103 = arith.constant 0 : index
    %c0_104 = arith.constant 0 : index
    %67 = vector.load %arg17[%c0_102, %c0_103, %c0_104] : memref<6x6x8xf32, #tpu.memory_space<vmem>>, vector<6x6x8xf32>
    tpu.vector_store %arg17[%c0_102, %c0_103, %c0_104], %66 {strides = array<i32>} : memref<6x6x8xf32, #tpu.memory_space<vmem>>, vector<6x6x8xf32>,
    %cst_105 = arith.constant 0.000000e+00 : f32
    %68 = vector.broadcast %cst_105 : f32 to vector<4x4x8xf32>
    %69 = arith.maximumf %65, %68 : vector<4x4x8xf32>
    %c1_106 = arith.constant 1 : index
    %c1_107 = arith.constant 1 : index
    %c0_108 = arith.constant 0 : index
    %70 = vector.load %arg17[%c1_106, %c1_107, %c0_108] : memref<6x6x8xf32, #tpu.memory_space<vmem>>, vector<4x4x8xf32>
    tpu.vector_store %arg17[%c1_106, %c1_107, %c0_108], %69 {strides = array<i32>} : memref<6x6x8xf32, #tpu.memory_space<vmem>>, vector<4x4x8xf32>,
    %c0_109 = arith.constant 0 : index
    %c0_110 = arith.constant 0 : index
    %c0_111 = arith.constant 0 : index
    %71 = vector.load %arg17[%c0_109, %c0_110, %c0_111] : memref<6x6x8xf32, #tpu.memory_space<vmem>>, vector<4x4x8xf32>
    %72 = vector.shape_cast %71 : vector<4x4x8xf32> to vector<16x8xf32>
    %c0_112 = arith.constant 0 : index
    %c1_113 = arith.constant 1 : index
    %c0_114 = arith.constant 0 : index
    %73 = vector.load %arg17[%c0_112, %c1_113, %c0_114] : memref<6x6x8xf32, #tpu.memory_space<vmem>>, vector<4x4x8xf32>
    %74 = vector.shape_cast %73 : vector<4x4x8xf32> to vector<16x8xf32>
    %c0_115 = arith.constant 0 : index
    %c2_116 = arith.constant 2 : index
    %c0_117 = arith.constant 0 : index
    %75 = vector.load %arg17[%c0_115, %c2_116, %c0_117] : memref<6x6x8xf32, #tpu.memory_space<vmem>>, vector<4x4x8xf32>
    %76 = vector.shape_cast %75 : vector<4x4x8xf32> to vector<16x8xf32>
    %c1_118 = arith.constant 1 : index
    %c0_119 = arith.constant 0 : index
    %c0_120 = arith.constant 0 : index
    %77 = vector.load %arg17[%c1_118, %c0_119, %c0_120] : memref<6x6x8xf32, #tpu.memory_space<vmem>>, vector<4x4x8xf32>
    %78 = vector.shape_cast %77 : vector<4x4x8xf32> to vector<16x8xf32>
    %c1_121 = arith.constant 1 : index
    %c1_122 = arith.constant 1 : index
    %c0_123 = arith.constant 0 : index
    %79 = vector.load %arg17[%c1_121, %c1_122, %c0_123] : memref<6x6x8xf32, #tpu.memory_space<vmem>>, vector<4x4x8xf32>
    %80 = vector.shape_cast %79 : vector<4x4x8xf32> to vector<16x8xf32>
    %c1_124 = arith.constant 1 : index
    %c2_125 = arith.constant 2 : index
    %c0_126 = arith.constant 0 : index
    %81 = vector.load %arg17[%c1_124, %c2_125, %c0_126] : memref<6x6x8xf32, #tpu.memory_space<vmem>>, vector<4x4x8xf32>
    %82 = vector.shape_cast %81 : vector<4x4x8xf32> to vector<16x8xf32>
    %c2_127 = arith.constant 2 : index
    %c0_128 = arith.constant 0 : index
    %c0_129 = arith.constant 0 : index
    %83 = vector.load %arg17[%c2_127, %c0_128, %c0_129] : memref<6x6x8xf32, #tpu.memory_space<vmem>>, vector<4x4x8xf32>
    %84 = vector.shape_cast %83 : vector<4x4x8xf32> to vector<16x8xf32>
    %c2_130 = arith.constant 2 : index
    %c1_131 = arith.constant 1 : index
    %c0_132 = arith.constant 0 : index
    %85 = vector.load %arg17[%c2_130, %c1_131, %c0_132] : memref<6x6x8xf32, #tpu.memory_space<vmem>>, vector<4x4x8xf32>
    %86 = vector.shape_cast %85 : vector<4x4x8xf32> to vector<16x8xf32>
    %c2_133 = arith.constant 2 : index
    %c2_134 = arith.constant 2 : index
    %c0_135 = arith.constant 0 : index
    %87 = vector.load %arg17[%c2_133, %c2_134, %c0_135] : memref<6x6x8xf32, #tpu.memory_space<vmem>>, vector<4x4x8xf32>
    %88 = vector.shape_cast %87 : vector<4x4x8xf32> to vector<16x8xf32>
    %89 = tpu.concatenate %72, %74, %76, %78, %80, %82, %84, %86, %88 in 1 : vector<16x8xf32>, vector<16x8xf32>, vector<16x8xf32>, vector<16x8xf32>, vector<16x8xf32>, vector<16x8xf32>, vector<16x8xf32>, vector<16x8xf32>, vector<16x8xf32> -> vector<16x72xf32>
    %c0_136 = arith.constant 0 : index
    %c0_137 = arith.constant 0 : index
    %90 = vector.load %arg4[%c0_136, %c0_137] : memref<72x8xf32, #tpu.memory_space<vmem>>, vector<72x8xf32>
    %cst_138 = arith.constant dense<0.000000e+00> : vector<16x8xf32>
    %91 = tpu.matmul %89, %90, %cst_138 {dimension_numbers = #tpu.dot_dimension_numbers<[1], [0], [0], [1], [0, 0, 1, 1], [], []>} : vector<16x72xf32>, vector<72x8xf32>, vector<16x8xf32> -> vector<16x8xf32>
    %c0_139 = arith.constant 0 : index
    %c0_140 = arith.constant 0 : index
    %92 = vector.load %arg5[%c0_139, %c0_140] : memref<1x8xf32, #tpu.memory_space<vmem>>, vector<1x8xf32>
    %93 = vector.broadcast %92 : vector<1x8xf32> to vector<16x8xf32>
    %94 = arith.addf %91, %93 : vector<16x8xf32>
    %95 = vector.shape_cast %94 : vector<16x8xf32> to vector<4x4x8xf32>
    %cst_141 = arith.constant 0.000000e+00 : f32
    %96 = vector.broadcast %cst_141 : f32 to vector<4x4x8xf32>
    %97 = arith.maximumf %95, %96 : vector<4x4x8xf32>
    %c1_142 = arith.constant 1 : index
    %c1_143 = arith.constant 1 : index
    %c0_144 = arith.constant 0 : index
    %98 = vector.load %arg17[%c1_142, %c1_143, %c0_144] : memref<6x6x8xf32, #tpu.memory_space<vmem>>, vector<4x4x8xf32>
    tpu.vector_store %arg17[%c1_142, %c1_143, %c0_144], %97 {strides = array<i32>} : memref<6x6x8xf32, #tpu.memory_space<vmem>>, vector<4x4x8xf32>,
    %c0_145 = arith.constant 0 : index
    %c0_146 = arith.constant 0 : index
    %c0_147 = arith.constant 0 : index
    %99 = vector.load %arg17[%c0_145, %c0_146, %c0_147] : memref<6x6x8xf32, #tpu.memory_space<vmem>>, vector<4x4x8xf32>
    %100 = vector.shape_cast %99 : vector<4x4x8xf32> to vector<16x8xf32>
    %c0_148 = arith.constant 0 : index
    %c1_149 = arith.constant 1 : index
    %c0_150 = arith.constant 0 : index
    %101 = vector.load %arg17[%c0_148, %c1_149, %c0_150] : memref<6x6x8xf32, #tpu.memory_space<vmem>>, vector<4x4x8xf32>
    %102 = vector.shape_cast %101 : vector<4x4x8xf32> to vector<16x8xf32>
    %c0_151 = arith.constant 0 : index
    %c2_152 = arith.constant 2 : index
    %c0_153 = arith.constant 0 : index
    %103 = vector.load %arg17[%c0_151, %c2_152, %c0_153] : memref<6x6x8xf32, #tpu.memory_space<vmem>>, vector<4x4x8xf32>
    %104 = vector.shape_cast %103 : vector<4x4x8xf32> to vector<16x8xf32>
    %c1_154 = arith.constant 1 : index
    %c0_155 = arith.constant 0 : index
    %c0_156 = arith.constant 0 : index
    %105 = vector.load %arg17[%c1_154, %c0_155, %c0_156] : memref<6x6x8xf32, #tpu.memory_space<vmem>>, vector<4x4x8xf32>
    %106 = vector.shape_cast %105 : vector<4x4x8xf32> to vector<16x8xf32>
    %c1_157 = arith.constant 1 : index
    %c1_158 = arith.constant 1 : index
    %c0_159 = arith.constant 0 : index
    %107 = vector.load %arg17[%c1_157, %c1_158, %c0_159] : memref<6x6x8xf32, #tpu.memory_space<vmem>>, vector<4x4x8xf32>
    %108 = vector.shape_cast %107 : vector<4x4x8xf32> to vector<16x8xf32>
    %c1_160 = arith.constant 1 : index
    %c2_161 = arith.constant 2 : index
    %c0_162 = arith.constant 0 : index
    %109 = vector.load %arg17[%c1_160, %c2_161, %c0_162] : memref<6x6x8xf32, #tpu.memory_space<vmem>>, vector<4x4x8xf32>
    %110 = vector.shape_cast %109 : vector<4x4x8xf32> to vector<16x8xf32>
    %c2_163 = arith.constant 2 : index
    %c0_164 = arith.constant 0 : index
    %c0_165 = arith.constant 0 : index
    %111 = vector.load %arg17[%c2_163, %c0_164, %c0_165] : memref<6x6x8xf32, #tpu.memory_space<vmem>>, vector<4x4x8xf32>
    %112 = vector.shape_cast %111 : vector<4x4x8xf32> to vector<16x8xf32>
    %c2_166 = arith.constant 2 : index
    %c1_167 = arith.constant 1 : index
    %c0_168 = arith.constant 0 : index
    %113 = vector.load %arg17[%c2_166, %c1_167, %c0_168] : memref<6x6x8xf32, #tpu.memory_space<vmem>>, vector<4x4x8xf32>
    %114 = vector.shape_cast %113 : vector<4x4x8xf32> to vector<16x8xf32>
    %c2_169 = arith.constant 2 : index
    %c2_170 = arith.constant 2 : index
    %c0_171 = arith.constant 0 : index
    %115 = vector.load %arg17[%c2_169, %c2_170, %c0_171] : memref<6x6x8xf32, #tpu.memory_space<vmem>>, vector<4x4x8xf32>
    %116 = vector.shape_cast %115 : vector<4x4x8xf32> to vector<16x8xf32>
    %117 = tpu.concatenate %100, %102, %104, %106, %108, %110, %112, %114, %116 in 1 : vector<16x8xf32>, vector<16x8xf32>, vector<16x8xf32>, vector<16x8xf32>, vector<16x8xf32>, vector<16x8xf32>, vector<16x8xf32>, vector<16x8xf32>, vector<16x8xf32> -> vector<16x72xf32>
    %c0_172 = arith.constant 0 : index
    %c0_173 = arith.constant 0 : index
    %118 = vector.load %arg6[%c0_172, %c0_173] : memref<72x8xf32, #tpu.memory_space<vmem>>, vector<72x8xf32>
    %cst_174 = arith.constant dense<0.000000e+00> : vector<16x8xf32>
    %119 = tpu.matmul %117, %118, %cst_174 {dimension_numbers = #tpu.dot_dimension_numbers<[1], [0], [0], [1], [0, 0, 1, 1], [], []>} : vector<16x72xf32>, vector<72x8xf32>, vector<16x8xf32> -> vector<16x8xf32>
    %c0_175 = arith.constant 0 : index
    %c0_176 = arith.constant 0 : index
    %120 = vector.load %arg7[%c0_175, %c0_176] : memref<1x8xf32, #tpu.memory_space<vmem>>, vector<1x8xf32>
    %121 = vector.broadcast %120 : vector<1x8xf32> to vector<16x8xf32>
    %122 = arith.addf %119, %121 : vector<16x8xf32>
    %123 = vector.shape_cast %122 : vector<16x8xf32> to vector<4x4x8xf32>
    %124 = arith.addf %123, %65 : vector<4x4x8xf32>
    %cst_177 = arith.constant 0.000000e+00 : f32
    %125 = vector.broadcast %cst_177 : f32 to vector<4x4x8xf32>
    %126 = arith.maximumf %124, %125 : vector<4x4x8xf32>
    %c1_178 = arith.constant 1 : index
    %c1_179 = arith.constant 1 : index
    %c0_180 = arith.constant 0 : index
    %127 = vector.load %arg17[%c1_178, %c1_179, %c0_180] : memref<6x6x8xf32, #tpu.memory_space<vmem>>, vector<4x4x8xf32>
    tpu.vector_store %arg17[%c1_178, %c1_179, %c0_180], %126 {strides = array<i32>} : memref<6x6x8xf32, #tpu.memory_space<vmem>>, vector<4x4x8xf32>,
    %c0_181 = arith.constant 0 : index
    %c0_182 = arith.constant 0 : index
    %c0_183 = arith.constant 0 : index
    %128 = vector.load %arg17[%c0_181, %c0_182, %c0_183] : memref<6x6x8xf32, #tpu.memory_space<vmem>>, vector<4x4x8xf32>
    %129 = vector.shape_cast %128 : vector<4x4x8xf32> to vector<16x8xf32>
    %c0_184 = arith.constant 0 : index
    %c1_185 = arith.constant 1 : index
    %c0_186 = arith.constant 0 : index
    %130 = vector.load %arg17[%c0_184, %c1_185, %c0_186] : memref<6x6x8xf32, #tpu.memory_space<vmem>>, vector<4x4x8xf32>
    %131 = vector.shape_cast %130 : vector<4x4x8xf32> to vector<16x8xf32>
    %c0_187 = arith.constant 0 : index
    %c2_188 = arith.constant 2 : index
    %c0_189 = arith.constant 0 : index
    %132 = vector.load %arg17[%c0_187, %c2_188, %c0_189] : memref<6x6x8xf32, #tpu.memory_space<vmem>>, vector<4x4x8xf32>
    %133 = vector.shape_cast %132 : vector<4x4x8xf32> to vector<16x8xf32>
    %c1_190 = arith.constant 1 : index
    %c0_191 = arith.constant 0 : index
    %c0_192 = arith.constant 0 : index
    %134 = vector.load %arg17[%c1_190, %c0_191, %c0_192] : memref<6x6x8xf32, #tpu.memory_space<vmem>>, vector<4x4x8xf32>
    %135 = vector.shape_cast %134 : vector<4x4x8xf32> to vector<16x8xf32>
    %c1_193 = arith.constant 1 : index
    %c1_194 = arith.constant 1 : index
    %c0_195 = arith.constant 0 : index
    %136 = vector.load %arg17[%c1_193, %c1_194, %c0_195] : memref<6x6x8xf32, #tpu.memory_space<vmem>>, vector<4x4x8xf32>
    %137 = vector.shape_cast %136 : vector<4x4x8xf32> to vector<16x8xf32>
    %c1_196 = arith.constant 1 : index
    %c2_197 = arith.constant 2 : index
    %c0_198 = arith.constant 0 : index
    %138 = vector.load %arg17[%c1_196, %c2_197, %c0_198] : memref<6x6x8xf32, #tpu.memory_space<vmem>>, vector<4x4x8xf32>
    %139 = vector.shape_cast %138 : vector<4x4x8xf32> to vector<16x8xf32>
    %c2_199 = arith.constant 2 : index
    %c0_200 = arith.constant 0 : index
    %c0_201 = arith.constant 0 : index
    %140 = vector.load %arg17[%c2_199, %c0_200, %c0_201] : memref<6x6x8xf32, #tpu.memory_space<vmem>>, vector<4x4x8xf32>
    %141 = vector.shape_cast %140 : vector<4x4x8xf32> to vector<16x8xf32>
    %c2_202 = arith.constant 2 : index
    %c1_203 = arith.constant 1 : index
    %c0_204 = arith.constant 0 : index
    %142 = vector.load %arg17[%c2_202, %c1_203, %c0_204] : memref<6x6x8xf32, #tpu.memory_space<vmem>>, vector<4x4x8xf32>
    %143 = vector.shape_cast %142 : vector<4x4x8xf32> to vector<16x8xf32>
    %c2_205 = arith.constant 2 : index
    %c2_206 = arith.constant 2 : index
    %c0_207 = arith.constant 0 : index
    %144 = vector.load %arg17[%c2_205, %c2_206, %c0_207] : memref<6x6x8xf32, #tpu.memory_space<vmem>>, vector<4x4x8xf32>
    %145 = vector.shape_cast %144 : vector<4x4x8xf32> to vector<16x8xf32>
    %146 = tpu.concatenate %129, %131, %133, %135, %137, %139, %141, %143, %145 in 1 : vector<16x8xf32>, vector<16x8xf32>, vector<16x8xf32>, vector<16x8xf32>, vector<16x8xf32>, vector<16x8xf32>, vector<16x8xf32>, vector<16x8xf32>, vector<16x8xf32> -> vector<16x72xf32>
    %c0_208 = arith.constant 0 : index
    %c0_209 = arith.constant 0 : index
    %147 = vector.load %arg8[%c0_208, %c0_209] : memref<72x8xf32, #tpu.memory_space<vmem>>, vector<72x8xf32>
    %cst_210 = arith.constant dense<0.000000e+00> : vector<16x8xf32>
    %148 = tpu.matmul %146, %147, %cst_210 {dimension_numbers = #tpu.dot_dimension_numbers<[1], [0], [0], [1], [0, 0, 1, 1], [], []>} : vector<16x72xf32>, vector<72x8xf32>, vector<16x8xf32> -> vector<16x8xf32>
    %c0_211 = arith.constant 0 : index
    %c0_212 = arith.constant 0 : index
    %149 = vector.load %arg9[%c0_211, %c0_212] : memref<1x8xf32, #tpu.memory_space<vmem>>, vector<1x8xf32>
    %150 = vector.broadcast %149 : vector<1x8xf32> to vector<16x8xf32>
    %151 = arith.addf %148, %150 : vector<16x8xf32>
    %152 = vector.shape_cast %151 : vector<16x8xf32> to vector<4x4x8xf32>
    %cst_213 = arith.constant 0.000000e+00 : f32
    %153 = vector.broadcast %cst_213 : f32 to vector<4x4x8xf32>
    %154 = arith.maximumf %152, %153 : vector<4x4x8xf32>
    %c1_214 = arith.constant 1 : index
    %c1_215 = arith.constant 1 : index
    %c0_216 = arith.constant 0 : index
    %155 = vector.load %arg17[%c1_214, %c1_215, %c0_216] : memref<6x6x8xf32, #tpu.memory_space<vmem>>, vector<4x4x8xf32>
    tpu.vector_store %arg17[%c1_214, %c1_215, %c0_216], %154 {strides = array<i32>} : memref<6x6x8xf32, #tpu.memory_space<vmem>>, vector<4x4x8xf32>,
    %c0_217 = arith.constant 0 : index
    %c0_218 = arith.constant 0 : index
    %c0_219 = arith.constant 0 : index
    %156 = vector.load %arg17[%c0_217, %c0_218, %c0_219] : memref<6x6x8xf32, #tpu.memory_space<vmem>>, vector<4x4x8xf32>
    %157 = vector.shape_cast %156 : vector<4x4x8xf32> to vector<16x8xf32>
    %c0_220 = arith.constant 0 : index
    %c1_221 = arith.constant 1 : index
    %c0_222 = arith.constant 0 : index
    %158 = vector.load %arg17[%c0_220, %c1_221, %c0_222] : memref<6x6x8xf32, #tpu.memory_space<vmem>>, vector<4x4x8xf32>
    %159 = vector.shape_cast %158 : vector<4x4x8xf32> to vector<16x8xf32>
    %c0_223 = arith.constant 0 : index
    %c2_224 = arith.constant 2 : index
    %c0_225 = arith.constant 0 : index
    %160 = vector.load %arg17[%c0_223, %c2_224, %c0_225] : memref<6x6x8xf32, #tpu.memory_space<vmem>>, vector<4x4x8xf32>
    %161 = vector.shape_cast %160 : vector<4x4x8xf32> to vector<16x8xf32>
    %c1_226 = arith.constant 1 : index
    %c0_227 = arith.constant 0 : index
    %c0_228 = arith.constant 0 : index
    %162 = vector.load %arg17[%c1_226, %c0_227, %c0_228] : memref<6x6x8xf32, #tpu.memory_space<vmem>>, vector<4x4x8xf32>
    %163 = vector.shape_cast %162 : vector<4x4x8xf32> to vector<16x8xf32>
    %c1_229 = arith.constant 1 : index
    %c1_230 = arith.constant 1 : index
    %c0_231 = arith.constant 0 : index
    %164 = vector.load %arg17[%c1_229, %c1_230, %c0_231] : memref<6x6x8xf32, #tpu.memory_space<vmem>>, vector<4x4x8xf32>
    %165 = vector.shape_cast %164 : vector<4x4x8xf32> to vector<16x8xf32>
    %c1_232 = arith.constant 1 : index
    %c2_233 = arith.constant 2 : index
    %c0_234 = arith.constant 0 : index
    %166 = vector.load %arg17[%c1_232, %c2_233, %c0_234] : memref<6x6x8xf32, #tpu.memory_space<vmem>>, vector<4x4x8xf32>
    %167 = vector.shape_cast %166 : vector<4x4x8xf32> to vector<16x8xf32>
    %c2_235 = arith.constant 2 : index
    %c0_236 = arith.constant 0 : index
    %c0_237 = arith.constant 0 : index
    %168 = vector.load %arg17[%c2_235, %c0_236, %c0_237] : memref<6x6x8xf32, #tpu.memory_space<vmem>>, vector<4x4x8xf32>
    %169 = vector.shape_cast %168 : vector<4x4x8xf32> to vector<16x8xf32>
    %c2_238 = arith.constant 2 : index
    %c1_239 = arith.constant 1 : index
    %c0_240 = arith.constant 0 : index
    %170 = vector.load %arg17[%c2_238, %c1_239, %c0_240] : memref<6x6x8xf32, #tpu.memory_space<vmem>>, vector<4x4x8xf32>
    %171 = vector.shape_cast %170 : vector<4x4x8xf32> to vector<16x8xf32>
    %c2_241 = arith.constant 2 : index
    %c2_242 = arith.constant 2 : index
    %c0_243 = arith.constant 0 : index
    %172 = vector.load %arg17[%c2_241, %c2_242, %c0_243] : memref<6x6x8xf32, #tpu.memory_space<vmem>>, vector<4x4x8xf32>
    %173 = vector.shape_cast %172 : vector<4x4x8xf32> to vector<16x8xf32>
    %174 = tpu.concatenate %157, %159, %161, %163, %165, %167, %169, %171, %173 in 1 : vector<16x8xf32>, vector<16x8xf32>, vector<16x8xf32>, vector<16x8xf32>, vector<16x8xf32>, vector<16x8xf32>, vector<16x8xf32>, vector<16x8xf32>, vector<16x8xf32> -> vector<16x72xf32>
    %c0_244 = arith.constant 0 : index
    %c0_245 = arith.constant 0 : index
    %175 = vector.load %arg10[%c0_244, %c0_245] : memref<72x8xf32, #tpu.memory_space<vmem>>, vector<72x8xf32>
    %cst_246 = arith.constant dense<0.000000e+00> : vector<16x8xf32>
    %176 = tpu.matmul %174, %175, %cst_246 {dimension_numbers = #tpu.dot_dimension_numbers<[1], [0], [0], [1], [0, 0, 1, 1], [], []>} : vector<16x72xf32>, vector<72x8xf32>, vector<16x8xf32> -> vector<16x8xf32>
    %c0_247 = arith.constant 0 : index
    %c0_248 = arith.constant 0 : index
    %177 = vector.load %arg11[%c0_247, %c0_248] : memref<1x8xf32, #tpu.memory_space<vmem>>, vector<1x8xf32>
    %178 = vector.broadcast %177 : vector<1x8xf32> to vector<16x8xf32>
    %179 = arith.addf %176, %178 : vector<16x8xf32>
    %180 = vector.shape_cast %179 : vector<16x8xf32> to vector<4x4x8xf32>
    %181 = arith.addf %180, %124 : vector<4x4x8xf32>
    %c0_249 = arith.constant 0 : index
    %c0_250 = arith.constant 0 : index
    %c0_251 = arith.constant 0 : index
    %c0_252 = arith.constant 0 : index
    %182 = vector.load %arg12[%c0_249, %c0_250, %c0_251, %c0_252] : memref<1x4x4x8xf32, #tpu.memory_space<vmem>>, vector<1x4x4x8xf32>
    %183 = vector.shape_cast %182 : vector<1x4x4x8xf32> to vector<4x4x8xf32>
    %184 = vector.shape_cast %181 : vector<4x4x8xf32> to vector<1x4x4x8xf32>
    tpu.vector_store %arg12[%c0_249, %c0_250, %c0_251, %c0_252], %184 {strides = array<i32>} : memref<1x4x4x8xf32, #tpu.memory_space<vmem>>, vector<1x4x4x8xf32>,
    return
  }
  func.func @transform_0(%arg0: i32) -> (i32, i32, i32, i32) {
    %c0_i32 = arith.constant 0 : i32
    %c0_i32_0 = arith.constant 0 : i32
    %c0_i32_1 = arith.constant 0 : i32
    %c0_i32_2 = arith.constant 0 : i32
    return %arg0, %c0_i32, %c0_i32_0, %c0_i32_1 : i32, i32, i32, i32
  }
  func.func @transform_1(%arg0: i32) -> (i32, i32) {
    %c0_i32 = arith.constant 0 : i32
    %c0_i32_0 = arith.constant 0 : i32
    %c0_i32_1 = arith.constant 0 : i32
    return %c0_i32, %c0_i32_0 : i32, i32
  }
  func.func @transform_2(%arg0: i32) -> (i32, i32) {
    %c0_i32 = arith.constant 0 : i32
    %c0_i32_0 = arith.constant 0 : i32
    %c0_i32_1 = arith.constant 0 : i32
    return %c0_i32, %c0_i32_0 : i32, i32
  }
  func.func @transform_3(%arg0: i32) -> (i32, i32) {
    %c0_i32 = arith.constant 0 : i32
    %c0_i32_0 = arith.constant 0 : i32
    %c0_i32_1 = arith.constant 0 : i32
    return %c0_i32, %c0_i32_0 : i32, i32
  }
  func.func @transform_4(%arg0: i32) -> (i32, i32) {
    %c0_i32 = arith.constant 0 : i32
    %c0_i32_0 = arith.constant 0 : i32
    %c0_i32_1 = arith.constant 0 : i32
    return %c0_i32, %c0_i32_0 : i32, i32
  }
  func.func @transform_5(%arg0: i32) -> (i32, i32) {
    %c0_i32 = arith.constant 0 : i32
    %c0_i32_0 = arith.constant 0 : i32
    %c0_i32_1 = arith.constant 0 : i32
    return %c0_i32, %c0_i32_0 : i32, i32
  }
  func.func @transform_6(%arg0: i32) -> (i32, i32) {
    %c0_i32 = arith.constant 0 : i32
    %c0_i32_0 = arith.constant 0 : i32
    %c0_i32_1 = arith.constant 0 : i32
    return %c0_i32, %c0_i32_0 : i32, i32
  }
  func.func @transform_7(%arg0: i32) -> (i32, i32) {
    %c0_i32 = arith.constant 0 : i32
    %c0_i32_0 = arith.constant 0 : i32
    %c0_i32_1 = arith.constant 0 : i32
    return %c0_i32, %c0_i32_0 : i32, i32
  }
  func.func @transform_8(%arg0: i32) -> (i32, i32) {
    %c0_i32 = arith.constant 0 : i32
    %c0_i32_0 = arith.constant 0 : i32
    %c0_i32_1 = arith.constant 0 : i32
    return %c0_i32, %c0_i32_0 : i32, i32
  }
  func.func @transform_9(%arg0: i32) -> (i32, i32) {
    %c0_i32 = arith.constant 0 : i32
    %c0_i32_0 = arith.constant 0 : i32
    %c0_i32_1 = arith.constant 0 : i32
    return %c0_i32, %c0_i32_0 : i32, i32
  }
  func.func @transform_10(%arg0: i32) -> (i32, i32) {
    %c0_i32 = arith.constant 0 : i32
    %c0_i32_0 = arith.constant 0 : i32
    %c0_i32_1 = arith.constant 0 : i32
    return %c0_i32, %c0_i32_0 : i32, i32
  }
  func.func @transform_11(%arg0: i32) -> (i32, i32, i32, i32) {
    %c0_i32 = arith.constant 0 : i32
    %c0_i32_0 = arith.constant 0 : i32
    %c0_i32_1 = arith.constant 0 : i32
    %c0_i32_2 = arith.constant 0 : i32
    return %arg0, %c0_i32, %c0_i32_0, %c0_i32_1 : i32, i32, i32, i32
  }
}

</mosaic_0001>

<bundles_post_ra>
// kernel: impala_block_small_forward.1
= control target key start
LH: loop header
LB: loop body
LE: loop exit
PB: predicated region body
PF: predicated region fallthrough
CT: control target
= control target key end

     0   :  { %s6264_s0 = inlined_call_operand.vmem [shape: f32[2,16,16,4], index: 0, kind: input, shape index: {}]   ;;  %s6265_s1 = inlined_call_operand.vmem [shape: f32[36,8], index: 1, kind: input, shape index: {}]   ;;  %s6266_s2 = inlined_call_operand.vmem [shape: f32[1,8], index: 2, kind: input, shape index: {}]   ;;  %s6267_s3 = inlined_call_operand.vmem [shape: f32[72,8], index: 3, kind: input, shape index: {}]   ;;  %s6268_s4 = inlined_call_operand.vmem [shape: f32[1,8], index: 4, kind: input, shape index: {}]   ;;  %s6269_s5 = inlined_call_operand.vmem [shape: f32[72,8], index: 5, kind: input, shape index: {}]   ;;  %s6270_s6 = inlined_call_operand.vmem [shape: f32[1,8], index: 6, kind: input, shape index: {}]   ;;  %s6271_s7 = inlined_call_operand.vmem [shape: f32[72,8], index: 7, kind: input, shape index: {}]   ;;  %s6272_s8 = inlined_call_operand.vmem [shape: f32[1,8], index: 8, kind: input, shape index: {}]   ;;  %s6273_s9 = inlined_call_operand.vmem [shape: f32[72,8], index: 9, kind: input, shape index: {}]   ;;  %s6274_s10 = inlined_call_operand.vmem [shape: f32[1,8], index: 10, kind: input, shape index: {}]   ;;  %s6275_s11 = inlined_call_operand.hbm [shape: f32[2,4,4,8], index: 11, kind: output, shape index: {}]  }
   0x1   :  { %6308 = sst [smem:[#allocation17_spill]] %s6264_s0 }
   0x2   :  { %6309 = sst [smem:[#allocation18_spill]] %s6265_s1 }
   0x3   :  { %6310 = sst [smem:[#allocation19_spill]] %s6266_s2 }
   0x4   :  { %6311 = sst [smem:[#allocation20_spill]] %s6267_s3 }
   0x5   :  { %6312 = sst [smem:[#allocation21_spill]] %s6268_s4 }
   0x6   :  { %16 = vsyncpa [#allocation8], 0 }
   0x7   :  { %18 = vsyncpa [#allocation8 + $0x1], 0  ;;  %s4210_s17 = smov 0   ;;  %s4212_s18 = smov 0  }
   0x8   :  { %s4214_s19 = smov 0   ;;  %s4216_s20 = smov 0  }
   0x9 LB: > { %6313 = sst [smem:[#allocation10_spill]] %s4122_s17  ;;  %s4231_s21 = sadd.s32 4294967295, %s4134_s20   ;;  %s4134_s20 = sphi %s4216_s20, %s6343_s20   ;;  %s4130_s19 = sphi %s4214_s19, %s6345_s19   ;;  %s4126_s18 = sphi %s4212_s18, %s6347_s18   ;;  %s4122_s17 = sphi %s4210_s17, %s6346_s17  }
   0xa   : > { %6314 = sst [smem:[#allocation11_spill]] %s4130_s19  ;;  %s3939_s22 = sadd.s32 4294967294, %s4134_s20  }
   0xb   : > { %6315 = sst [smem:[#allocation12_spill]] %s4134_s20  ;;  %s4235_s23 = sadd.s32 1, %s4134_s20  }
   0xc   : > { %6316 = sst [smem:[#allocation13_spill]] %s4235_s23  ;;  %s267_s24 = sadd.s32 1, %s4130_s19 }
   0xd   : > { %s264_s25 = ssub.s32 %s4134_s20, %s4235_s23  ;;  %p277_p0 = scmp.ne.s32.totalorder %s4130_s19, %s4126_s18 }
   0xe   : > { %p265_p1 = scmp.eq.s32.totalorder %s264_s25, 0  ;;  %p278_p2 = scmp.eq.s32.totalorder %s4231_s21, 1 }
   0xf   : > { %p283_p3 = scmp.ne.s32.totalorder %s4126_s18, %s4122_s17  ;;  %p284_p4 = scmp.eq.s32.totalorder %s3939_s22, 1 }
  0x10   : > { %s4246_s26 = scalar_select %p265_p1, %s4130_s19, %s267_s24  }
  0x11   : > { %p4248_p5 = por %p278_p2, %p277_p0  ;;  %p4252_p6 = por %p284_p4, %p283_p3 }
  0x12   : > { %6317 = sst [smem:[#allocation14_spill]] %s4246_s26  ;;  %p3942_p7 = scmp.ge.s32.totalorder %s4134_s20, 1 }
  0x13   : > { %s6318_s27 = scalar_select %p4248_p5, 1, 0 }
  0x14   : > { %s6320_s28 = scalar_select %p4252_p6, 1, 0 }
  0x15   : > { %6319 = sst [smem:[#allocation15_spill]] %s6318_s27  ;;  %p340_p8 = scmp.lt.s32.totalorder %s4134_s20, 3 }
  0x16   : > { %6321 = sst [smem:[#allocation16_spill]] %s6320_s28 }
  0x17   : > { %p341_p9 = pnand %p3942_p7, %p340_p8 }
  0x18   : > { %s6286_s29 = smov (!%p341_p9), 4   ;;  %s6284_s30 = smov (!%p341_p9), 8  }
  0x19   : > { %344 = sbr.rel (%p341_p9) target bundleno = 2345 (0x929), region = 64  ;;  %p380_p10 = scmp.lt.s32.totalorder (!%p341_p9), %s4231_s21, 1 }
  0x1a   : > { %s6322_s0 = sld [smem:[#allocation17_spill]] (!%p341_p9)  ;;  %s6280_s22 = smov (!%p341_p9), 12  }
  0x1b   : > { %s6276_s24 = smov (!%p341_p9), 20   ;;  %s6278_s25 = smov (!%p341_p9), 16  }
  0x1c   : > { %s6290_s14 = smov (!%p341_p9), 32   ;;  %s6323_s1 = sld [smem:[#allocation18_spill]] (!%p341_p9) }
  0x1d   : > { %s6325_s15 = smov (!%p341_p9), 12   ;;  %s6329_s2 = sld [smem:[#allocation19_spill]] (!%p341_p9) }
  0x1e   : > { %vm385_vm0 = vcmask 31744   ;;  %v4136_v0 = vmov 0.0   ;;  %s381_s12 = scalar_select %p380_p10, %s4231_s21, 1  ;;  %vm388_vm1 = vcmask 25600   ;;  %vm2188_vm2 = vcmask 1043456  }
  0x1f   : > { %386 = vst.msk [vmem:[#allocation2] sm:$0xff] %vm385_vm0, %v4136_v0  ;;  %vm1851_vm3 = vcmask 64512   ;;  %vm1884_vm4 = vcmask 97280   ;;  %vm1917_vm5 = vcmask 130048   ;;  %vm1950_vm6 = vcmask 162816   ;;  %s6333_s3 = sld [smem:[#allocation20_spill]] }
  0x20   : > { %387 = vst.msk [vmem:[#allocation2 + $0x8] sm:$0xff] %vm385_vm0, %v4136_v0  ;;  %s3992_s13 = sshll.u32 %s381_s12, 8  ;;  %s6282_s12 = smov 24   ;;  %vm1983_vm7 = vcmask 195584   ;;  %vm2016_vm8 = vcmask 228352   ;;  %vm2049_vm9 = vcmask 261120  }
  0x21   : > { %390 = vst.msk [vmem:[#allocation2 + $0x18] sm:$0xff] %vm385_vm0, %v4136_v0  ;;  %s4329_s16 = scalar_lea.vmem %s6322_s0, %s3992_s13  ;;  %s6288_s13 = smov 28   ;;  %vm2091_vm10 = vcmask 293888   ;;  %vm2307_vm11 = vcmask 60416   ;;  %vm2589_vm12 = vcmask 61440   ;;  %vm2618_vm13 = vcmask 57344  }
  0x22   : > { %391 = vst.msk [vmem:[#allocation2 + $0x20] sm:$0xff] %vm385_vm0, %v4136_v0  ;;  %v441_v3 = vld [vmem:[%s4329_s16] sm:$0xff]  ;;  %v442_v4 = vld [vmem:[%s4329_s16 + $0x8] sm:$0xff]  ;;  %v443_v8 = vld [vmem:[%s4329_s16 + $0x10] sm:$0xff]  ;;  %vm2735_vm14 = vcmask 62464   ;;  %s6332_s0 = smov 32  }
  0x23   : > { %393 = vst.msk [vmem:[#allocation2 + $0x30] sm:$0xff] %vm385_vm0, %v4136_v0  ;;  %v444_v9 = vld [vmem:[%s4329_s16 + $0x18] sm:$0xff]  ;;  %v445_v13 = vld [vmem:[%s4329_s16 + $0x20] sm:$0xff]  ;;  %v446_v17 = vld [vmem:[%s4329_s16 + $0x28] sm:$0xff]  ;;  %s6336_s28 = smov 56   ;;  %s6337_s26 = smov 64  }
  0x24   : > { %394 = vst.msk [vmem:[#allocation2 + $0x38] sm:$0xff] %vm385_vm0, %v4136_v0  ;;  %v454_v21 = vld [vmem:[%s4329_s16 + $0x68] sm:$0xff]  ;;  %v455_v24 = vld [vmem:[%s4329_s16 + $0x70] sm:$0xff]  ;;  %v456_v25 = vld [vmem:[%s4329_s16 + $0x78] sm:$0xff]  ;;  %vm2963_vm15 = vcmask 326656   ;;  %s6338_s4 = sld [smem:[#allocation21_spill]] }
  0x25   : > { %396 = vst.msk [vmem:[#allocation2 + $0x48] sm:$0xff] %vm385_vm0, %v4136_v0  ;;  %v457_v28 = vld [vmem:[%s4329_s16 + $0x80] sm:$0xff]  ;;  %v458_v29 = vld [vmem:[%s4329_s16 + $0x88] sm:$0xff]  ;;  %v447_v40 = vld [vmem:[%s4329_s16 + $0x30] sm:$0xff]  ;;  %s4092_s27 = scalar_lea.hbm %s6275_s11, 32 }
  0x26   : > { %397 = vst.msk [vmem:[#allocation2 + $0x50] sm:$0xff] %vm385_vm0, %v4136_v0  ;;  %v2086_v42 = vld [vmem:[%s6323_s1 + $0x20] sm:$0xf]  ;;  %v2085_v43 = vld [vmem:[%s6323_s1 + $0x18] sm:$0xff]  ;;  %v2084_v44 = vld [vmem:[%s6323_s1 + $0x10] sm:$0xff] }
  0x27   : > { %v538_v1 = vld [vmem:[#allocation2 + $0x1] sm:$0xff]  ;;  %399 = vst.msk [vmem:[#allocation2 + $0x60] sm:$0xff] %vm385_vm0, %v4136_v0  ;;  %3946 = vmatpush.msk.msra.mxu0 %vm2188_vm2, %v2086_v42  ;;  %3995 = vmatpush.msk.msra.mxu2 %vm2188_vm2, %v2086_v42  ;;  %v448_v46 = vld [vmem:[%s4329_s16 + $0x38] sm:$0xff]  ;;  %v2082_v51 = vld [vmem:[%s6323_s1] sm:$0xff] }
  0x28   : > { %827 = vrot.lane.b32.xlu0 %v538_v1, %s6286_s29  ;;  %400 = vst.msk [vmem:[#allocation2 + $0x68] sm:$0xff] %vm385_vm0, %v4136_v0  ;;  %v570_v2 = vld [vmem:[#allocation2 + $0x2] sm:$0xff]  ;;  %3994 = vmatpush.msk.msra.mxu1 %vm2188_vm2, %v2086_v42  ;;  %v460_v55 = vld [vmem:[%s4329_s16 + $0x98] sm:$0xff] }
  0x29   : > { %402 = vst.msk [vmem:[#allocation2 + $0x78] sm:$0xff] %vm385_vm0, %v4136_v0  ;;  %3996 = vmatpush.msk.msra.mxu3 %vm2188_vm2, %v2086_v42  ;;  %2204 = vmatpush.msra.mxu0 %v2085_v43  ;;  %v459_v47 = vld [vmem:[%s4329_s16 + $0x90] sm:$0xff]  ;;  %v2083_v48 = vld [vmem:[%s6323_s1 + $0x8] sm:$0xff]  ;;  %s6334_s1 = smov 40   ;;  %vm2969_vm2 = vcmask 457728  }
  0x2a   : > { %403 = vst.msk [vmem:[#allocation2 + $0x80] sm:$0xff] %vm385_vm0, %v4136_v0  ;;  %3998 = vmatpush.msra.mxu2 %v2085_v43  ;;  %3997 = vmatpush.msra.mxu1 %v2085_v43  ;;  %v506_v57 = vld [vmem:[#allocation2] sm:$0xff] }
  0x2b   : > { %405 = vst.msk [vmem:[#allocation2 + $0x90] sm:$0xff] %vm385_vm0, %v4136_v0  ;;  %3999 = vmatpush.msra.mxu3 %v2085_v43  ;;  %2205 = vmatpush.msra.mxu0 %v2084_v44 }
  0x2c   : > { %406 = vst.msk [vmem:[#allocation2 + $0x98] sm:$0xff] %vm385_vm0, %v4136_v0  ;;  %4001 = vmatpush.msra.mxu2 %v2084_v44  ;;  %4000 = vmatpush.msra.mxu1 %v2084_v44 }
  0x2d   : > { %408 = vst.msk [vmem:[#allocation2 + $0xa8] sm:$0xff] %vm385_vm0, %v4136_v0  ;;  %2206 = vmatpush.msra.mxu0 %v2083_v48  ;;  %4002 = vmatpush.msra.mxu3 %v2084_v44 }
  0x2e   : > { %409 = vst.msk [vmem:[#allocation2 + $0xb0] sm:$0xff] %vm385_vm0, %v4136_v0  ;;  %4004 = vmatpush.msra.mxu2 %v2083_v48  ;;  %4003 = vmatpush.msra.mxu1 %v2083_v48 }
  0x2f   : > { %411 = vst.msk [vmem:[#allocation2 + $0xc0] sm:$0xff] %vm385_vm0, %v4136_v0  ;;  %2207 = vmatpush.msra.mxu0 %v2082_v51  ;;  %4005 = vmatpush.msra.mxu3 %v2083_v48 }
  0x30   : > { %412 = vst.msk [vmem:[#allocation2 + $0xc8] sm:$0xff] %vm385_vm0, %v4136_v0  ;;  %955 = vrot.lane.b32.xlu0 %v570_v2, %s6284_s30  ;;  %4007 = vmatpush.msra.mxu2 %v2082_v51 }
  0x31   : > { %414 = vst.msk [vmem:[#allocation2 + $0xd8] sm:$0xff] %vm385_vm0, %v4136_v0  ;;  %4006 = vmatpush.msra.mxu1 %v2082_v51  ;;  %4008 = vmatpush.msra.mxu3 %v2082_v51 }
  0x32   : > { %415 = vst.msk [vmem:[#allocation2 + $0xe0] sm:$0xff] %vm385_vm0, %v4136_v0 }
  0x33   : > { %417 = vst.msk [vmem:[#allocation2 + $0xf0] sm:$0xff] %vm385_vm0, %v4136_v0 }
  0x34   : > { %418 = vst.msk [vmem:[#allocation2 + $0xf8] sm:$0xff] %vm385_vm0, %v4136_v0 }
  0x35   : > { %420 = vst.msk [vmem:[#allocation2 + $0x108] sm:$0xff] %vm385_vm0, %v4136_v0 }
  0x36   : > { %421 = vst.msk [vmem:[#allocation2 + $0x110] sm:$0xff] %vm385_vm0, %v4136_v0 }
  0x37   : > { %423 = vst.msk [vmem:[#allocation2 + $0x120] sm:$0xff] %vm385_vm0, %v4136_v0 }
  0x38   : > { %424 = vst.msk [vmem:[#allocation2 + $0x128] sm:$0xff] %vm385_vm0, %v4136_v0 }
  0x39   : > { %426 = vst.msk [vmem:[#allocation2 + $0x138] sm:$0xff] %vm385_vm0, %v4136_v0 }
  0x3a   : > { %427 = vst.msk [vmem:[#allocation2 + $0x140] sm:$0xff] %vm385_vm0, %v4136_v0 }
  0x3b   : > { %429 = vst.msk [vmem:[#allocation2 + $0x150] sm:$0xff] %vm385_vm0, %v4136_v0 }
  0x3c   : > { %430 = vst.msk [vmem:[#allocation2 + $0x158] sm:$0xff] %vm385_vm0, %v4136_v0 }
  0x3d   : > { %432 = vst.msk [vmem:[#allocation2 + $0x168] sm:$0xff] %vm385_vm0, %v4136_v0 }
  0x3e   : > { %433 = vst.msk [vmem:[#allocation2 + $0x170] sm:$0xff] %vm385_vm0, %v4136_v0 }
  0x3f   : > { %435 = vst.msk [vmem:[#allocation2 + $0x180] sm:$0xff] %vm385_vm0, %v4136_v0 }
  0x40   : > { %436 = vst.msk [vmem:[#allocation2 + $0x188] sm:$0xff] %vm385_vm0, %v4136_v0 }
  0x41   : > { %438 = vst.msk [vmem:[#allocation2 + $0x198] sm:$0xff] %vm385_vm0, %v4136_v0 }
  0x42   : > { %439 = vst.msk [vmem:[#allocation2 + $0x1a0] sm:$0xff] %vm385_vm0, %v4136_v0 }
  0x43   : > { %392 = vst.msk [vmem:[#allocation2 + $0x28] sm:$0x3] %vm388_vm1, %v4136_v0 }
  0x44   : > { %474 = vst.msk [vmem:[#allocation2 + $0x19] sm:$0xff] %vm385_vm0, %v441_v3 }
  0x45   : > { %475 = vst.msk [vmem:[#allocation2 + $0x21] sm:$0xff] %vm385_vm0, %v442_v4 }
  0x46   : > { %389 = vst.msk [vmem:[#allocation2 + $0x10] sm:$0x3] %vm388_vm1, %v4136_v0 }
  0x47   : > { %395 = vst.msk [vmem:[#allocation2 + $0x40] sm:$0x3] %vm388_vm1, %v4136_v0 }
  0x48   : > { %398 = vst.msk [vmem:[#allocation2 + $0x58] sm:$0x3] %vm388_vm1, %v4136_v0 }
  0x49   : > { %401 = vst.msk [vmem:[#allocation2 + $0x70] sm:$0x3] %vm388_vm1, %v4136_v0 }
  0x4a   : > { %404 = vst.msk [vmem:[#allocation2 + $0x88] sm:$0x3] %vm388_vm1, %v4136_v0 }
  0x4b   : > { %407 = vst.msk [vmem:[#allocation2 + $0xa0] sm:$0x3] %vm388_vm1, %v4136_v0  ;;  %v4357_v5 = vld [vmem:[#allocation2 + $0x18] sm:$0xff] }
  0x4c   : > { %v666_v6 = vld [vmem:[#allocation2 + $0x1a] sm:$0xff]  ;;  %410 = vst.msk [vmem:[#allocation2 + $0xb8] sm:$0x3] %vm388_vm1, %v4136_v0  ;;  %1083 = vrot.lane.b32.xlu1 %v4357_v5, %s6280_s22  ;;  %v667_v19 = vld [vmem:[#allocation2 + $0x22] sm:$0xff] }
  0x4d   : > { %1339 = vrot.lane.b32.xlu2 %v666_v6, %s6276_s24  ;;  %413 = vst.msk [vmem:[#allocation2 + $0xd0] sm:$0x3] %vm388_vm1, %v4136_v0  ;;  %v634_v7 = vld [vmem:[#allocation2 + $0x19] sm:$0xff]  ;;  %v539_v14 = vld [vmem:[#allocation2 + $0x9] sm:$0xff]  ;;  %v635_v18 = vld [vmem:[#allocation2 + $0x21] sm:$0xff] }
  0x4e   : > { %416 = vst.msk [vmem:[#allocation2 + $0xe8] sm:$0x3] %vm388_vm1, %v4136_v0  ;;  %v571_v15 = vld [vmem:[#allocation2 + $0xa] sm:$0xff]  ;;  %v4403_v16 = vld [vmem:[#allocation2 + $0x20] sm:$0xff] }
  0x4f   : > { %419 = vst.msk [vmem:[#allocation2 + $0x100] sm:$0x3] %vm388_vm1, %v4136_v0 }
  0x50   : > { %422 = vst.msk [vmem:[#allocation2 + $0x118] sm:$0x3] %vm388_vm1, %v4136_v0 }
  0x51   : > { %425 = vst.msk [vmem:[#allocation2 + $0x130] sm:$0x3] %vm388_vm1, %v4136_v0 }
  0x52   : > { %428 = vst.msk [vmem:[#allocation2 + $0x148] sm:$0x3] %vm388_vm1, %v4136_v0 }
  0x53   : > { %431 = vst.msk [vmem:[#allocation2 + $0x160] sm:$0x3] %vm388_vm1, %v4136_v0 }
  0x54   : > { %434 = vst.msk [vmem:[#allocation2 + $0x178] sm:$0x3] %vm388_vm1, %v4136_v0  ;;  %1211 = vrot.lane.b32.xlu1 %v634_v7, %s6278_s25 }
  0x55   : > { %437 = vst.msk [vmem:[#allocation2 + $0x190] sm:$0x3] %vm388_vm1, %v4136_v0 }
  0x56   : > { %440 = vst.msk [vmem:[#allocation2 + $0x1a8] sm:$0x3] %vm388_vm1, %v4136_v0  ;;  %vm2966_vm1 = vcmask 392192  }
  0x57   : > { %476 = vst.msk [vmem:[#allocation2 + $0x31] sm:$0xff] %vm385_vm0, %v443_v8 }
  0x58   : > { %477 = vst.msk [vmem:[#allocation2 + $0x39] sm:$0xff] %vm385_vm0, %v444_v9  ;;  %v453_v9 = vld [vmem:[%s4329_s16 + $0x60] sm:$0xff] }
  0x59   : > { %478 = vst.msk [vmem:[#allocation2 + $0x49] sm:$0xff] %vm385_vm0, %v445_v13 }
  0x5a   : > { %479 = vst.msk [vmem:[#allocation2 + $0x51] sm:$0xff] %vm385_vm0, %v446_v17 }
  0x5b   : > { %487 = vst.msk [vmem:[#allocation2 + $0xb1] sm:$0xff] %vm385_vm0, %v454_v21  ;;  %v507_v21 = vld [vmem:[#allocation2 + $0x8] sm:$0xff] }
  0x5c   : > { %488 = vst.msk [vmem:[#allocation2 + $0xc1] sm:$0xff] %vm385_vm0, %v455_v24 }
  0x5d   : > { %489 = vst.msk [vmem:[#allocation2 + $0xc9] sm:$0xff] %vm385_vm0, %v456_v25 }
  0x5e   : > { %v4389_v10 = vld [vmem:[#allocation2 + $0x30] sm:$0xff]  ;;  %490 = vst.msk [vmem:[#allocation2 + $0xd9] sm:$0xff] %vm385_vm0, %v457_v28 }
  0x5f   : > { %v4391_v11 = vld [vmem:[#allocation2 + $0x31] sm:$0xff]  ;;  %1467 = vrot.lane.b32.xlu2 %v4389_v10, %s6282_s12  ;;  %v4419_v22 = vld [vmem:[#allocation2 + $0x39] sm:$0xff]  ;;  %491 = vst.msk [vmem:[#allocation2 + $0xe1] sm:$0xff] %vm385_vm0, %v458_v29 }
  0x60   : > { %1595 = vrot.lane.b32.xlu0 %v4391_v11, %s6288_s13  ;;  %v4397_v12 = vld [vmem:[#allocation2 + $0x32] sm:$0xff]  ;;  %v4421_v23 = vld [vmem:[#allocation2 + $0x3a] sm:$0xff]  ;;  %v4437_v26 = vld [vmem:[#allocation2 + $0x48] sm:$0xff]  ;;  %480 = vst.msk [vmem:[#allocation2 + $0x61] sm:$0xff] %vm385_vm0, %v447_v40 }
  0x61   : > { %1723 = vrot.lane.b32.xlu1 %v4397_v12, %s6290_s14  ;;  %v4411_v20 = vld [vmem:[#allocation2 + $0x38] sm:$0xff]  ;;  %v4439_v27 = vld [vmem:[#allocation2 + $0x49] sm:$0xff]  ;;  %481 = vst.msk [vmem:[#allocation2 + $0x69] sm:$0xff] %vm385_vm0, %v448_v46 }
  0x62   : > { %v4451_v30 = vld [vmem:[#allocation2 + $0x4a] sm:$0xff]  ;;  %v4459_v32 = vld [vmem:[#allocation2 + $0xb2] sm:$0xff]  ;;  %492 = vst.msk [vmem:[#allocation2 + $0xf1] sm:$0xff] %vm385_vm0, %v459_v47 }
  0x63   : > { %v4457_v31 = vld [vmem:[#allocation2 + $0xb1] sm:$0xff]  ;;  %v554_v53 = vld [vmem:[#allocation2 + $0xc1] sm:$0xff]  ;;  %493 = vst.msk [vmem:[#allocation2 + $0xf9] sm:$0xff] %vm385_vm0, %v460_v55 }
  0x64   : > { %v4467_v33 = vld [vmem:[#allocation2 + $0xc8] sm:$0xff]  ;;  %v4477_v35 = vld [vmem:[#allocation2 + $0x50] sm:$0xff]  ;;  %486 = vst.msk [vmem:[#allocation2 + $0xa9] sm:$0xff] %vm385_vm0, %v453_v9 }
  0x65   : > { %v4475_v34 = vld [vmem:[#allocation2 + $0xc9] sm:$0xff]  ;;  %v4487_v37 = vld [vmem:[#allocation2 + $0x51] sm:$0xff]  ;;  %v4550_v4 = vld [vmem:[#allocation2 + $0xd9] sm:$0xff]  ;;  %2736 = vst.msk [vmem:[#allocation6] sm:$0x3f] %vm2735_vm14, %v4136_v0 }
  0x66   : > { %v4479_v36 = vld [vmem:[#allocation2 + $0xca] sm:$0xff]  ;;  %v4489_v38 = vld [vmem:[#allocation2 + $0xe0] sm:$0xff]  ;;  %v4491_v39 = vld [vmem:[#allocation2 + $0x52] sm:$0xff]  ;;  %2737 = vst.msk [vmem:[#allocation6 + $0x8] sm:$0x3f] %vm2735_vm14, %v4136_v0 }
  0x67   : > { %829 = vrot.lane.b32.xlu2 %v539_v14, %s6286_s29  ;;  %v4512_v45 = vld [vmem:[#allocation2 + $0xe1] sm:$0xff]  ;;  %v4541_v62 = vld [vmem:[#allocation2 + $0xd8] sm:$0xff]  ;;  %2741 = vst.msk [vmem:[#allocation6 + $0x28] sm:$0x3f] %vm2735_vm14, %v4136_v0 }
  0x68   : > { %957 = vrot.lane.b32.xlu0 %v571_v15, %s6284_s30  ;;  %v4530_v52 = vld [vmem:[#allocation2 + $0xe2] sm:$0xff]  ;;  %v4567_v17 = vld [vmem:[#allocation2 + $0xda] sm:$0xff]  ;;  %2738 = vst.msk [vmem:[#allocation6 + $0x10] sm:$0x3f] %vm2735_vm14, %v4136_v0 }
  0x69   : > { %1085 = vrot.lane.b32.xlu1 %v4403_v16, %s6280_s22  ;;  %v586_v60 = vld [vmem:[#allocation2 + $0xc2] sm:$0xff]  ;;  %v4585_v43 = vld [vmem:[#allocation2 + $0xf1] sm:$0xff]  ;;  %2739 = vst.msk [vmem:[#allocation6 + $0x18] sm:$0x3f] %vm2735_vm14, %v4136_v0 }
  0x6a   : > { %2740 = vst.msk [vmem:[#allocation6 + $0x20] sm:$0x3f] %vm2735_vm14, %v4136_v0 }
  0x6f   : > { %1213 = vrot.lane.b32.xlu2 %v635_v18, %s6278_s25 }
  0x70   : > { %1341 = vrot.lane.b32.xlu0 %v667_v19, %s6276_s24 }
  0x71   : > { %1469 = vrot.lane.b32.xlu1 %v4411_v20, %s6282_s12 }
  0x77   : > { %1597 = vrot.lane.b32.xlu2 %v4419_v22, %s6288_s13 }
  0x78   : > { %1725 = vrot.lane.b32.xlu0 %v4421_v23, %s6290_s14 }
  0x79   : > { %831 = vrot.lane.b32.xlu1 %v634_v7, %s6286_s29  ;;  %v4554_v7 = vld [vmem:[#allocation2 + $0x60] sm:$0xff] }
  0x7f   : > { %959 = vrot.lane.b32.xlu2 %v666_v6, %s6284_s30 }
  0x80   : > { %1087 = vrot.lane.b32.xlu0 %v4389_v10, %s6280_s22 }
  0x81   : > { %1215 = vrot.lane.b32.xlu1 %v4391_v11, %s6278_s25 }
  0x87   : > { %1343 = vrot.lane.b32.xlu2 %v4397_v12, %s6276_s24 }
  0x88   : > { %1471 = vrot.lane.b32.xlu0 %v4437_v26, %s6282_s12 }
  0x89   : > { %1599 = vrot.lane.b32.xlu1 %v4439_v27, %s6288_s13 }
  0x8f   : > { %1727 = vrot.lane.b32.xlu2 %v4451_v30, %s6290_s14 }
  0x90   : > { %833 = vrot.lane.b32.xlu0 %v635_v18, %s6286_s29  ;;  %v4569_v18 = vld [vmem:[#allocation2 + $0x61] sm:$0xff] }
  0x91   : > { %961 = vrot.lane.b32.xlu1 %v667_v19, %s6284_s30  ;;  %v4572_v19 = vld [vmem:[#allocation2 + $0xf0] sm:$0xff] }
  0x97   : > { %857 = vrot.lane.b32.xlu2 %v4457_v31, %s6286_s29 }
  0x98   : > { %1089 = vrot.lane.b32.xlu0 %v4411_v20, %s6280_s22 }
  0x99   : > { %985 = vrot.lane.b32.xlu1 %v4459_v32, %s6284_s30  ;;  %s6326_s30 = smov 16  }
  0x9a   : > { %v828_v49 = vpop.permute.xlu0 %827 }
  0x9b   : > { %v1819_v59 = vsel %vm385_vm0, %v506_v57, %v828_v49 }
  0x9f   : > { %1217 = vrot.lane.b32.xlu2 %v4419_v22, %s6278_s25 }
  0xa0   : > { %1113 = vrot.lane.b32.xlu0 %v4467_v33, %s6280_s22  ;;  %s6327_s22 = smov 20  }
  0xa1   : > { %1345 = vrot.lane.b32.xlu1 %v4421_v23, %s6276_s24 }
  0xa2   : > { %v956_v58 = vpop.permute.xlu0 %955 }
  0xa3   : > { %v1852_v61 = vsel %vm1851_vm3, %v1819_v59, %v956_v58 }
  0xa7   : > { %1241 = vrot.lane.b32.xlu2 %v4475_v34, %s6278_s25  ;;  %v4498_v41 = vpop.permute.xlu2 %1339  ;;  %s6328_s25 = smov 24  }
  0xa8   : > { %1473 = vrot.lane.b32.xlu0 %v4477_v35, %s6282_s12 }
  0xa9   : > { %1369 = vrot.lane.b32.xlu1 %v4479_v36, %s6276_s24  ;;  %s6324_s24 = smov 8  }
  0xaf   : > { %1601 = vrot.lane.b32.xlu2 %v4487_v37, %s6288_s13 }
  0xb0   : > { %1497 = vrot.lane.b32.xlu0 %v4489_v38, %s6282_s12 }
  0xb1   : > { %1729 = vrot.lane.b32.xlu1 %v4491_v39, %s6290_s14 }
  0xb7   : > { %835 = vrot.lane.b32.xlu2 %v4391_v11, %s6286_s29 }
  0xb8   : > { %1625 = vrot.lane.b32.xlu0 %v4512_v45, %s6288_s13 }
  0xb9   : > { %963 = vrot.lane.b32.xlu1 %v4397_v12, %s6324_s24  ;;  %v1468_v50 = vpop.permute.xlu2 %1467 }
  0xbe   : > { %v1084_v54 = vpop.permute.xlu1 %1083 }
  0xbf   : > { %1753 = vrot.lane.b32.xlu2 %v4530_v52, %s6290_s14  ;;  %v1885_v1 = vsel %vm1884_vm4, %v1852_v61, %v1084_v54 }
  0xc0   : > { %859 = vrot.lane.b32.xlu0 %v554_v53, %s6286_s29 }
  0xc1   : > { %1091 = vrot.lane.b32.xlu1 %v4437_v26, %s6325_s15  ;;  %v830_v56 = vpop.permute.xlu2 %829 }
  0xc2   : > { %v1820_v24 = vsel %vm385_vm0, %v507_v21, %v830_v56 }
  0xc6   : > { %v1212_v63 = vpop.permute.xlu1 %1211 }
  0xc7   : > { %987 = vrot.lane.b32.xlu2 %v586_v60, %s6324_s24  ;;  %v1918_v3 = vsel %vm1917_vm5, %v1885_v1, %v1212_v63 }
  0xc8   : > { %1219 = vrot.lane.b32.xlu0 %v4439_v27, %s6326_s30  ;;  %v1951_v6 = vsel %vm1950_vm6, %v1918_v3, %v4498_v41  ;;  %v4582_v41 = vld [vmem:[#allocation2 + $0x62] sm:$0xff] }
  0xc9   : > { %1115 = vrot.lane.b32.xlu1 %v4541_v62, %s6325_s15  ;;  %v1214_v2 = vpop.permute.xlu2 %1213  ;;  %v1984_v8 = vsel %vm1983_vm7, %v1951_v6, %v1468_v50  ;;  %v4595_v50 = vld [vmem:[#allocation2 + $0xf2] sm:$0xff]  ;;  %v4627_v3 = vld [vmem:[#allocation2 + $0x68] sm:$0xff] }
  0xca   : > { %v4631_v6 = vld [vmem:[#allocation2 + $0x69] sm:$0xff] }
  0xcf   : > { %1347 = vrot.lane.b32.xlu2 %v4451_v30, %s6327_s22 }
  0xd0   : > { %1243 = vrot.lane.b32.xlu0 %v4550_v4, %s6326_s30 }
  0xd1   : > { %1475 = vrot.lane.b32.xlu1 %v4554_v7, %s6328_s25  ;;  %v1598_v11 = vpop.permute.xlu2 %1597 }
  0xd2   : > { %v1596_v12 = vpop.permute.xlu0 %1595 }
  0xd3   : > { %v2017_v13 = vsel %vm2016_vm8, %v1984_v8, %v1596_v12  ;;  %v1724_v14 = vpop.permute.xlu1 %1723  ;;  %v449_v8 = vld [vmem:[%s4329_s16 + $0x40] sm:$0xff] }
  0xd4   : > { %v2050_v15 = vsel %vm2049_vm9, %v2017_v13, %v1724_v14  ;;  %482 = vst.msk [vmem:[#allocation2 + $0x79] sm:$0xff] %vm385_vm0, %v449_v8  ;;  %v4641_v13 = vld [vmem:[#allocation2 + $0xf8] sm:$0xff]  ;;  %v4643_v14 = vld [vmem:[#allocation2 + $0x6a] sm:$0xff] }
  0xd5   : > { %3947 = vmatmul.msk.f32.vlgmr.msra.gmra.mxu0 %vm2091_vm10, %v2050_v15  ;;  %v461_v15 = vld [vmem:[%s4329_s16 + $0xa0] sm:$0xff] }
  0xd6   : > { %494 = vst.msk [vmem:[#allocation2 + $0x109] sm:$0xff] %vm385_vm0, %v461_v15  ;;  %v464_v15 = vld [vmem:[%s4329_s16 + $0xb8] sm:$0xff] }
  0xd7   : > { %1371 = vrot.lane.b32.xlu2 %v4567_v17, %s6327_s22  ;;  %497 = vst.msk [vmem:[#allocation2 + $0x129] sm:$0xff] %vm385_vm0, %v464_v15 }
  0xd8   : > { %1603 = vrot.lane.b32.xlu0 %v4569_v18, %s6288_s13 }
  0xd9   : > { %1499 = vrot.lane.b32.xlu1 %v4572_v19, %s6328_s25  ;;  %v960_v25 = vpop.permute.xlu2 %959 }
  0xda   : > { %v958_v28 = vpop.permute.xlu0 %957 }
  0xdb   : > { %v1086_v29 = vpop.permute.xlu1 %1085  ;;  %v1853_v40 = vsel %vm1851_vm3, %v1820_v24, %v958_v28  ;;  %v4653_v28 = vld [vmem:[#allocation2 + $0xf9] sm:$0xff] }
  0xdc   : > { %v1886_v42 = vsel %vm1884_vm4, %v1853_v40, %v1086_v29  ;;  %v4655_v29 = vld [vmem:[#allocation2 + $0xfa] sm:$0xff] }
  0xdd   : > { %v1919_v44 = vsel %vm1917_vm5, %v1886_v42, %v1214_v2  ;;  %v450_v40 = vld [vmem:[%s4329_s16 + $0x48] sm:$0xff] }
  0xde   : > { %483 = vst.msk [vmem:[#allocation2 + $0x81] sm:$0xff] %vm385_vm0, %v450_v40 }
  0xdf   : > { %1731 = vrot.lane.b32.xlu2 %v4582_v41, %s6290_s14 }
  0xe0   : > { %837 = vrot.lane.b32.xlu0 %v4419_v22, %s6286_s29 }
  0xe1   : > { %1627 = vrot.lane.b32.xlu1 %v4585_v43, %s6288_s13  ;;  %v1344_v46 = vpop.permute.xlu2 %1343 }
  0xe2   : > { %v1342_v47 = vpop.permute.xlu0 %1341 }
  0xe3   : > { %v1470_v48 = vpop.permute.xlu1 %1469  ;;  %v1952_v49 = vsel %vm1950_vm6, %v1919_v44, %v1342_v47 }
  0xe4   : > { %v1985_v51 = vsel %vm1983_vm7, %v1952_v49, %v1470_v48 }
  0xe5   : > { %v2018_v22 = vsel %vm2016_vm8, %v1985_v51, %v1598_v11  ;;  %v4735_v40 = vld [vmem:[#allocation2 + $0x81] sm:$0xff] }
  0xe7   : > { %965 = vrot.lane.b32.xlu2 %v4421_v23, %s6324_s24 }
  0xe8   : > { %1755 = vrot.lane.b32.xlu0 %v4595_v50, %s6290_s14 }
  0xe9   : > { %861 = vrot.lane.b32.xlu1 %v4475_v34, %s6286_s29  ;;  %v1728_v53 = vpop.permute.xlu2 %1727 }
  0xea   : > { %v1726_v54 = vpop.permute.xlu0 %1725 }
  0xeb   : > { %v2051_v55 = vsel %vm2049_vm9, %v2018_v22, %v1726_v54  ;;  %v832_v56 = vpop.permute.xlu1 %831  ;;  %v4677_v22 = vld [vmem:[#allocation2 + $0xb0] sm:$0xff]  ;;  %v462_v54 = vld [vmem:[%s4329_s16 + $0xa8] sm:$0xff] }
  0xec   : > { %3948 = vmatmul.msk.f32.gmra.mxu0 %vm2091_vm10, %v2051_v55  ;;  %v1821_v57 = vsel %vm385_vm0, %v4357_v5, %v832_v56  ;;  %495 = vst.msk [vmem:[#allocation2 + $0x111] sm:$0xff] %vm385_vm0, %v462_v54 }
  0xed   : > { %v1854_v23 = vsel %vm1851_vm3, %v1821_v57, %v960_v25 }
  0xef   : > { %1093 = vrot.lane.b32.xlu2 %v4477_v35, %s6325_s15 }
  0xf0   : > { %989 = vrot.lane.b32.xlu0 %v4479_v36, %s6324_s24 }
  0xf1   : > { %1221 = vrot.lane.b32.xlu1 %v4487_v37, %s6326_s30  ;;  %v858_v34 = vpop.permute.xlu2 %857 }
  0xf2   : > { %v1088_v58 = vpop.permute.xlu0 %1087 }
  0xf3   : > { %v1216_v59 = vpop.permute.xlu1 %1215  ;;  %v1887_v60 = vsel %vm1884_vm4, %v1854_v23, %v1088_v58 }
  0xf4   : > { %v1920_v61 = vsel %vm1917_vm5, %v1887_v60, %v1216_v59 }
  0xf5   : > { %v1953_v5 = vsel %vm1950_vm6, %v1920_v61, %v1344_v46 }
  0xf7   : > { %1117 = vrot.lane.b32.xlu2 %v4489_v38, %s6325_s15 }
  0xf8   : > { %1349 = vrot.lane.b32.xlu0 %v4491_v39, %s6327_s22 }
  0xf9   : > { %1245 = vrot.lane.b32.xlu1 %v4512_v45, %s6326_s30  ;;  %v1218_v35 = vpop.permute.xlu2 %1217 }
  0xfa   : > { %v1472_v36 = vpop.permute.xlu0 %1471 }
  0xfb   : > { %v1986_v63 = vsel %vm1983_vm7, %v1953_v5, %v1472_v36  ;;  %v1600_v1 = vpop.permute.xlu1 %1599  ;;  %v451_v5 = vld [vmem:[%s4329_s16 + $0x50] sm:$0xff] }
  0xfc   : > { %v2019_v2 = vsel %vm2016_vm8, %v1986_v63, %v1600_v1  ;;  %484 = vst.msk [vmem:[#allocation2 + $0x91] sm:$0xff] %vm385_vm0, %v451_v5 }
  0xfd   : > { %v2052_v38 = vsel %vm2049_vm9, %v2019_v2, %v1728_v53 }
  0xfe   : > { %3949 = vmatmul.msk.f32.gmra.mxu0 %vm2091_vm10, %v2052_v38 }
  0xff   : > { %1477 = vrot.lane.b32.xlu2 %v4627_v3, %s6328_s25 }
 0x100   : > { %1373 = vrot.lane.b32.xlu0 %v4530_v52, %s6327_s22 }
 0x101   : > { %1605 = vrot.lane.b32.xlu1 %v4631_v6, %s6288_s13  ;;  %v1242_v9 = vpop.permute.xlu2 %1241 }
 0x102   : > { %v834_v11 = vpop.permute.xlu0 %833 }
 0x103   : > { %v962_v12 = vpop.permute.xlu1 %961  ;;  %v1822_v44 = vsel %vm385_vm0, %v4403_v16, %v834_v11  ;;  %v4721_v11 = vld [vmem:[#allocation2 + $0x108] sm:$0xff] }
 0x104   : > { %v1855_v47 = vsel %vm1851_vm3, %v1822_v44, %v962_v12  ;;  %v4723_v12 = vld [vmem:[#allocation2 + $0x7a] sm:$0xff] }
 0x105   : > { %v465_v44 = vld [vmem:[%s4329_s16 + $0xc0] sm:$0xff] }
 0x106   : > { %498 = vst.msk [vmem:[#allocation2 + $0x139] sm:$0xff] %vm385_vm0, %v465_v44 }
 0x107   : > { %1501 = vrot.lane.b32.xlu2 %v4641_v13, %s6328_s25 }
 0x108   : > { %1733 = vrot.lane.b32.xlu0 %v4643_v14, %s6290_s14 }
 0x109   : > { %839 = vrot.lane.b32.xlu1 %v4439_v27, %s6286_s29  ;;  %v1602_v21 = vpop.permute.xlu2 %1601 }
 0x10a   : > { %v1090_v24 = vpop.permute.xlu0 %1089 }
 0x10b   : > { %v986_v25 = vpop.permute.xlu1 %985 }
 0x10f   : > { %1629 = vrot.lane.b32.xlu2 %v4653_v28, %s6288_s13 }
 0x110   : > { %967 = vrot.lane.b32.xlu0 %v4451_v30, %s6324_s24  ;;  %v1888_v30 = vsel %vm1884_vm4, %v1855_v47, %v1090_v24 }
 0x111   : > { %1757 = vrot.lane.b32.xlu1 %v4655_v29, %s6290_s14  ;;  %v4665_v27 = vpop.permute.xlu2 %835  ;;  %v1921_v16 = vsel %vm1917_vm5, %v1888_v30, %v1218_v35  ;;  %v452_v35 = vld [vmem:[%s4329_s16 + $0x58] sm:$0xff] }
 0x112   : > { %v1114_v42 = vpop.permute.xlu0 %1113  ;;  %485 = vst.msk [vmem:[#allocation2 + $0x99] sm:$0xff] %vm385_vm0, %v452_v35  ;;  %v4841_v35 = vld [vmem:[%s6329_s2] ss:$0 sm:$0xff] }
 0x113   : > { %v1346_v46 = vpop.permute.xlu1 %1345 }
 0x114   : > { %v1954_v53 = vsel %vm1950_vm6, %v1921_v16, %v1346_v46  ;;  %v4145_v46 = vmov -3.4028235e+38  }
 0x115   : > { %2305 = vst.msk [vmem:[#allocation3] sm:$0xff] %vm1851_vm3, %v4145_v46 }
 0x116   : > { %2312 = vst.msk [vmem:[#allocation3 + $0x30] sm:$0xff] %vm1851_vm3, %v4145_v46 }
 0x117   : > { %863 = vrot.lane.b32.xlu2 %v4550_v4, %s6286_s29  ;;  %v1834_v4 = vsel %vm385_vm0, %v4677_v22, %v858_v34  ;;  %2313 = vst.msk [vmem:[#allocation3 + $0x38] sm:$0xff] %vm1851_vm3, %v4145_v46 }
 0x118   : > { %1095 = vrot.lane.b32.xlu0 %v4554_v7, %s6325_s15  ;;  %v1867_v7 = vsel %vm1851_vm3, %v1834_v4, %v986_v25  ;;  %2306 = vst.msk [vmem:[#allocation3 + $0x8] sm:$0xff] %vm1851_vm3, %v4145_v46 }
 0x119   : > { %991 = vrot.lane.b32.xlu1 %v4567_v17, %s6324_s24  ;;  %v1754_v48 = vpop.permute.xlu2 %1753  ;;  %v463_v17 = vld [vmem:[%s4329_s16 + $0xb0] sm:$0xff]  ;;  %v1900_v23 = vsel %vm1884_vm4, %v1867_v7, %v1114_v42  ;;  %2309 = vst.msk [vmem:[#allocation3 + $0x18] sm:$0xff] %vm1851_vm3, %v4145_v46 }
 0x11a   : > { %v1474_v49 = vpop.permute.xlu0 %1473  ;;  %496 = vst.msk [vmem:[#allocation2 + $0x121] sm:$0xff] %vm385_vm0, %v463_v17  ;;  %v1933_v60 = vsel %vm1917_vm5, %v1900_v23, %v1242_v9  ;;  %v4719_v9 = vld [vmem:[#allocation2 + $0x79] sm:$0xff]  ;;  %v4737_v42 = vld [vmem:[#allocation2 + $0x109] sm:$0xff] }
 0x11b   : > { %v1370_v51 = vpop.permute.xlu1 %1369  ;;  %v1987_v55 = vsel %vm1983_vm7, %v1954_v53, %v1474_v49  ;;  %v4759_v49 = vld [vmem:[#allocation2 + $0x10a] sm:$0xff]  ;;  %2310 = vst.msk [vmem:[#allocation3 + $0x20] sm:$0xff] %vm1851_vm3, %v4145_v46  ;;  %v4805_v17 = vld [vmem:[#allocation2 + $0xc0] sm:$0xff] }
 0x11c   : > { %v2020_v58 = vsel %vm2016_vm8, %v1987_v55, %v1602_v21  ;;  %v1966_v61 = vsel %vm1950_vm6, %v1933_v60, %v1370_v51  ;;  %v1823_v51 = vsel %vm385_vm0, %v4389_v10, %v4665_v27  ;;  %2315 = vst.msk [vmem:[#allocation3 + $0x48] sm:$0xff] %vm1851_vm3, %v4145_v46 }
 0x11d   : > { %2316 = vst.msk [vmem:[#allocation3 + $0x50] sm:$0xff] %vm1851_vm3, %v4145_v46 }
 0x11e   : > { %2318 = vst.msk [vmem:[#allocation3 + $0x60] sm:$0xff] %vm1851_vm3, %v4145_v46 }
 0x11f   : > { %1223 = vrot.lane.b32.xlu2 %v4569_v18, %s6326_s30  ;;  %2319 = vst.msk [vmem:[#allocation3 + $0x68] sm:$0xff] %vm1851_vm3, %v4145_v46 }
 0x120   : > { %1119 = vrot.lane.b32.xlu0 %v4572_v19, %s6325_s15  ;;  %v4700_v19 = vld [vmem:[#allocation2 + $0x78] sm:$0xff]  ;;  %2321 = vst.msk [vmem:[#allocation3 + $0x78] sm:$0xff] %vm1851_vm3, %v4145_v46 }
 0x121   : > { %1351 = vrot.lane.b32.xlu1 %v4582_v41, %s6327_s22  ;;  %v4694_v56 = vpop.permute.xlu2 %987  ;;  %2322 = vst.msk [vmem:[#allocation3 + $0x80] sm:$0xff] %vm1851_vm3, %v4145_v46  ;;  %v4789_v54 = vld [vmem:[#allocation2 + $0x121] sm:$0xff] }
 0x122   : > { %v1498_v57 = vpop.permute.xlu0 %1497  ;;  %2324 = vst.msk [vmem:[#allocation3 + $0x90] sm:$0xff] %vm1851_vm3, %v4145_v46  ;;  %v4826_v60 = vld [vmem:[#allocation2 + $0x122] sm:$0xff] }
 0x123   : > { %v1730_v34 = vpop.permute.xlu1 %1729  ;;  %v1999_v36 = vsel %vm1983_vm7, %v1966_v61, %v1498_v57  ;;  %2325 = vst.msk [vmem:[#allocation3 + $0x98] sm:$0xff] %vm1851_vm3, %v4145_v46 }
 0x124   : > { %v2053_v59 = vsel %vm2049_vm9, %v2020_v58, %v1730_v34  ;;  %2327 = vst.msk [vmem:[#allocation3 + $0xa8] sm:$0xff] %vm1851_vm3, %v4145_v46 }
 0x125   : > { %3950 = vmatmul.msk.f32.gmra.mxu0 %vm2091_vm10, %v2053_v59  ;;  %2328 = vst.msk [vmem:[#allocation3 + $0xb0] sm:$0xff] %vm1851_vm3, %v4145_v46  ;;  %v613_v59 = vld [vmem:[#allocation2 + $0x98] sm:$0xff] }
 0x126   : > { %2330 = vst.msk [vmem:[#allocation3 + $0xc0] sm:$0xff] %vm1851_vm3, %v4145_v46 }
 0x127   : > { %1247 = vrot.lane.b32.xlu2 %v4585_v43, %s6326_s30  ;;  %2331 = vst.msk [vmem:[#allocation3 + $0xc8] sm:$0xff] %vm1851_vm3, %v4145_v46 }
 0x128   : > { %1479 = vrot.lane.b32.xlu0 %v4700_v19, %s6328_s25  ;;  %2333 = vst.msk [vmem:[#allocation3 + $0xd8] sm:$0xff] %vm1851_vm3, %v4145_v46 }
 0x129   : > { %1375 = vrot.lane.b32.xlu1 %v4595_v50, %s6327_s22  ;;  %v1348_v63 = vpop.permute.xlu2 %1347  ;;  %2334 = vst.msk [vmem:[#allocation3 + $0xe0] sm:$0xff] %vm1851_vm3, %v4145_v46 }
 0x12a   : > { %v1626_v1 = vpop.permute.xlu0 %1625  ;;  %2336 = vst.msk [vmem:[#allocation3 + $0xf0] sm:$0xff] %vm1851_vm3, %v4145_v46 }
 0x12b   : > { %v2032_v2 = vsel %vm2016_vm8, %v1999_v36, %v1626_v1  ;;  %v964_v38 = vpop.permute.xlu1 %963  ;;  %2337 = vst.msk [vmem:[#allocation3 + $0xf8] sm:$0xff] %vm1851_vm3, %v4145_v46 }
 0x12c   : > { %v2065_v8 = vsel %vm2049_vm9, %v2032_v2, %v1754_v48  ;;  %v1856_v16 = vsel %vm1851_vm3, %v1823_v51, %v964_v38  ;;  %2339 = vst.msk [vmem:[#allocation3 + $0x108] sm:$0xff] %vm1851_vm3, %v4145_v46  ;;  %v4861_v38 = vld [vmem:[#allocation2 + $0x99] sm:$0xff] }
 0x12d   : > { %3962 = vmatmul.msk.f32.vlgmr.msra.gmra.mxu2 %vm2091_vm10, %v2065_v8  ;;  %2340 = vst.msk [vmem:[#allocation3 + $0x110] sm:$0xff] %vm1851_vm3, %v4145_v46 }
 0x12e   : > { %2342 = vst.msk [vmem:[#allocation3 + $0x120] sm:$0xff] %vm1851_vm3, %v4145_v46 }
 0x12f   : > { %1607 = vrot.lane.b32.xlu2 %v4719_v9, %s6288_s13  ;;  %2343 = vst.msk [vmem:[#allocation3 + $0x128] sm:$0xff] %vm1851_vm3, %v4145_v46 }
 0x130   : > { %1503 = vrot.lane.b32.xlu0 %v4721_v11, %s6328_s25  ;;  %2345 = vst.msk [vmem:[#allocation3 + $0x138] sm:$0xff] %vm1851_vm3, %v4145_v46 }
 0x131   : > { %1735 = vrot.lane.b32.xlu1 %v4723_v12, %s6290_s14  ;;  %v4733_v21 = vpop.permute.xlu2 %1371  ;;  %2346 = vst.msk [vmem:[#allocation3 + $0x140] sm:$0xff] %vm1851_vm3, %v4145_v46 }
 0x132   : > { %v860_v24 = vpop.permute.xlu0 %859  ;;  %2348 = vst.msk [vmem:[#allocation3 + $0x150] sm:$0xff] %vm1851_vm3, %v4145_v46 }
 0x133   : > { %v1092_v25 = vpop.permute.xlu1 %1091  ;;  %v1835_v58 = vsel %vm385_vm0, %v4805_v17, %v860_v24  ;;  %2349 = vst.msk [vmem:[#allocation3 + $0x158] sm:$0xff] %vm1851_vm3, %v4145_v46 }
 0x134   : > { %v1889_v53 = vsel %vm1884_vm4, %v1856_v16, %v1092_v25  ;;  %v1868_v61 = vsel %vm1851_vm3, %v1835_v58, %v4694_v56  ;;  %2351 = vst.msk [vmem:[#allocation3 + $0x168] sm:$0xff] %vm1851_vm3, %v4145_v46  ;;  %v466_v58 = vld [vmem:[%s4329_s16 + $0xc8] sm:$0xff] }
 0x135   : > { %2352 = vst.msk [vmem:[#allocation3 + $0x170] sm:$0xff] %vm1851_vm3, %v4145_v46 }
 0x136   : > { %2354 = vst.msk [vmem:[#allocation3 + $0x180] sm:$0xff] %vm1851_vm3, %v4145_v46 }
 0x137   : > { %841 = vrot.lane.b32.xlu2 %v4487_v37, %s6286_s29  ;;  %v4755_v37 = vld [vmem:[#allocation2 + $0x82] sm:$0xff]  ;;  %2355 = vst.msk [vmem:[#allocation3 + $0x188] sm:$0xff] %vm1851_vm3, %v4145_v46 }
 0x138   : > { %849 = vrot.lane.b32.xlu0 %v4735_v40, %s6286_s29  ;;  %2308 = vst.msk [vmem:[#allocation3 + $0x10] sm:$0xf] %vm2307_vm11, %v4145_v46 }
 0x139   : > { %1631 = vrot.lane.b32.xlu1 %v4737_v42, %s6288_s13  ;;  %v1732_v47 = vpop.permute.xlu2 %1731  ;;  %2314 = vst.msk [vmem:[#allocation3 + $0x40] sm:$0xf] %vm2307_vm11, %v4145_v46 }
 0x13a   : > { %v1220_v30 = vpop.permute.xlu0 %1219  ;;  %2311 = vst.msk [vmem:[#allocation3 + $0x28] sm:$0xf] %vm2307_vm11, %v4145_v46 }
 0x13b   : > { %v1116_v48 = vpop.permute.xlu1 %1115  ;;  %v1922_v4 = vsel %vm1917_vm5, %v1889_v53, %v1220_v30  ;;  %v626_v30 = vld [vmem:[#allocation2 + $0x138] sm:$0xff]  ;;  %2317 = vst.msk [vmem:[#allocation3 + $0x58] sm:$0xf] %vm2307_vm11, %v4145_v46 }
 0x13c   : > { %v1955_v7 = vsel %vm1950_vm6, %v1922_v4, %v1348_v63  ;;  %v1901_v5 = vsel %vm1884_vm4, %v1868_v61, %v1116_v48  ;;  %v4886_v48 = vld [vmem:[#allocation2 + $0x9a] sm:$0xff]  ;;  %2320 = vst.msk [vmem:[#allocation3 + $0x70] sm:$0xf] %vm2307_vm11, %v4145_v46 }
 0x13d   : > { %v4901_v53 = vld [vmem:[#allocation2 + $0x139] sm:$0xff]  ;;  %2323 = vst.msk [vmem:[#allocation3 + $0x88] sm:$0xf] %vm2307_vm11, %v4145_v46 }
 0x13e   : > { %2326 = vst.msk [vmem:[#allocation3 + $0xa0] sm:$0xf] %vm2307_vm11, %v4145_v46 }
 0x13f   : > { %969 = vrot.lane.b32.xlu2 %v4491_v39, %s6324_s24  ;;  %2329 = vst.msk [vmem:[#allocation3 + $0xb8] sm:$0xf] %vm2307_vm11, %v4145_v46 }
 0x140   : > { %977 = vrot.lane.b32.xlu0 %v4755_v37, %s6324_s24  ;;  %2332 = vst.msk [vmem:[#allocation3 + $0xd0] sm:$0xf] %vm2307_vm11, %v4145_v46 }
 0x141   : > { %1759 = vrot.lane.b32.xlu1 %v4759_v49, %s6290_s14  ;;  %v4780_v10 = vpop.permute.xlu2 %965  ;;  %2335 = vst.msk [vmem:[#allocation3 + $0xe8] sm:$0xf] %vm2307_vm11, %v4145_v46 }
 0x142   : > { %v1244_v27 = vpop.permute.xlu0 %1243  ;;  %2338 = vst.msk [vmem:[#allocation3 + $0x100] sm:$0xf] %vm2307_vm11, %v4145_v46 }
 0x143   : > { %v1476_v39 = vpop.permute.xlu1 %1475  ;;  %2341 = vst.msk [vmem:[#allocation3 + $0x118] sm:$0xf] %vm2307_vm11, %v4145_v46 }
 0x144   : > { %v1988_v55 = vsel %vm1983_vm7, %v1955_v7, %v1476_v39  ;;  %2344 = vst.msk [vmem:[#allocation3 + $0x130] sm:$0xf] %vm2307_vm11, %v4145_v46 }
 0x145   : > { %2347 = vst.msk [vmem:[#allocation3 + $0x148] sm:$0xf] %vm2307_vm11, %v4145_v46 }
 0x146   : > { %2350 = vst.msk [vmem:[#allocation3 + $0x160] sm:$0xf] %vm2307_vm11, %v4145_v46 }
 0x147   : > { %865 = vrot.lane.b32.xlu2 %v4512_v45, %s6286_s29  ;;  %2353 = vst.msk [vmem:[#allocation3 + $0x178] sm:$0xf] %vm2307_vm11, %v4145_v46 }
 0x148   : > { %875 = vrot.lane.b32.xlu0 %v4789_v54, %s6286_s29  ;;  %2356 = vst.msk [vmem:[#allocation3 + $0x190] sm:$0xf] %vm2307_vm11, %v4145_v46  ;;  %v468_v46 = vld [vmem:[%s4329_s16 + $0xd8] sm:$0xff]  ;;  %s6330_s29 = smov 4  }
 0x149   : > { %1097 = vrot.lane.b32.xlu1 %v4627_v3, %s6325_s15  ;;  %v4811_v57 = vpop.permute.xlu2 %1093  ;;  %499 = vst.msk [vmem:[#allocation2 + $0x141] sm:$0xff] %vm385_vm0, %v466_v58  ;;  %v5037_v58 = vld [vmem:[#allocation2 + $0x129] sm:$0xff] }
 0x14a   : > { %v1604_v23 = vpop.permute.xlu0 %1603  ;;  %501 = vst.msk [vmem:[#allocation2 + $0x159] sm:$0xff] %vm385_vm0, %v468_v46 }
 0x14b   : > { %v2021_v45 = vsel %vm2016_vm8, %v1988_v55, %v1604_v23  ;;  %v1500_v34 = vpop.permute.xlu1 %1499 }
 0x14c   : > { %v2054_v3 = vsel %vm2049_vm9, %v2021_v45, %v1732_v47 }
 0x14d   : > { %3951 = vmatmul.msk.f32.gmra.mxu0 %vm2091_vm10, %v2054_v3  ;;  %v467_v3 = vld [vmem:[%s4329_s16 + $0xd0] sm:$0xff] }
 0x14e   : > { %500 = vst.msk [vmem:[#allocation2 + $0x151] sm:$0xff] %vm385_vm0, %v467_v3 }
 0x14f   : > { %1105 = vrot.lane.b32.xlu2 %v613_v59, %s6325_s15 }
 0x150   : > { %993 = vrot.lane.b32.xlu0 %v4530_v52, %s6324_s24  ;;  %v1934_v52 = vsel %vm1917_vm5, %v1901_v5, %v1244_v27 }
 0x151   : > { %1003 = vrot.lane.b32.xlu1 %v4826_v60, %s6324_s24  ;;  %v4849_v56 = vpop.permute.xlu2 %1117  ;;  %v1967_v8 = vsel %vm1950_vm6, %v1934_v52, %v4733_v21 }
 0x152   : > { %v838_v36 = vpop.permute.xlu0 %837  ;;  %v2209_v63 = vpop.f32.mrf.mxu0  ;;  %v2000_v15 = vsel %vm1983_vm7, %v1967_v8, %v1500_v34 }
 0x153   : > { %v1628_v1 = vpop.permute.xlu1 %1627  ;;  %v2210_v2 = vadd.f32 %v4841_v35, %v2209_v63  ;;  %v1824_v39 = vsel %vm385_vm0, %v4411_v20, %v838_v36 }
 0x154   : > { %v2033_v24 = vsel %vm2016_vm8, %v2000_v15, %v1628_v1  ;;  %v1857_v23 = vsel %vm1851_vm3, %v1824_v39, %v4780_v10  ;;  %v4977_v15 = vld [vmem:[#allocation2 + $0x13a] sm:$0xff] }
 0x155   : > { %2367 = vst.msk [vmem:[#allocation3 + $0x32] sm:$0xff] %vm1851_vm3, %v2210_v2  ;;  %v1890_v20 = vsel %vm1884_vm4, %v1857_v23, %v4811_v57  ;;  %v5005_v39 = vld [vmem:[#allocation2 + $0x151] sm:$0xff] }
 0x156   : > { %v5019_v23 = vld [vmem:[#allocation2 + $0x112] sm:$0xff] }
 0x157   : > { %1225 = vrot.lane.b32.xlu2 %v4631_v6, %s6326_s30 }
 0x158   : > { %1233 = vrot.lane.b32.xlu0 %v4861_v38, %s6326_s30 }
 0x159   : > { %1121 = vrot.lane.b32.xlu1 %v4641_v13, %s6325_s15  ;;  %v1478_v21 = vpop.permute.xlu2 %1477 }
 0x15a   : > { %v1756_v25 = vpop.permute.xlu0 %1755 }
 0x15b   : > { %v2066_v44 = vsel %vm2049_vm9, %v2033_v24, %v1756_v25  ;;  %v862_v47 = vpop.permute.xlu1 %861 }
 0x15c   : > { %3963 = vmatmul.msk.f32.gmra.mxu2 %vm2091_vm10, %v2066_v44  ;;  %v1836_v34 = vsel %vm385_vm0, %v4467_v33, %v862_v47 }
 0x15f   : > { %1131 = vrot.lane.b32.xlu2 %v626_v30, %s6325_s15  ;;  %v4993_v30 = vld [vmem:[#allocation2 + $0x110] sm:$0xff] }
 0x160   : > { %1353 = vrot.lane.b32.xlu0 %v4643_v14, %s6327_s22  ;;  %v4907_v14 = vld [vmem:[#allocation2 + $0x80] sm:$0xff] }
 0x161   : > { %1361 = vrot.lane.b32.xlu1 %v4886_v48, %s6327_s22  ;;  %v4893_v13 = vpop.permute.xlu2 %1501 }
 0x162   : > { %v990_v51 = vpop.permute.xlu0 %989 }
 0x163   : > { %v1222_v16 = vpop.permute.xlu1 %1221  ;;  %v1869_v59 = vsel %vm1851_vm3, %v1836_v34, %v990_v51  ;;  %v5033_v34 = vld [vmem:[#allocation2 + $0x92] sm:$0xff] }
 0x164   : > { %v1923_v10 = vsel %vm1917_vm5, %v1890_v20, %v1222_v16  ;;  %v1902_v5 = vsel %vm1884_vm4, %v1869_v59, %v4849_v56  ;;  %v4982_v56 = vld [vmem:[#allocation2 + $0x150] sm:$0xff] }
 0x165   : > { %v4996_v16 = vld [vmem:[#allocation2 + $0x91] sm:$0xff] }
 0x166   : > { %v5021_v20 = vld [vmem:[#allocation2 + $0x152] sm:$0xff] }
 0x167   : > { %1249 = vrot.lane.b32.xlu2 %v4653_v28, %s6326_s30 }
 0x168   : > { %1259 = vrot.lane.b32.xlu0 %v4901_v53, %s6326_s30 }
 0x169   : > { %v2212_v27 = vpop.f32.mrf.mxu0  ;;  %1481 = vrot.lane.b32.xlu1 %v4907_v14, %s6328_s25  ;;  %v1630_v4 = vpop.permute.xlu2 %1629 }
 0x16a   : > { %v2213_v7 = vadd.f32 %v4841_v35, %v2212_v27  ;;  %v1350_v28 = vpop.permute.xlu0 %1349 }
 0x16b   : > { %v1246_v55 = vpop.permute.xlu1 %1245 }
 0x16c   : > { %2368 = vst.msk [vmem:[#allocation3 + $0x3a] sm:$0xff] %vm1851_vm3, %v2213_v7  ;;  %v1935_v36 = vsel %vm1917_vm5, %v1902_v5, %v1246_v55 }
 0x16f   : > { %1489 = vrot.lane.b32.xlu2 %v4677_v22, %s6328_s25 }
 0x170   : > { %1377 = vrot.lane.b32.xlu0 %v4655_v29, %s6327_s22  ;;  %v1956_v29 = vsel %vm1950_vm6, %v1923_v10, %v1350_v28  ;;  %v5015_v28 = vld [vmem:[#allocation2 + $0x111] sm:$0xff] }
 0x171   : > { %v4950_v45 = vpop.permute.xlu2 %863  ;;  %v1989_v61 = vsel %vm1983_vm7, %v1956_v29, %v1478_v21  ;;  %1387 = vrot.lane.b32.xlu1 %v4977_v15, %s6327_s22 }
 0x172   : > { %v1374_v57 = vpop.permute.xlu0 %1373 }
 0x173   : > { %v1606_v22 = vpop.permute.xlu1 %1605  ;;  %v1968_v8 = vsel %vm1950_vm6, %v1935_v36, %v1374_v57 }
 0x174   : > { %v2022_v33 = vsel %vm2016_vm8, %v1989_v61, %v1606_v22  ;;  %v2001_v24 = vsel %vm1983_vm7, %v1968_v8, %v4893_v13 }
 0x175   : > { %v2034_v47 = vsel %vm2016_vm8, %v2001_v24, %v1630_v4  ;;  %v5070_v24 = vld [vmem:[#allocation2 + $0xa8] sm:$0xff] }
 0x177   : > { %1609 = vrot.lane.b32.xlu2 %v4735_v40, %s6288_s13 }
 0x178   : > { %1617 = vrot.lane.b32.xlu0 %v4457_v31, %s6288_s13 }
 0x179   : > { %v1224_v52 = vpop.permute.xlu2 %1223  ;;  %1505 = vrot.lane.b32.xlu1 %v4993_v30, %s6328_s25 }
 0x17a   : > { %v1734_v63 = vpop.permute.xlu0 %1733 }
 0x17b   : > { %v2055_v1 = vsel %vm2049_vm9, %v2022_v33, %v1734_v63  ;;  %v840_v40 = vpop.permute.xlu1 %839  ;;  %v2215_v2 = vpop.f32.mrf.mxu0  ;;  %v5051_v63 = vld [vmem:[#allocation2 + $0x12a] sm:$0xff] }
 0x17c   : > { %3952 = vmatmul.msk.f32.gmra.mxu0 %vm2091_vm10, %v2055_v1  ;;  %v2216_v31 = vadd.f32 %v4841_v35, %v2215_v2  ;;  %v1825_v55 = vsel %vm385_vm0, %v4437_v26, %v840_v40 }
 0x17e   : > { %2369 = vst.msk [vmem:[#allocation3 + $0x4a] sm:$0xff] %vm1851_vm3, %v2216_v31 }
 0x17f   : > { %1515 = vrot.lane.b32.xlu2 %v4982_v56, %s6328_s25 }
 0x180   : > { %1737 = vrot.lane.b32.xlu0 %v4755_v37, %s6290_s14 }
 0x181   : > { %v4990_v21 = vpop.permute.xlu2 %1247  ;;  %1745 = vrot.lane.b32.xlu1 %v4459_v32, %s6290_s14 }
 0x182   : > { %v968_v25 = vpop.permute.xlu0 %967 }
 0x183   : > { %v1758_v44 = vpop.permute.xlu1 %1757  ;;  %v1858_v32 = vsel %vm1851_vm3, %v1825_v55, %v968_v25  ;;  %v5105_v55 = vld [vmem:[#allocation2 + $0x141] sm:$0xff] }
 0x184   : > { %v2067_v51 = vsel %vm2049_vm9, %v2034_v47, %v1758_v44 }
 0x185   : > { %3964 = vmatmul.msk.f32.gmra.mxu2 %vm2091_vm10, %v2067_v51 }
 0x187   : > { %843 = vrot.lane.b32.xlu2 %v4569_v18, %s6330_s29 }
 0x188   : > { %851 = vrot.lane.b32.xlu0 %v4996_v16, %s6330_s29 }
 0x189   : > { %v1608_v37 = vpop.permute.xlu2 %1607  ;;  %1633 = vrot.lane.b32.xlu1 %v5015_v28, %s6288_s13 }
 0x18a   : > { %v1096_v13 = vpop.permute.xlu0 %1095 }
 0x18b   : > { %v992_v27 = vpop.permute.xlu1 %991 }
 0x18f   : > { %1643 = vrot.lane.b32.xlu2 %v5005_v39, %s6288_s13 }
 0x190   : > { %971 = vrot.lane.b32.xlu0 %v4582_v41, %s6324_s24  ;;  %v1891_v41 = vsel %vm1884_vm4, %v1858_v32, %v1096_v13  ;;  %v5107_v32 = vld [vmem:[#allocation2 + $0x90] sm:$0xff] }
 0x191   : > { %v5013_v4 = vpop.permute.xlu2 %841  ;;  %v1924_v22 = vsel %vm1917_vm5, %v1891_v41, %v1224_v52  ;;  %979 = vrot.lane.b32.xlu1 %v5033_v34, %s6324_s24 }
 0x192   : > { %v1120_v18 = vpop.permute.xlu0 %1119 }
 0x193   : > { %v1352_v7 = vpop.permute.xlu1 %1351 }
 0x194   : > { %v1957_v29 = vsel %vm1950_vm6, %v1924_v22, %v1352_v7  ;;  %v627_v7 = vld [vmem:[#allocation2 + $0x140] sm:$0xff] }
 0x197   : > { %1761 = vrot.lane.b32.xlu2 %v5019_v23, %s6290_s14 }
 0x198   : > { %1771 = vrot.lane.b32.xlu0 %v5021_v20, %s6290_s14 }
 0x199   : > { %v5031_v10 = vpop.permute.xlu2 %969  ;;  %867 = vrot.lane.b32.xlu1 %v4585_v43, %s6330_s29 }
 0x19a   : > { %v1480_v26 = vpop.permute.xlu0 %1479 }
 0x19b   : > { %v1376_v57 = vpop.permute.xlu1 %1375  ;;  %v1990_v3 = vsel %vm1983_vm7, %v1957_v29, %v1480_v26  ;;  %v5120_v26 = vld [vmem:[#allocation2 + $0x142] sm:$0xff] }
 0x19c   : > { %v2023_v5 = vsel %vm2016_vm8, %v1990_v3, %v1608_v37 }
 0x19f   : > { %877 = vrot.lane.b32.xlu2 %v5037_v58, %s6330_s29 }
 0x1a0   : > { %1099 = vrot.lane.b32.xlu0 %v4700_v19, %s6325_s15  ;;  %v1837_v19 = vsel %vm385_vm0, %v4541_v62, %v4950_v45  ;;  %v5072_v62 = vld [vmem:[#allocation2 + $0xa9] sm:$0xff] }
 0x1a1   : > { %v5046_v59 = vpop.permute.xlu2 %865  ;;  %v1870_v1 = vsel %vm1851_vm3, %v1837_v19, %v992_v27  ;;  %1107 = vrot.lane.b32.xlu1 %v5070_v24, %s6325_s15  ;;  %v5092_v27 = vld [vmem:[#allocation2 + $0xaa] sm:$0xff] }
 0x1a2   : > { %v1504_v61 = vpop.permute.xlu0 %1503  ;;  %v2218_v33 = vpop.f32.mrf.mxu0  ;;  %v1903_v31 = vsel %vm1884_vm4, %v1870_v1, %v1120_v18 }
 0x1a3   : > { %v1736_v46 = vpop.permute.xlu1 %1735  ;;  %v2219_v36 = vadd.f32 %v4841_v35, %v2218_v33  ;;  %v1936_v43 = vsel %vm1917_vm5, %v1903_v31, %v4990_v21  ;;  %v5135_v33 = vld [vmem:[#allocation2 + $0xc1] sm:$0xff] }
 0x1a4   : > { %v2056_v52 = vsel %vm2049_vm9, %v2023_v5, %v1736_v46  ;;  %v1969_v45 = vsel %vm1950_vm6, %v1936_v43, %v1376_v57  ;;  %v2405_v46 = vld [vmem:[#allocation3 + $0x30] sm:$0xff] }
 0x1a5   : > { %3953 = vmatmul.msk.f32.gmra.mxu0 %vm2091_vm10, %v2056_v52  ;;  %2370 = vst.msk [vmem:[#allocation3 + $0x52] sm:$0xff] %vm1851_vm3, %v2219_v36  ;;  %v2002_v44 = vsel %vm1983_vm7, %v1969_v45, %v1504_v61  ;;  %v5138_v5 = vld [vmem:[#allocation2 + $0x120] sm:$0xff]  ;;  %v2408_v36 = vld [vmem:[#allocation3 + $0x48] sm:$0xff]  ;;  %v2416_v19 = vsel %vm1851_vm3, %v2405_v46, -inf }
 0x1a7   : > { %995 = vrot.lane.b32.xlu2 %v4595_v50, %s6324_s24 }
 0x1a8   : > { %1005 = vrot.lane.b32.xlu0 %v5051_v63, %s6324_s24 }
 0x1a9   : > { %v5065_v40 = vpop.permute.xlu2 %1105  ;;  %1227 = vrot.lane.b32.xlu1 %v4719_v9, %s6326_s30 }
 0x1aa   : > { %v5067_v2 = vpop.permute.xlu0 %849 }
 0x1ab   : > { %v1632_v8 = vpop.permute.xlu1 %1631 }
 0x1ac   : > { %v2035_v21 = vsel %vm2016_vm8, %v2002_v44, %v1632_v8 }
 0x1af   : > { %1235 = vrot.lane.b32.xlu2 %v5072_v62, %s6326_s30 }
 0x1b0   : > { %1123 = vrot.lane.b32.xlu0 %v4721_v11, %s6325_s15  ;;  %v2254_v50 = vpop.f32.mrf.mxu2 }
 0x1b1   : > { %v2255_v25 = vadd.f32 %v4841_v35, %v2254_v50  ;;  %v5085_v47 = vpop.permute.xlu2 %1225  ;;  %1133 = vrot.lane.b32.xlu1 %v627_v7, %s6325_s15 }
 0x1b2   : > { %v5087_v51 = vpop.permute.xlu0 %977 }
 0x1b3   : > { %2382 = vst.msk [vmem:[#allocation3 + $0xe2] sm:$0xff] %vm1851_vm3, %v2255_v25  ;;  %v1760_v37 = vpop.permute.xlu1 %1759  ;;  %v5154_v25 = vld [vmem:[#allocation2 + $0xc2] sm:$0xff] }
 0x1b4   : > { %v2068_v13 = vsel %vm2049_vm9, %v2035_v21, %v1760_v37 }
 0x1b5   : > { %3965 = vmatmul.msk.f32.gmra.mxu2 %vm2091_vm10, %v2068_v13 }
 0x1b7   : > { %1355 = vrot.lane.b32.xlu2 %v4723_v12, %s6327_s22 }
 0x1b8   : > { %1363 = vrot.lane.b32.xlu0 %v5092_v27, %s6327_s22 }
 0x1b9   : > { %v5101_v11 = vpop.permute.xlu2 %1131  ;;  %1251 = vrot.lane.b32.xlu1 %v4737_v42, %s6326_s30  ;;  %v2399_v42 = vld [vmem:[#allocation3] sm:$0xff] }
 0x1ba   : > { %v5103_v18 = vpop.permute.xlu0 %875  ;;  %v2414_v52 = vsel %vm1851_vm3, %v2399_v42, -inf }
 0x1bb   : > { %v5110_v41 = vpop.permute.xlu1 %1097  ;;  %v2417_v45 = vmax.f32 %v2414_v52, %v2416_v19 }
 0x1bf   : > { %1261 = vrot.lane.b32.xlu2 %v5105_v55, %s6326_s30 }
 0x1c0   : > { %1483 = vrot.lane.b32.xlu0 %v5107_v32, %s6328_s25 }
 0x1c1   : > { %v5116_v9 = vpop.permute.xlu2 %1249  ;;  %1491 = vrot.lane.b32.xlu1 %v4805_v17, %s6328_s25  ;;  %v2418_v17 = vsel %vm1851_vm3, %v2408_v36, -inf }
 0x1c2   : > { %v5118_v12 = vpop.permute.xlu0 %993 }
 0x1c3   : > { %v5128_v57 = vpop.permute.xlu1 %1003 }
 0x1c7   : > { %1379 = vrot.lane.b32.xlu2 %v4759_v49, %s6327_s22  ;;  %v2402_v49 = vld [vmem:[#allocation3 + $0x18] sm:$0xff] }
 0x1c8   : > { %1389 = vrot.lane.b32.xlu0 %v5120_v26, %s6327_s22  ;;  %v2415_v43 = vsel %vm1851_vm3, %v2402_v49, -inf }
 0x1c9   : > { %v5130_v22 = vpop.permute.xlu2 %1489  ;;  %v2419_v21 = vmax.f32 %v2415_v43, %v2418_v17  ;;  %1611 = vrot.lane.b32.xlu1 %v4996_v16, %s6288_s13 }
 0x1ca   : > { %v5132_v29 = vpop.permute.xlu0 %1233  ;;  %v2221_v3 = vpop.f32.mrf.mxu0 }
 0x1cb   : > { %v2222_v61 = vadd.f32 %v4841_v35, %v2221_v3  ;;  %v5150_v8 = vpop.permute.xlu1 %1121 }
 0x1cd   : > { %2371 = vst.msk [vmem:[#allocation3 + $0x62] sm:$0xff] %vm1851_vm3, %v2222_v61  ;;  %v5171_v61 = vld [vmem:[#allocation2 + $0x158] sm:$0xff] }
 0x1cf   : > { %1619 = vrot.lane.b32.xlu2 %v5135_v33, %s6288_s13 }
 0x1d0   : > { %1507 = vrot.lane.b32.xlu0 %v5138_v5, %s6328_s25 }
 0x1d1   : > { %v5148_v1 = vpop.permute.xlu2 %1609  ;;  %1517 = vrot.lane.b32.xlu1 %v5171_v61, %s6328_s25 }
 0x1d2   : > { %v1354_v31 = vpop.permute.xlu0 %1353 }
 0x1d3   : > { %v5173_v42 = vpop.permute.xlu1 %1361 }
 0x1d4   : > { %v2411_v50 = vld [vmem:[#allocation3 + $0x60] sm:$0xff] }
 0x1d5   : > { %v5157_v44 = vsel %vm1851_vm3, %v2411_v50, -inf  ;;  %v4067_v50 = vld [vmem:[#allocation2 + $0x50] sm:$0xff] }
 0x1d6   : > { %v2421_v37 = vmax.f32 %v2417_v45, %v5157_v44  ;;  %v579_v45 = vld [vmem:[#allocation2 + $0x6a] sm:$0xff] }
 0x1d7   : > { %1739 = vrot.lane.b32.xlu2 %v5033_v34, %s6290_s14 }
 0x1d8   : > { %1747 = vrot.lane.b32.xlu0 %v5154_v25, %s6290_s14  ;;  %v2422_v13 = vmax.f32 %v2421_v37, %v2419_v21 }
 0x1d9   : > { %v5166_v7 = vpop.permute.xlu2 %1515  ;;  %845 = vrot.lane.b32.xlu1 %v4631_v6, %s6330_s29 }
 0x1da   : > { %v5168_v3 = vpop.permute.xlu0 %1259  ;;  %2441 = vst.msk [vmem:[#allocation4] sm:$0xff] %vm1851_vm3, %v2422_v13 }
 0x1df   : > { %v2257_v46 = vpop.f32.mrf.mxu2  ;;  %853 = vrot.lane.b32.xlu2 %v4861_v38, %s6330_s29  ;;  %v1826_v38 = vsel %vm385_vm0, %v4067_v50, %v5013_v4 }
 0x1e0   : > { %v2258_v49 = vadd.f32 %v4841_v35, %v2257_v46  ;;  %1635 = vrot.lane.b32.xlu0 %v4789_v54, %s6288_s13  ;;  %v1482_v54 = vpop.permute.xlu1 %1481  ;;  %v1859_v13 = vsel %vm1851_vm3, %v1826_v38, %v5031_v10 }
 0x1e1   : > { %v2585_v36 = vld [vmem:[#allocation4] sm:$0x1f]  ;;  %v5183_v52 = vpop.permute.xlu2 %843  ;;  %v1892_v46 = vsel %vm1884_vm4, %v1859_v13, %v5110_v41  ;;  %v1830_v13 = vsel %vm385_vm0, %v4907_v14, %v5067_v2  ;;  %v2400_v2 = vld [vmem:[#allocation3 + $0x8] sm:$0xff] }
 0x1e2   : > { %2383 = vst.msk [vmem:[#allocation3 + $0xf2] sm:$0xff] %vm1851_vm3, %v2258_v49  ;;  %v5185_v19 = vpop.permute.xlu0 %1377  ;;  %v2590_v43 = vsel %vm2589_vm12, %v2585_v36, -inf  ;;  %v1925_v6 = vsel %vm1917_vm5, %v1892_v46, %v5085_v47  ;;  %v1863_v46 = vsel %vm1851_vm3, %v1830_v13, %v5087_v51  ;;  %v2406_v51 = vld [vmem:[#allocation3 + $0x38] sm:$0xff]  ;;  %v2409_v13 = vld [vmem:[#allocation3 + $0x50] sm:$0xff] }
 0x1e3   : > { %v2591_v17 = vrot.slane %v2590_v43, 4  ;;  %v1958_v10 = vsel %vm1950_vm6, %v1925_v6, %v1354_v31 }
 0x1e4   : > { %v1991_v38 = vsel %vm1983_vm7, %v1958_v10, %v1482_v54  ;;  %v615_v54 = vld [vmem:[#allocation2 + $0xb0] sm:$0xff] }
 0x1e5   : > { %v2592_v21 = vmax.f32 %v2590_v43, %v2591_v17  ;;  %v5201_v17 = vld [vmem:[#allocation2 + $0x159] sm:$0xff]  ;;  %v2407_v10 = vld [vmem:[#allocation3 + $0x40] sm:$0xf] }
 0x1e6   : > { %1645 = vrot.lane.b32.xlu1 %v5201_v17, %s6288_s13 }
 0x1e7   : > { %v2593_v37 = vrot.slane %v2592_v21, 2  ;;  %973 = vrot.lane.b32.xlu2 %v579_v45, %s6324_s24  ;;  %v5205_v45 = vld [vmem:[#allocation2 + $0x15a] sm:$0xff] }
 0x1e8   : > { %981 = vrot.lane.b32.xlu0 %v4886_v48, %s6324_s24  ;;  %v559_v48 = vld [vmem:[#allocation2 + $0xf9] sm:$0xff]  ;;  %v1388_v41 = vpop.permute.xlu1 %1387 }
 0x1e9   : > { %v2594_v49 = vmax.f32 %v2592_v21, %v2593_v37  ;;  %v5199_v36 = vpop.permute.xlu2 %1643  ;;  %v2024_v37 = vsel %vm2016_vm8, %v1991_v38, %v5148_v1  ;;  %v2403_v38 = vld [vmem:[#allocation3 + $0x20] sm:$0xff] }
 0x1ea   : > { %v1618_v4 = vpop.permute.xlu0 %1617 }
 0x1eb   : > { %v2595_v43 = vrot.slane %v2594_v49, 1 }
 0x1ed   : > { %v2596_v50 = vmax.f32 %v2594_v49, %v2595_v43 }
 0x1ee   : > { %1763 = vrot.lane.b32.xlu1 %v4826_v60, %s6290_s14  ;;  %v1896_v60 = vsel %vm1884_vm4, %v1863_v46, %v5065_v40  ;;  %v1843_v40 = vsel %vm385_vm0, %v5138_v5, %v5103_v18  ;;  %v2423_v46 = vsel %vm1851_vm3, %v2400_v2, -inf  ;;  %v2427_v5 = vsel %vm1851_vm3, %v2409_v13, -inf }
 0x1ef   : > { %2619 = vst.msk [vmem:[#allocation5] sm:$0x1] %vm2618_vm13, %v2596_v50  ;;  %1773 = vrot.lane.b32.xlu2 %v5205_v45, %s6290_s14  ;;  %v2401_v50 = vld [vmem:[#allocation3 + $0x10] sm:$0xf] }
 0x1f0   : > { %869 = vrot.lane.b32.xlu0 %v559_v48, %s6330_s29  ;;  %v5231_v1 = vpop.permute.xlu1 %1505 }
 0x1f1   : > { %v5215_v47 = vpop.permute.xlu2 %1761 }
 0x1f2   : > { %v1738_v21 = vpop.permute.xlu0 %1737 }
 0x1f3   : > { %v2057_v31 = vsel %vm2049_vm9, %v2024_v37, %v1738_v21  ;;  %v643_v37 = vld [vmem:[#allocation2 + $0x81] sm:$0xff] }
 0x1f4   : > { %3954 = vmatmul.msk.f32.gmra.mxu0 %vm2091_vm10, %v2057_v31  ;;  %v525_v31 = vld [vmem:[#allocation2 + $0xe0] sm:$0xff] }
 0x1f6   : > { %879 = vrot.lane.b32.xlu1 %v4901_v53, %s6330_s29 }
 0x1f7   : > { %1101 = vrot.lane.b32.xlu2 %v4907_v14, %s6325_s15  ;;  %v1929_v14 = vsel %vm1917_vm5, %v1896_v60, %v5132_v29  ;;  %v2410_v29 = vld [vmem:[#allocation3 + $0x58] sm:$0xf]  ;;  %v2434_v60 = vsel %vm2307_vm11, %v2407_v10, -inf }
 0x1f8   : > { %1109 = vrot.lane.b32.xlu0 %v615_v54, %s6325_s15  ;;  %v1962_v21 = vsel %vm1950_vm6, %v1929_v14, %v5173_v42  ;;  %v2404_v54 = vld [vmem:[#allocation3 + $0x28] sm:$0xf]  ;;  %v2425_v42 = vsel %vm1851_vm3, %v2406_v51, -inf  ;;  %v2424_v14 = vsel %vm1851_vm3, %v2403_v38, -inf  ;;  %v2436_v51 = vsel %vm2307_vm11, %v2410_v29, -inf }
 0x1f9   : > { %v2224_v49 = vpop.f32.mrf.mxu0  ;;  %v5233_v43 = vpop.permute.xlu2 %877  ;;  %v1995_v18 = vsel %vm1983_vm7, %v1962_v21, %v5130_v22  ;;  %v2433_v53 = vsel %vm2307_vm11, %v2404_v54, -inf  ;;  %v2426_v21 = vmax.f32 %v2423_v46, %v2425_v42  ;;  %v591_v29 = vld [vmem:[#allocation2 + $0xfa] sm:$0xff]  ;;  %v2428_v46 = vmax.f32 %v2424_v14, %v2427_v5 }
 0x1fa   : > { %v2225_v6 = vadd.f32 %v4841_v35, %v2224_v49  ;;  %v5236_v48 = vpop.permute.xlu0 %851  ;;  %v2432_v49 = vsel %vm2307_vm11, %v2401_v50, -inf  ;;  %v2028_v2 = vsel %vm2016_vm8, %v1995_v18, %v1618_v4  ;;  %v1746_v50 = vpop.permute.xlu1 %1745 }
 0x1fb   : > { %v2061_v10 = vsel %vm2049_vm9, %v2028_v2, %v1746_v50  ;;  %v2751_v2 = vld [vmem:[#allocation6] sm:$0xf]  ;;  %v469_v50 = vld [vmem:[%s4329_s16 + $0xe0] sm:$0xff] }
 0x1fc   : > { %2372 = vst.msk [vmem:[#allocation3 + $0x6a] sm:$0xff] %vm1851_vm3, %v2225_v6  ;;  %v1876_v6 = vsel %vm1851_vm3, %v1843_v40, %v5128_v57  ;;  %v1838_v57 = vsel %vm385_vm0, %v525_v31, %v5046_v59  ;;  %3958 = vmatmul.msk.f32.vlgmr.msra.gmra.mxu1 %vm2091_vm10, %v2061_v10 }
 0x1fd   : > { %v1871_v22 = vsel %vm1851_vm3, %v1838_v57, %v5118_v12  ;;  %2792 = vst [vmem:[#allocation1] ss:$2 sm:$0xff] %v2751_v2 }
 0x1fe   : > { %v1904_v4 = vsel %vm1884_vm4, %v1871_v22, %v5150_v8  ;;  %997 = vrot.lane.b32.xlu1 %v591_v29, %s6324_s24  ;;  %502 = vst.msk [vmem:[#allocation2 + $0x169] sm:$0xff] %vm385_vm0, %v469_v50  ;;  %v675_v29 = vld [vmem:[#allocation2 + $0x82] sm:$0xff] }
 0x1ff   : > { %1007 = vrot.lane.b32.xlu2 %v4977_v15, %s6324_s24  ;;  %v1909_v15 = vsel %vm1884_vm4, %v1876_v6, %v5101_v11 }
 0x200   : > { %1229 = vrot.lane.b32.xlu0 %v643_v37, %s6326_s30  ;;  %v2435_v37 = vmax.f32 %v2432_v49, %v2434_v60  ;;  %v1942_v31 = vsel %vm1917_vm5, %v1909_v15, %v5168_v3  ;;  %v2437_v49 = vmax.f32 %v2433_v53, %v2436_v51  ;;  %v1937_v3 = vsel %vm1917_vm5, %v1904_v4, %v5116_v9  ;;  %v647_v53 = vld [vmem:[#allocation2 + $0xb1] sm:$0xff] }
 0x201   : > { %v5273_v38 = vpop.permute.xlu2 %995  ;;  %v1975_v11 = vsel %vm1950_vm6, %v1942_v31, %v1388_v41  ;;  %v1970_v41 = vsel %vm1950_vm6, %v1937_v3, %v5185_v19 }
 0x202   : > { %v5275_v59 = vpop.permute.xlu0 %971  ;;  %v2008_v42 = vsel %vm1983_vm7, %v1975_v11, %v5166_v7  ;;  %v2003_v9 = vsel %vm1983_vm7, %v1970_v41, %v5231_v1  ;;  %v1634_v7 = vpop.permute.xlu1 %1633 }
 0x203   : > { %v2412_v54 = vld [vmem:[#allocation3 + $0x68] sm:$0xff]  ;;  %v2413_v13 = vld [vmem:[#allocation3 + $0x70] sm:$0xf]  ;;  %v2036_v14 = vsel %vm2016_vm8, %v2003_v9, %v1634_v7  ;;  %v2041_v5 = vsel %vm2016_vm8, %v2008_v42, %v5199_v36 }
 0x204   : > { %v5284_v12 = vsel %vm1851_vm3, %v2412_v54, -inf  ;;  %v2438_v40 = vsel %vm2307_vm11, %v2413_v13, -inf  ;;  %v679_v36 = vld [vmem:[#allocation2 + $0xb2] sm:$0xff] }
 0x205   : > { %v2430_v6 = vmax.f32 %v2426_v21, %v5284_v12  ;;  %v2439_v8 = vmax.f32 %v2435_v37, %v2438_v40 }
 0x206   : > { %1237 = vrot.lane.b32.xlu1 %v647_v53, %s6326_s30 }
 0x207   : > { %v2431_v60 = vmax.f32 %v2430_v6, %v2428_v46  ;;  %v2440_v18 = vmax.f32 %v2439_v8, %v2437_v49  ;;  %1125 = vrot.lane.b32.xlu2 %v4993_v30, %s6325_s15  ;;  %v5342_v49 = vld [vmem:[#allocation2 + $0x98] sm:$0xff]  ;;  %v712_v6 = vld [vmem:[#allocation2 + $0xc8] sm:$0xff] }
 0x208   : > { %1135 = vrot.lane.b32.xlu0 %v4982_v56, %s6325_s15  ;;  %v2069_v56 = vsel %vm2049_vm9, %v2036_v14, %v5215_v47  ;;  %v2260_v1 = vpop.f32.mrf.mxu2 }
 0x209   : > { %2442 = vst.msk [vmem:[#allocation4 + $0x8] sm:$0xff] %vm1851_vm3, %v2431_v60  ;;  %v5306_v19 = vpop.permute.xlu2 %1235  ;;  %3966 = vmatmul.msk.f32.gmra.mxu2 %vm2091_vm10, %v2069_v56  ;;  %v2261_v47 = vadd.f32 %v4841_v35, %v2260_v1 }
 0x20a   : > { %2443 = vst.msk [vmem:[#allocation4 + $0x10] sm:$0xf] %vm2307_vm11, %v2440_v18  ;;  %v1772_v57 = vpop.permute.xlu0 %1771  ;;  %v5333_v37 = vpop.permute.xlu1 %979 }
 0x20b   : > { %v2074_v30 = vsel %vm2049_vm9, %v2041_v5, %v1772_v57  ;;  %2384 = vst.msk [vmem:[#allocation3 + $0xfa] sm:$0xff] %vm1851_vm3, %v2261_v47 }
 0x20c   : > { %3971 = vmatmul.msk.f32.vlgmr.msra.gmra.mxu3 %vm2091_vm10, %v2074_v30 }
 0x20e   : > { %1357 = vrot.lane.b32.xlu1 %v675_v29, %s6327_s22 }
 0x20f   : > { %1365 = vrot.lane.b32.xlu2 %v679_v36, %s6327_s22  ;;  %v740_v36 = vld [vmem:[#allocation2 + $0x99] sm:$0xff] }
 0x210   : > { %v2623_v51 = vld [vmem:[#allocation4 + $0x4] sm:$0x1f]  ;;  %1253 = vrot.lane.b32.xlu0 %v5015_v28, %s6326_s30 }
 0x211   : > { %v2659_v22 = vld [vmem:[#allocation4 + $0x8] sm:$0x1f]  ;;  %v2627_v15 = vsel %vm2589_vm12, %v2623_v51, -inf  ;;  %v5337_v54 = vpop.permute.xlu2 %1355 }
 0x212   : > { %v2663_v10 = vsel %vm2589_vm12, %v2659_v22, -inf  ;;  %v2695_v21 = vld [vmem:[#allocation4 + $0xc] sm:$0x1f]  ;;  %v2628_v4 = vrot.slane %v2627_v15, 4  ;;  %v5339_v13 = vpop.permute.xlu0 %1099  ;;  %v5348_v9 = vpop.permute.xlu1 %867 }
 0x213   : > { %v2664_v0 = vrot.slane %v2663_v10, 4  ;;  %v2699_v31 = vsel %vm2589_vm12, %v2695_v21, -inf }
 0x214   : > { %v2700_v11 = vrot.slane %v2699_v31, 4  ;;  %v2629_v28 = vmax.f32 %v2627_v15, %v2628_v4  ;;  %v5367_v15 = vld [vmem:[#allocation2 + $0x168] sm:$0xff] }
 0x215   : > { %v2665_v40 = vmax.f32 %v2663_v10, %v2664_v0 }
 0x216   : > { %v2701_v46 = vmax.f32 %v2699_v31, %v2700_v11  ;;  %v2630_v8 = vrot.slane %v2629_v28, 2  ;;  %1263 = vrot.lane.b32.xlu1 %v5005_v39, %s6326_s30  ;;  %v5370_v39 = vld [vmem:[#allocation2 + $0x128] sm:$0xff] }
 0x217   : > { %v2666_v3 = vrot.slane %v2665_v40, 2  ;;  %1485 = vrot.lane.b32.xlu2 %v5342_v49, %s6328_s25  ;;  %v744_v11 = vld [vmem:[#allocation2 + $0xc9] sm:$0xff] }
 0x218   : > { %v2702_v42 = vrot.slane %v2701_v46, 2  ;;  %v2631_v60 = vmax.f32 %v2629_v28, %v2630_v8  ;;  %1493 = vrot.lane.b32.xlu0 %v712_v6, %s6328_s25  ;;  %v776_v28 = vld [vmem:[#allocation2 + $0xca] sm:$0xff]  ;;  %v772_v8 = vld [vmem:[#allocation2 + $0x9a] sm:$0xff] }
 0x219   : > { %v2667_v18 = vmax.f32 %v2665_v40, %v2666_v3  ;;  %v5350_v57 = vpop.permute.xlu2 %1261  ;;  %v548_v40 = vld [vmem:[#allocation2 + $0x79] sm:$0xff]  ;;  %v5386_v3 = vld [vmem:[#allocation2 + $0x169] sm:$0xff] }
 0x21a   : > { %v2703_v41 = vmax.f32 %v2701_v46, %v2702_v42  ;;  %v2632_v7 = vrot.slane %v2631_v60, 1  ;;  %v5352_v5 = vpop.permute.xlu0 %1005  ;;  %v1108_v47 = vpop.permute.xlu1 %1107  ;;  %v2755_v42 = vld [vmem:[#allocation6 + $0x1] sm:$0xf] }
 0x21b   : > { %v2668_v14 = vrot.slane %v2667_v18, 1 }
 0x21c   : > { %v2704_v56 = vrot.slane %v2703_v41, 1  ;;  %v2633_v30 = vmax.f32 %v2631_v60, %v2632_v7 }
 0x21d   : > { %v2669_v1 = vmax.f32 %v2667_v18, %v2668_v14 }
 0x21e   : > { %v2705_v53 = vmax.f32 %v2703_v41, %v2704_v56  ;;  %2655 = vst.msk [vmem:[#allocation5 + $0x1] sm:$0x1] %vm2618_vm13, %v2633_v30  ;;  %1381 = vrot.lane.b32.xlu1 %v5019_v23, %s6327_s22 }
 0x21f   : > { %2691 = vst.msk [vmem:[#allocation5 + $0x2] sm:$0x1] %vm2618_vm13, %v2669_v1  ;;  %1391 = vrot.lane.b32.xlu2 %v5021_v20, %s6327_s22  ;;  %v470_v20 = vld [vmem:[%s4329_s16 + $0xe8] sm:$0xff]  ;;  %v1831_v1 = vsel %vm385_vm0, %v5107_v32, %v5236_v48 }
 0x220   : > { %2727 = vst.msk [vmem:[#allocation5 + $0x3] sm:$0x1] %vm2618_vm13, %v2705_v53  ;;  %1613 = vrot.lane.b32.xlu0 %v740_v36, %s6288_s13  ;;  %v1864_v53 = vsel %vm1851_vm3, %v1831_v1, %v5333_v37 }
 0x221   : > { %v5362_v2 = vpop.permute.xlu2 %1379  ;;  %503 = vst.msk [vmem:[#allocation2 + $0x171] sm:$0xff] %vm385_vm0, %v470_v20 }
 0x222   : > { %v5364_v50 = vpop.permute.xlu0 %1123  ;;  %v2227_v51 = vpop.f32.mrf.mxu0 }
 0x223   : > { %v2228_v22 = vadd.f32 %v4841_v35, %v2227_v51  ;;  %v1228_v4 = vpop.permute.xlu1 %1227 }
 0x225   : > { %2373 = vst.msk [vmem:[#allocation3 + $0x7a] sm:$0xff] %vm1851_vm3, %v2228_v22  ;;  %v1897_v22 = vsel %vm1884_vm4, %v1864_v53, %v1108_v47 }
 0x226   : > { %1621 = vrot.lane.b32.xlu1 %v744_v11, %s6288_s13  ;;  %v580_v11 = vld [vmem:[#allocation2 + $0x7a] sm:$0xff]  ;;  %v1930_v47 = vsel %vm1917_vm5, %v1897_v22, %v5306_v19 }
 0x227   : > { %v2731_v10 = vld [vmem:[#allocation5] sm:$0xf]  ;;  %1509 = vrot.lane.b32.xlu2 %v5370_v39, %s6328_s25 }
 0x228   : > { %v2742_v21 = vmax.f32 %v2731_v10, 0.0  ;;  %1519 = vrot.lane.b32.xlu0 %v5367_v15, %s6328_s25 }
 0x229   : > { %v1620_v0 = vpop.permute.xlu2 %1619 }
 0x22a   : > { %2747 = vst.msk [vmem:[#allocation6 + $0x9] sm:$0xf] %vm2307_vm11, %v2742_v21  ;;  %v1364_v31 = vpop.permute.xlu0 %1363 }
 0x22b   : > { %v5384_v29 = vpop.permute.xlu1 %1133 }
 0x22e   : > { %1741 = vrot.lane.b32.xlu1 %v772_v8, %s6290_s14 }
 0x22f   : > { %1749 = vrot.lane.b32.xlu2 %v776_v28, %s6290_s14  ;;  %v1963_v28 = vsel %vm1950_vm6, %v1930_v47, %v1364_v31 }
 0x230   : > { %847 = vrot.lane.b32.xlu0 %v548_v40, %s6330_s29 }
 0x231   : > { %v2752_v23 = vld [vmem:[#allocation6 + $0x8] sm:$0xf]  ;;  %v1740_v46 = vpop.permute.xlu2 %1739 }
 0x232   : > { %v1484_v6 = vpop.permute.xlu0 %1483  ;;  %2794 = vst [vmem:[#allocation1 + $0x1] ss:$2 sm:$0xff] %v2752_v23  ;;  %v2756_v30 = vld [vmem:[#allocation6 + $0x9] sm:$0xf] }
 0x233   : > { %v5393_v18 = vpop.permute.xlu1 %1251 }
 0x236   : > { %855 = vrot.lane.b32.xlu1 %v5072_v62, %s6330_s29 }
 0x237   : > { %1637 = vrot.lane.b32.xlu2 %v5037_v58, %s6288_s13  ;;  %v514_v58 = vld [vmem:[#allocation2 + $0x60] sm:$0xff] }
 0x238   : > { %1647 = vrot.lane.b32.xlu0 %v5386_v3, %s6288_s13  ;;  %v2263_v60 = vpop.f32.mrf.mxu2  ;;  %v1827_v51 = vsel %vm385_vm0, %v514_v58, %v5183_v52 }
 0x239   : > { %v2264_v41 = vadd.f32 %v4841_v35, %v2263_v60  ;;  %v5396_v7 = vld.sshfl [vmem:[#allocation1] sm:$0xff pattern:$0x75316420]  ;;  %v5398_v14 = vpop.permute.xlu2 %853  ;;  %v2759_v35 = vld [vmem:[#allocation6 + $0x2] sm:$0xf]  ;;  %v1860_v21 = vsel %vm1851_vm3, %v1827_v51, %v5275_v59 }
 0x23a   : > { %v5400_v56 = vpop.permute.xlu0 %1389  ;;  %2807 = vst [vmem:[#allocation1] ss:$2 sm:$0xff] %v2755_v42  ;;  %v1893_v37 = vsel %vm1884_vm4, %v1860_v21, %v5339_v13 }
 0x23b   : > { %2809 = vst [vmem:[#allocation1 + $0x1] ss:$2 sm:$0xff] %v2756_v30  ;;  %v1492_v36 = vpop.permute.xlu1 %1491  ;;  %v1926_v52 = vsel %vm1917_vm5, %v1893_v37, %v1228_v4  ;;  %v5519_v37 = vld [vmem:[#allocation2 + $0x170] sm:$0xff] }
 0x23c   : > { %2385 = vst.msk [vmem:[#allocation3 + $0x10a] sm:$0xff] %vm1851_vm3, %v2264_v41  ;;  %v1996_v40 = vsel %vm1983_vm7, %v1963_v28, %v1492_v36  ;;  %v1959_v59 = vsel %vm1950_vm6, %v1926_v52, %v5337_v54  ;;  %v2763_v54 = vld [vmem:[#allocation6 + $0x8] sm:$0xf]  ;;  %v5533_v52 = vld [vmem:[%s6329_s2] ss:$0 sm:$0xff] }
 0x23d   : > { %v1992_v13 = vsel %vm1983_vm7, %v1959_v59, %v1484_v6  ;;  %v2029_v8 = vsel %vm2016_vm8, %v1996_v40, %v1620_v0  ;;  %v616_v6 = vld [vmem:[#allocation2 + $0xc0] sm:$0xff]  ;;  %v5539_v59 = vld [vmem:[#allocation2 + $0x171] sm:$0xff] }
 0x23e   : > { %975 = vrot.lane.b32.xlu1 %v580_v11, %s6324_s24  ;;  %v745_v40 = vld [vmem:[#allocation2 + $0xd9] sm:$0xff] }
 0x23f   : > { %983 = vrot.lane.b32.xlu2 %v5092_v27, %s6324_s24 }
 0x240   : > { %1765 = vrot.lane.b32.xlu0 %v5051_v63, %s6290_s14  ;;  %v2760_v63 = vld [vmem:[#allocation6 + $0xa] sm:$0xf] }
 0x241   : > { %v5417_v10 = vpop.permute.xlu2 %973 }
 0x242   : > { %v5419_v20 = vpop.permute.xlu0 %1507  ;;  %v5421_v48 = vld.sshfl [vmem:[#allocation1] sm:$0xff pattern:$0x75316420] }
 0x243   : > { %2826 = vst [vmem:[#allocation1] ss:$2 sm:$0xff] %v2759_v35  ;;  %v1612_v4 = vpop.permute.xlu1 %1611  ;;  %v526_v35 = vld [vmem:[#allocation2 + $0xf0] sm:$0xff] }
 0x244   : > { %2828 = vst [vmem:[#allocation1 + $0x1] ss:$2 sm:$0xff] %v2760_v63  ;;  %v2025_v19 = vsel %vm2016_vm8, %v1992_v13, %v1612_v4  ;;  %v471_v4 = vld [vmem:[%s4329_s16 + $0xf0] sm:$0xff] }
 0x245   : > { %v2058_v42 = vsel %vm2049_vm9, %v2025_v19, %v1740_v46  ;;  %504 = vst.msk [vmem:[#allocation2 + $0x181] sm:$0xff] %vm385_vm0, %v471_v4 }
 0x246   : > { %3955 = vmatmul.msk.f32.gmra.mxu0 %vm2091_vm10, %v2058_v42  ;;  %v566_v42 = vld [vmem:[#allocation2 + $0x151] sm:$0xff] }
 0x247   : > { %881 = vrot.lane.b32.xlu2 %v5105_v55, %s6330_s29  ;;  %v5447_v55 = vld [vmem:[#allocation2 + $0x16a] sm:$0xff] }
 0x248   : > { %1103 = vrot.lane.b32.xlu0 %v5107_v32, %s6325_s15  ;;  %1775 = vrot.lane.b32.xlu1 %v5447_v55, %s6290_s14 }
 0x249   : > { %v1774_v23 = vpop.permute.xlu2 %1773 }
 0x24a   : > { %v1748_v31 = vpop.permute.xlu0 %1747 }
 0x24b   : > { %v2062_v60 = vsel %vm2049_vm9, %v2029_v8, %v1748_v31  ;;  %v5444_v41 = vld.sshfl [vmem:[#allocation1] sm:$0xff pattern:$0x75316420]  ;;  %v1518_v32 = vpop.permute.xlu1 %1517  ;;  %v592_v8 = vld [vmem:[#allocation2 + $0x10a] sm:$0xff] }
 0x24c   : > { %3959 = vmatmul.msk.f32.gmra.mxu1 %vm2091_vm10, %v2062_v60  ;;  %2845 = vst [vmem:[#allocation1] ss:$2 sm:$0xff] %v2763_v54  ;;  %v777_v31 = vld [vmem:[#allocation2 + $0xda] sm:$0xff] }
 0x24f   : > { %1009 = vrot.lane.b32.xlu2 %v5120_v26, %s6324_s24  ;;  %v1844_v26 = vsel %vm385_vm0, %v5370_v39, %v5233_v43 }
 0x250   : > { %1231 = vrot.lane.b32.xlu0 %v4996_v16, %s6326_s30  ;;  %1111 = vrot.lane.b32.xlu1 %v616_v6, %s6325_s15  ;;  %v1877_v1 = vsel %vm1851_vm3, %v1844_v26, %v5352_v5  ;;  %v560_v26 = vld [vmem:[#allocation2 + $0x109] sm:$0xff] }
 0x251   : > { %v5456_v0 = vpop.permute.xlu2 %1101 }
 0x252   : > { %v1636_v46 = vpop.permute.xlu0 %1635 }
 0x253   : > { %v5463_v30 = vpop.permute.xlu1 %845 }
 0x257   : > { %1137 = vrot.lane.b32.xlu2 %v5171_v61, %s6325_s15  ;;  %v1910_v61 = vsel %vm1884_vm4, %v1877_v1, %v5384_v29  ;;  %v624_v1 = vld [vmem:[#allocation2 + $0x120] sm:$0xff] }
 0x258   : > { %1359 = vrot.lane.b32.xlu0 %v5033_v34, %s6327_s22  ;;  %v1839_v34 = vsel %vm385_vm0, %v526_v35, %v5348_v9  ;;  %v1943_v53 = vsel %vm1917_vm5, %v1910_v61, %v5350_v57  ;;  %1239 = vrot.lane.b32.xlu1 %v5135_v33, %s6326_s30  ;;  %v472_v35 = vld [vmem:[%s4329_s16 + $0xf8] sm:$0xff]  ;;  %s6292_s16 = smov 40  }
 0x259   : > { %v5468_v16 = vpop.permute.xlu2 %1007  ;;  %v1976_v43 = vsel %vm1950_vm6, %v1943_v53, %v5400_v56  ;;  %v1872_v9 = vsel %vm1851_vm3, %v1839_v34, %v5273_v38  ;;  %505 = vst.msk [vmem:[#allocation2 + $0x189] sm:$0xff] %vm385_vm0, %v472_v35  ;;  %v561_v35 = vld [vmem:[#allocation2 + $0x111] sm:$0xff] }
 0x25a   : > { %v5470_v58 = vpop.permute.xlu0 %981  ;;  %v2009_v5 = vsel %vm1983_vm7, %v1976_v43, %v1518_v32  ;;  %v1905_v56 = vsel %vm1884_vm4, %v1872_v9, %v5364_v50  ;;  %v598_v43 = vld [vmem:[#allocation2 + $0x152] sm:$0xff] }
 0x25b   : > { %v1646_v29 = vpop.permute.xlu1 %1645 }
 0x25c   : > { %v2042_v57 = vsel %vm2016_vm8, %v2009_v5, %v1646_v29  ;;  %v688_v5 = vld [vmem:[#allocation2 + $0x122] sm:$0xff] }
 0x25d   : > { %v2075_v51 = vsel %vm2049_vm9, %v2042_v57, %v1774_v23 }
 0x25e   : > { %3972 = vmatmul.msk.f32.gmra.mxu3 %vm2091_vm10, %v2075_v51 }
 0x25f   : > { %1265 = vrot.lane.b32.xlu2 %v5201_v17, %s6326_s30 }
 0x260   : > { %1487 = vrot.lane.b32.xlu0 %v5070_v24, %s6328_s25  ;;  %v1938_v24 = vsel %vm1917_vm5, %v1905_v56, %v5393_v18  ;;  %1367 = vrot.lane.b32.xlu1 %v5154_v25, %s6327_s22  ;;  %v713_v25 = vld [vmem:[#allocation2 + $0xd8] sm:$0xff] }
 0x261   : > { %v5492_v36 = vpop.permute.xlu2 %1125  ;;  %v1971_v22 = vsel %vm1950_vm6, %v1938_v24, %v5362_v2 }
 0x262   : > { %v5494_v33 = vpop.permute.xlu0 %869  ;;  %v2004_v38 = vsel %vm1983_vm7, %v1971_v22, %v5419_v20  ;;  %v656_v22 = vld [vmem:[#allocation2 + $0x121] sm:$0xff] }
 0x263   : > { %v2037_v50 = vsel %vm2016_vm8, %v2004_v38, %v1636_v46  ;;  %v1764_v18 = vpop.permute.xlu1 %1763  ;;  %v727_v38 = vld [vmem:[#allocation2 + $0x180] sm:$0xff] }
 0x264   : > { %v2070_v21 = vsel %vm2049_vm9, %v2037_v50, %v1764_v18  ;;  %v532_v50 = vld [vmem:[#allocation2 + $0x138] sm:$0xff] }
 0x265   : > { %3967 = vmatmul.msk.f32.gmra.mxu2 %vm2091_vm10, %v2070_v21  ;;  %v515_v21 = vld [vmem:[#allocation2 + $0x68] sm:$0xff] }
 0x266   : > { %v1828_v4 = vsel %vm385_vm0, %v515_v21, %v5463_v30  ;;  %v533_v21 = vld [vmem:[#allocation2 + $0x140] sm:$0xff] }
 0x267   : > { %1393 = vrot.lane.b32.xlu2 %v5205_v45, %s6327_s22 }
 0x268   : > { %1615 = vrot.lane.b32.xlu0 %v5072_v62, %s6288_s13  ;;  %1495 = vrot.lane.b32.xlu1 %v713_v25, %s6328_s25  ;;  %s6294_s13 = smov 48  }
 0x269   : > { %v5514_v63 = vpop.permute.xlu2 %1365 }
 0x26a   : > { %v5516_v2 = vpop.permute.xlu0 %1109 }
 0x26b   : > { %v5526_v62 = vpop.permute.xlu1 %879 }
 0x26f   : > { %1521 = vrot.lane.b32.xlu2 %v5519_v37, %s6328_s25 }
 0x270   : > { %1743 = vrot.lane.b32.xlu0 %v5092_v27, %s6290_s14  ;;  %v5541_v27 = vld [vmem:[#allocation2 + $0x172] sm:$0xff]  ;;  %s6331_s14 = smov 28  }
 0x271   : > { %v2230_v20 = vpop.f32.mrf.mxu0  ;;  %v5528_v11 = vpop.permute.xlu2 %1485  ;;  %1623 = vrot.lane.b32.xlu1 %v745_v40, %s6331_s14 }
 0x272   : > { %v2231_v47 = vadd.f32 %v5533_v52, %v2230_v20  ;;  %v5536_v28 = vpop.permute.xlu0 %1229 }
 0x273   : > { %v5548_v13 = vpop.permute.xlu1 %997 }
 0x274   : > { %2374 = vst.msk [vmem:[#allocation3 + $0x82] sm:$0xff] %vm1851_vm3, %v2231_v47 }
 0x277   : > { %1649 = vrot.lane.b32.xlu2 %v5539_v59, %s6331_s14 }
 0x278   : > { %1777 = vrot.lane.b32.xlu0 %v5541_v27, %s6332_s0 }
 0x279   : > { %v5551_v19 = vpop.permute.xlu2 %1391  ;;  %1751 = vrot.lane.b32.xlu1 %v777_v31, %s6332_s0  ;;  %v2242_v60 = vpop.f32.mrf.mxu1 }
 0x27a   : > { %v5553_v23 = vpop.permute.xlu0 %1135  ;;  %v2243_v54 = vadd.f32 %v5533_v52, %v2242_v60 }
 0x27b   : > { %v1238_v32 = vpop.permute.xlu1 %1237 }
 0x27c   : > { %2378 = vst.msk [vmem:[#allocation3 + $0xb2] sm:$0xff] %vm1851_vm3, %v2243_v54 }
 0x27f   : > { %883 = vrot.lane.b32.xlu2 %v566_v42, %s6330_s29  ;;  %v759_v42 = vld [vmem:[#allocation2 + $0x181] sm:$0xff] }
 0x280   : > { %999 = vrot.lane.b32.xlu0 %v592_v8, %s6324_s24  ;;  %v785_v8 = vld [vmem:[#allocation2 + $0x13a] sm:$0xff] }
 0x281   : > { %v5560_v46 = vpop.permute.xlu2 %1509  ;;  %871 = vrot.lane.b32.xlu1 %v560_v26, %s6330_s29  ;;  %v753_v26 = vld [vmem:[#allocation2 + $0x139] sm:$0xff] }
 0x282   : > { %v5562_v6 = vpop.permute.xlu0 %1253 }
 0x283   : > { %v1358_v61 = vpop.permute.xlu1 %1357 }
 0x287   : > { %1127 = vrot.lane.b32.xlu2 %v624_v1, %s6325_s15 }
 0x288   : > { %1139 = vrot.lane.b32.xlu0 %v5367_v15, %s6325_s15 }
 0x289   : > { %v1750_v34 = vpop.permute.xlu2 %1749  ;;  %1011 = vrot.lane.b32.xlu1 %v598_v43, %s6324_s24 }
 0x28a   : > { %v1494_v53 = vpop.permute.xlu0 %1493 }
 0x28b   : > { %v5577_v15 = vpop.permute.xlu1 %1263 }
 0x28c   : > { %v2266_v29 = vpop.f32.mrf.mxu2 }
 0x28d   : > { %v2267_v57 = vadd.f32 %v5533_v52, %v2266_v29 }
 0x28f   : > { %v2281_v9 = vpop.f32.mrf.mxu3  ;;  %1267 = vrot.lane.b32.xlu2 %v5386_v3, %s6326_s30  ;;  %2386 = vst.msk [vmem:[#allocation3 + $0x112] sm:$0xff] %vm1851_vm3, %v2267_v57  ;;  %v1832_v3 = vsel %vm385_vm0, %v5342_v49, %v5398_v14  ;;  %v1861_v49 = vsel %vm1851_vm3, %v1828_v4, %v5417_v10  ;;  %v760_v4 = vld [vmem:[#allocation2 + $0x189] sm:$0xff] }
 0x290   : > { %v2282_v56 = vadd.f32 %v5533_v52, %v2281_v9  ;;  %1383 = vrot.lane.b32.xlu0 %v688_v5, %s6327_s22  ;;  %v1865_v47 = vsel %vm1851_vm3, %v1832_v3, %v5470_v58  ;;  %v1894_v10 = vsel %vm1884_vm4, %v1861_v49, %v5456_v0 }
 0x291   : > { %v1638_v51 = vpop.permute.xlu2 %1637  ;;  %1255 = vrot.lane.b32.xlu1 %v656_v22, %s6326_s30  ;;  %v1898_v40 = vsel %vm1884_vm4, %v1865_v47, %v5516_v2  ;;  %v593_v22 = vld [vmem:[#allocation2 + $0x112] sm:$0xff] }
 0x292   : > { %v1614_v24 = vpop.permute.xlu0 %1613  ;;  %2391 = vst.msk [vmem:[#allocation3 + $0x152] sm:$0xff] %vm1851_vm3, %v2282_v56  ;;  %v1931_v31 = vsel %vm1917_vm5, %v1898_v40, %v1238_v32 }
 0x293   : > { %v1382_v18 = vpop.permute.xlu1 %1381  ;;  %v1964_v14 = vsel %vm1950_vm6, %v1931_v31, %v5514_v63  ;;  %v1927_v63 = vsel %vm1917_vm5, %v1894_v10, %v5536_v28  ;;  %v786_v10 = vld [vmem:[#allocation2 + $0x142] sm:$0xff] }
 0x294   : > { %v1997_v58 = vsel %vm1983_vm7, %v1964_v14, %v1494_v53  ;;  %v1960_v1 = vsel %vm1950_vm6, %v1927_v63, %v1358_v61  ;;  %v728_v14 = vld [vmem:[#allocation2 + $0x188] sm:$0xff] }
 0x295   : > { %v1993_v0 = vsel %vm1983_vm7, %v1960_v1, %v5528_v11  ;;  %v791_v11 = vld [vmem:[#allocation2 + $0x182] sm:$0xff] }
 0x296   : > { %v2026_v28 = vsel %vm2016_vm8, %v1993_v0, %v1614_v24 }
 0x297   : > { %1511 = vrot.lane.b32.xlu2 %v532_v50, %s6328_s25 }
 0x298   : > { %1523 = vrot.lane.b32.xlu0 %v727_v38, %s6328_s25  ;;  %v1845_v38 = vsel %vm385_vm0, %v532_v50, %v5526_v62 }
 0x299   : > { %v5587_v25 = vpop.permute.xlu2 %983  ;;  %1395 = vrot.lane.b32.xlu1 %v5447_v55, %s6327_s22  ;;  %v527_v55 = vld [vmem:[#allocation2 + $0xf8] sm:$0xff] }
 0x29a   : > { %v5589_v20 = vpop.permute.xlu0 %1519  ;;  %v1840_v53 = vsel %vm385_vm0, %v527_v55, %v5494_v33 }
 0x29b   : > { %v1622_v30 = vpop.permute.xlu1 %1621  ;;  %v1873_v43 = vsel %vm1851_vm3, %v1840_v53, %v5548_v13 }
 0x29c   : > { %v2030_v2 = vsel %vm2016_vm8, %v1997_v58, %v1622_v30  ;;  %v792_v30 = vld [vmem:[#allocation2 + $0x18a] sm:$0xff] }
 0x29d   : > { %v2063_v32 = vsel %vm2049_vm9, %v2030_v2, %v1750_v34  ;;  %v1906_v34 = vsel %vm1884_vm4, %v1873_v43, %v5492_v36 }
 0x29e   : > { %3960 = vmatmul.msk.f32.gmra.mxu1 %vm2091_vm10, %v2063_v32  ;;  %v1939_v29 = vsel %vm1917_vm5, %v1906_v34, %v5562_v6 }
 0x29f   : > { %1651 = vrot.lane.b32.xlu2 %v759_v42, %s6331_s14 }
 0x2a0   : > { %1767 = vrot.lane.b32.xlu0 %v785_v8, %s6332_s0 }
 0x2a1   : > { %v5608_v60 = vpop.permute.xlu2 %881  ;;  %1639 = vrot.lane.b32.xlu1 %v753_v26, %s6331_s14  ;;  %v516_v26 = vld [vmem:[#allocation2 + $0x78] sm:$0xff] }
 0x2a2   : > { %v5610_v54 = vpop.permute.xlu0 %847 }
 0x2a3   : > { %v1742_v61 = vpop.permute.xlu1 %1741 }
 0x2a4   : > { %v2059_v33 = vsel %vm2049_vm9, %v2026_v28, %v1742_v61 }
 0x2a5   : > { %3956 = vmatmul.msk.f32.gmra.mxu0 %vm2091_vm10, %v2059_v33 }
 0x2a7   : > { %873 = vrot.lane.b32.xlu2 %v561_v35, %s6330_s29  ;;  %v1829_v35 = vsel %vm385_vm0, %v516_v26, %v5610_v54 }
 0x2a8   : > { %885 = vrot.lane.b32.xlu0 %v5201_v17, %s6330_s29  ;;  %v1972_v17 = vsel %vm1950_vm6, %v1939_v29, %v1382_v18 }
 0x2a9   : > { %v5633_v5 = vpop.permute.xlu2 %1009  ;;  %v2005_v9 = vsel %vm1983_vm7, %v1972_v17, %v5560_v46  ;;  %1779 = vrot.lane.b32.xlu1 %v791_v11, %s6332_s0  ;;  %v657_v46 = vld [vmem:[#allocation2 + $0x129] sm:$0xff] }
 0x2aa   : > { %v1648_v13 = vpop.permute.xlu0 %1647  ;;  %v2038_v56 = vsel %vm2016_vm8, %v2005_v9, %v1638_v51 }
 0x2ab   : > { %v5646_v36 = vpop.permute.xlu1 %855 }
 0x2af   : > { %1013 = vrot.lane.b32.xlu2 %v5205_v45, %s6324_s24 }
 0x2b0   : > { %1129 = vrot.lane.b32.xlu0 %v5370_v39, %s6325_s15  ;;  %v1878_v39 = vsel %vm1851_vm3, %v1845_v38, %v5468_v16 }
 0x2b1   : > { %v5648_v57 = vpop.permute.xlu2 %1137  ;;  %1001 = vrot.lane.b32.xlu1 %v593_v22, %s6324_s24  ;;  %v1911_v3 = vsel %vm1884_vm4, %v1878_v39, %v5553_v23 }
 0x2b2   : > { %v1766_v6 = vpop.permute.xlu0 %1765  ;;  %v1944_v62 = vsel %vm1917_vm5, %v1911_v3, %v5577_v15 }
 0x2b3   : > { %v2071_v24 = vsel %vm2049_vm9, %v2038_v56, %v1766_v6  ;;  %v976_v45 = vpop.permute.xlu1 %975  ;;  %v1977_v50 = vsel %vm1950_vm6, %v1944_v62, %v5551_v19  ;;  %v689_v19 = vld [vmem:[#allocation2 + $0x12a] sm:$0xff] }
 0x2b4   : > { %3968 = vmatmul.msk.f32.gmra.mxu2 %vm2091_vm10, %v2071_v24  ;;  %v1862_v53 = vsel %vm1851_vm3, %v1829_v35, %v976_v45 }
 0x2b7   : > { %1257 = vrot.lane.b32.xlu2 %v657_v46, %s6326_s30 }
 0x2b8   : > { %1269 = vrot.lane.b32.xlu0 %v5539_v59, %s6326_s30  ;;  %v2010_v59 = vsel %vm1983_vm7, %v1977_v50, %v5589_v20 }
 0x2b9   : > { %v5661_v51 = vpop.permute.xlu2 %1265  ;;  %1141 = vrot.lane.b32.xlu1 %v5519_v37, %s6325_s15  ;;  %v2043_v16 = vsel %vm2016_vm8, %v2010_v59, %v1648_v13  ;;  %v754_v37 = vld [vmem:[#allocation2 + $0x141] sm:$0xff] }
 0x2ba   : > { %v1104_v18 = vpop.permute.xlu0 %1103 }
 0x2bb   : > { %v1776_v23 = vpop.permute.xlu1 %1775  ;;  %v1895_v0 = vsel %vm1884_vm4, %v1862_v53, %v1104_v18 }
 0x2bc   : > { %v2076_v15 = vsel %vm2049_vm9, %v2043_v16, %v1776_v23 }
 0x2bd   : > { %3973 = vmatmul.msk.f32.gmra.mxu3 %vm2091_vm10, %v2076_v15 }
 0x2bf   : > { %1397 = vrot.lane.b32.xlu2 %v5541_v27, %s6327_s22 }
 0x2c0   : > { %1513 = vrot.lane.b32.xlu0 %v533_v21, %s6328_s25 }
 0x2c1   : > { %v1394_v47 = vpop.permute.xlu2 %1393  ;;  %1385 = vrot.lane.b32.xlu1 %v689_v19, %s6327_s22 }
 0x2c2   : > { %v1232_v40 = vpop.permute.xlu0 %1231 }
 0x2c3   : > { %v1112_v20 = vpop.permute.xlu1 %1111  ;;  %v2233_v27 = vpop.f32.mrf.mxu0  ;;  %v1928_v28 = vsel %vm1917_vm5, %v1895_v0, %v1232_v40 }
 0x2c4   : > { %v2234_v31 = vadd.f32 %v5533_v52, %v2233_v27 }
 0x2c6   : > { %2375 = vst.msk [vmem:[#allocation3 + $0x92] sm:$0xff] %vm1851_vm3, %v2234_v31 }
 0x2c7   : > { %1641 = vrot.lane.b32.xlu2 %v754_v37, %s6331_s14 }
 0x2c8   : > { %1653 = vrot.lane.b32.xlu0 %v760_v4, %s6331_s14 }
 0x2c9   : > { %v2245_v8 = vpop.f32.mrf.mxu1  ;;  %v1522_v58 = vpop.permute.xlu2 %1521  ;;  %1525 = vrot.lane.b32.xlu1 %v728_v14, %s6328_s25 }
 0x2ca   : > { %v2246_v42 = vadd.f32 %v5533_v52, %v2245_v8  ;;  %v1360_v49 = vpop.permute.xlu0 %1359 }
 0x2cb   : > { %v1240_v2 = vpop.permute.xlu1 %1239  ;;  %v1961_v61 = vsel %vm1950_vm6, %v1928_v28, %v1360_v49  ;;  %v534_v49 = vld [vmem:[#allocation2 + $0x150] sm:$0xff] }
 0x2cc   : > { %2379 = vst.msk [vmem:[#allocation3 + $0xc2] sm:$0xff] %vm1851_vm3, %v2246_v42 }
 0x2cf   : > { %1781 = vrot.lane.b32.xlu2 %v792_v30, %s6332_s0 }
 0x2d0   : > { %2816 = vrot.lane.b32.xlu0 %v5421_v48, %s6324_s24  ;;  %v1846_v48 = vsel %vm385_vm0, %v533_v21, %v5608_v60 }
 0x2d1   : > { %v1650_v32 = vpop.permute.xlu2 %1649  ;;  %1769 = vrot.lane.b32.xlu1 %v786_v10, %s6332_s0  ;;  %v1879_v33 = vsel %vm1851_vm3, %v1846_v48, %v5633_v5 }
 0x2d2   : > { %v1488_v55 = vpop.permute.xlu0 %1487  ;;  %v1912_v17 = vsel %vm1884_vm4, %v1879_v33, %v5648_v57 }
 0x2d3   : > { %v1368_v63 = vpop.permute.xlu1 %1367  ;;  %v1994_v54 = vsel %vm1983_vm7, %v1961_v61, %v1488_v55  ;;  %v1945_v9 = vsel %vm1917_vm5, %v1912_v17, %v5661_v51 }
 0x2d4   : > { %v1978_v24 = vsel %vm1950_vm6, %v1945_v9, %v1394_v47 }
 0x2d5   : > { %v2011_v46 = vsel %vm1983_vm7, %v1978_v24, %v1522_v58  ;;  %v2447_v24 = vld [vmem:[#allocation3 + $0x70] sm:$0xf] }
 0x2d6   : > { %v2044_v57 = vsel %vm2016_vm8, %v2011_v46, %v1650_v32 }
 0x2d9   : > { %v884_v43 = vpop.permute.xlu2 %883  ;;  %2835 = vrot.lane.b32.xlu1 %v5444_v41, %s6326_s30  ;;  %v520_v41 = vld [vmem:[#allocation2 + $0xa8] sm:$0xff] }
 0x2da   : > { %v1616_v1 = vpop.permute.xlu0 %1615  ;;  %v1833_v56 = vsel %vm385_vm0, %v520_v41, %v5646_v36 }
 0x2db   : > { %v1496_v34 = vpop.permute.xlu1 %1495  ;;  %v2027_v13 = vsel %vm2016_vm8, %v1994_v54, %v1616_v1  ;;  %v1866_v45 = vsel %vm1851_vm3, %v1833_v56, %v5587_v25 }
 0x2dc   : > { %v1899_v51 = vsel %vm1884_vm4, %v1866_v45, %v1112_v20  ;;  %v528_v20 = vld [vmem:[#allocation2 + $0x108] sm:$0xff] }
 0x2dd   : > { %v1932_v36 = vsel %vm1917_vm5, %v1899_v51, %v1240_v2  ;;  %v1847_v2 = vsel %vm385_vm0, %v534_v49, %v884_v43  ;;  %v2503_v49 = vld [vmem:[#allocation3 + $0x118] sm:$0xf] }
 0x2de   : > { %v1965_v3 = vsel %vm1950_vm6, %v1932_v36, %v1368_v63 }
 0x2df   : > { %v1998_v50 = vsel %vm1983_vm7, %v1965_v3, %v1496_v34 }
 0x2e1   : > { %v2284_v11 = vpop.f32.mrf.mxu3  ;;  %v1128_v5 = vpop.permute.xlu2 %1127 }
 0x2e2   : > { %v1744_v29 = vpop.permute.xlu0 %1743  ;;  %v2285_v6 = vadd.f32 %v5533_v52, %v2284_v11 }
 0x2e3   : > { %v2060_v60 = vsel %vm2049_vm9, %v2027_v13, %v1744_v29  ;;  %v1624_v22 = vpop.permute.xlu1 %1623 }
 0x2e4   : > { %3957 = vmatmul.msk.f32.gmra.mxu0 %vm2091_vm10, %v2060_v60  ;;  %2392 = vst.msk [vmem:[#allocation3 + $0x15a] sm:$0xff] %vm1851_vm3, %v2285_v6  ;;  %v2031_v21 = vsel %vm2016_vm8, %v1998_v50, %v1624_v22  ;;  %v2456_v22 = vld [vmem:[#allocation3 + $0xb8] sm:$0xf] }
 0x2e5   : > { %v2482_v51 = vsel %vm2307_vm11, %v2456_v22, -inf  ;;  %v2451_v22 = vld [vmem:[#allocation3 + $0x90] sm:$0xff] }
 0x2e8   : > { %v2269_v18 = vpop.f32.mrf.mxu2 }
 0x2e9   : > { %v2270_v62 = vadd.f32 %v5533_v52, %v2269_v18  ;;  %v1268_v16 = vpop.permute.xlu2 %1267  ;;  %v535_v18 = vld [vmem:[#allocation2 + $0x158] sm:$0xff] }
 0x2ea   : > { %v1778_v38 = vpop.permute.xlu0 %1777 }
 0x2eb   : > { %v2077_v39 = vsel %vm2049_vm9, %v2044_v57, %v1778_v38  ;;  %2387 = vst.msk [vmem:[#allocation3 + $0x122] sm:$0xff] %vm1851_vm3, %v2270_v62  ;;  %v1752_v25 = vpop.permute.xlu1 %1751  ;;  %v2450_v57 = vld [vmem:[#allocation3 + $0x88] sm:$0xf] }
 0x2ec   : > { %3974 = vmatmul.msk.f32.gmra.mxu3 %vm2091_vm10, %v2077_v39  ;;  %v2064_v59 = vsel %vm2049_vm9, %v2031_v21, %v1752_v25  ;;  %v2478_v39 = vsel %vm2307_vm11, %v2447_v24, -inf  ;;  %v2479_v62 = vsel %vm2307_vm11, %v2450_v57, -inf  ;;  %v2457_v57 = vld [vmem:[#allocation3 + $0xc0] sm:$0xff] }
 0x2ed   : > { %3961 = vmatmul.msk.f32.gmra.mxu1 %vm2091_vm10, %v2064_v59  ;;  %v2483_v21 = vmax.f32 %v2479_v62, %v2482_v51 }
 0x2f1   : > { %v1512_v40 = vpop.permute.xlu2 %1511 }
 0x2f2   : > { %v1000_v23 = vpop.permute.xlu0 %999 }
 0x2f3   : > { %v872_v15 = vpop.permute.xlu1 %871 }
 0x2f4   : > { %v1841_v8 = vsel %vm385_vm0, %v528_v20, %v872_v15  ;;  %v529_v15 = vld [vmem:[#allocation2 + $0x110] sm:$0xff] }
 0x2f5   : > { %v1874_v42 = vsel %vm1851_vm3, %v1841_v8, %v1000_v23 }
 0x2f6   : > { %v1907_v30 = vsel %vm1884_vm4, %v1874_v42, %v1128_v5  ;;  %v2500_v42 = vld [vmem:[#allocation3 + $0x100] sm:$0xf] }
 0x2f9   : > { %v1652_v37 = vpop.permute.xlu2 %1651 }
 0x2fa   : > { %v1140_v47 = vpop.permute.xlu0 %1139 }
 0x2fb   : > { %v1012_v19 = vpop.permute.xlu1 %1011 }
 0x2fc   : > { %v1880_v32 = vsel %vm1851_vm3, %v1847_v2, %v1012_v19 }
 0x2fd   : > { %v1913_v26 = vsel %vm1884_vm4, %v1880_v32, %v1140_v47  ;;  %v2527_v32 = vsel %vm2307_vm11, %v2500_v42, -inf  ;;  %v2499_v42 = vld [vmem:[#allocation3 + $0xf8] sm:$0xff] }
 0x2fe   : > { %v1946_v53 = vsel %vm1917_vm5, %v1913_v26, %v1268_v16 }
 0x301   : > { %v874_v14 = vpop.permute.xlu2 %873 }
 0x302   : > { %v1384_v4 = vpop.permute.xlu0 %1383  ;;  %v1842_v20 = vsel %vm385_vm0, %v529_v15, %v874_v14  ;;  %v2529_v14 = vsel %vm2307_vm11, %v2503_v49, -inf  ;;  %v2501_v49 = vld [vmem:[#allocation3 + $0x108] sm:$0xff] }
 0x303   : > { %v1256_v27 = vpop.permute.xlu1 %1255 }
 0x304   : > { %v1940_v55 = vsel %vm1917_vm5, %v1907_v30, %v1256_v27 }
 0x305   : > { %v1973_v63 = vsel %vm1950_vm6, %v1940_v55, %v1384_v4  ;;  %v2497_v55 = vld [vmem:[#allocation3 + $0xe8] sm:$0xf] }
 0x306   : > { %v2006_v1 = vsel %vm1983_vm7, %v1973_v63, %v1512_v40 }
 0x309   : > { %v1014_v0 = vpop.permute.xlu2 %1013 }
 0x30a   : > { %v1524_v31 = vpop.permute.xlu0 %1523 }
 0x30b   : > { %v1396_v58 = vpop.permute.xlu1 %1395 }
 0x30c   : > { %v1979_v28 = vsel %vm1950_vm6, %v1946_v53, %v1396_v58 }
 0x30d   : > { %v2012_v34 = vsel %vm1983_vm7, %v1979_v28, %v1524_v31  ;;  %v2526_v28 = vsel %vm2307_vm11, %v2497_v55, -inf }
 0x30e   : > { %v2045_v33 = vsel %vm2016_vm8, %v2012_v34, %v1652_v37 }
 0x311   : > { %v1258_v41 = vpop.permute.xlu2 %1257 }
 0x312   : > { %v1768_v10 = vpop.permute.xlu0 %1767 }
 0x313   : > { %v1640_v35 = vpop.permute.xlu1 %1639 }
 0x314   : > { %v2039_v48 = vsel %vm2016_vm8, %v2006_v1, %v1640_v35 }
 0x315   : > { %v2072_v43 = vsel %vm2049_vm9, %v2039_v48, %v1768_v10 }
 0x316   : > { %3969 = vmatmul.msk.f32.gmra.mxu2 %vm2091_vm10, %v2072_v43 }
 0x319   : > { %v1398_v56 = vpop.permute.xlu2 %1397 }
 0x31a   : > { %v886_v61 = vpop.permute.xlu0 %885 }
 0x31b   : > { %v2248_v54 = vpop.f32.mrf.mxu1  ;;  %v1780_v13 = vpop.permute.xlu1 %1779  ;;  %v1848_v16 = vsel %vm385_vm0, %v535_v18, %v886_v61  ;;  %v2466_v18 = vsel %vm1851_vm3, %v2457_v57, -inf }
 0x31c   : > { %v2249_v29 = vadd.f32 %v5533_v52, %v2248_v54  ;;  %v2078_v60 = vsel %vm2049_vm9, %v2045_v33, %v1780_v13  ;;  %v1881_v37 = vsel %vm1851_vm3, %v1848_v16, %v1014_v0  ;;  %v2530_v33 = vmax.f32 %v2526_v28, %v2529_v14 }
 0x31d   : > { %3975 = vmatmul.msk.f32.gmra.mxu3 %vm2091_vm10, %v2078_v60  ;;  %v2511_v14 = vsel %vm1851_vm3, %v2501_v49, -inf }
 0x31e   : > { %2380 = vst.msk [vmem:[#allocation3 + $0xca] sm:$0xff] %vm1851_vm3, %v2249_v29 }
 0x321   : > { %v1642_v40 = vpop.permute.xlu2 %1641 }
 0x322   : > { %v1130_v17 = vpop.permute.xlu0 %1129  ;;  %v2236_v11 = vpop.f32.mrf.mxu0 }
 0x323   : > { %v2237_v9 = vadd.f32 %v5533_v52, %v2236_v11  ;;  %v1002_v6 = vpop.permute.xlu1 %1001 }
 0x324   : > { %v1875_v8 = vsel %vm1851_vm3, %v1842_v20, %v1002_v6 }
 0x325   : > { %2376 = vst.msk [vmem:[#allocation3 + $0x9a] sm:$0xff] %vm1851_vm3, %v2237_v9  ;;  %v2459_v38 = vld [vmem:[#allocation3 + $0xd0] sm:$0xf]  ;;  %v1908_v2 = vsel %vm1884_vm4, %v1875_v8, %v1130_v17  ;;  %v2458_v51 = vld [vmem:[#allocation3 + $0xc8] sm:$0xff]  ;;  %v2504_v8 = vld [vmem:[#allocation3 + $0x120] sm:$0xff] }
 0x326   : > { %v2484_v50 = vsel %vm2307_vm11, %v2459_v38, -inf  ;;  %v2494_v31 = vld [vmem:[#allocation3 + $0xd0] sm:$0xf]  ;;  %v1941_v35 = vsel %vm1917_vm5, %v1908_v2, %v1258_v41  ;;  %v2448_v38 = vld [vmem:[#allocation3 + $0x78] sm:$0xff]  ;;  %v5807_v2 = vsel %vm1851_vm3, %v2504_v8, -inf }
 0x327   : > { %v2525_v30 = vsel %vm2307_vm11, %v2494_v31, -inf  ;;  %v2498_v31 = vld [vmem:[#allocation3 + $0xf0] sm:$0xff] }
 0x328   : > { %v2528_v1 = vmax.f32 %v2525_v30, %v2527_v32  ;;  %v2509_v30 = vsel %vm1851_vm3, %v2498_v31, -inf  ;;  %v2518_v32 = vsel %vm1851_vm3, %v2499_v42, -inf }
 0x329   : > { %v1782_v0 = vpop.permute.xlu2 %1781 }
 0x32a   : > { %v1270_v5 = vpop.permute.xlu0 %1269 }
 0x32b   : > { %v1142_v46 = vpop.permute.xlu1 %1141 }
 0x32c   : > { %v2453_v45 = vld [vmem:[#allocation3 + $0xa0] sm:$0xf]  ;;  %v1914_v27 = vsel %vm1884_vm4, %v1881_v37, %v1142_v46  ;;  %v2452_v24 = vld [vmem:[#allocation3 + $0x98] sm:$0xff] }
 0x32d   : > { %v2480_v36 = vsel %vm2307_vm11, %v2453_v45, -inf  ;;  %v1947_v58 = vsel %vm1917_vm5, %v1914_v27, %v1270_v5  ;;  %v2471_v46 = vsel %vm1851_vm3, %v2452_v24, -inf  ;;  %v2462_v45 = vsel %vm1851_vm3, %v2451_v22, -inf }
 0x32e   : > { %v2481_v3 = vmax.f32 %v2478_v39, %v2480_v36  ;;  %v1980_v63 = vsel %vm1950_vm6, %v1947_v58, %v1398_v56  ;;  %v2449_v39 = vld [vmem:[#allocation3 + $0x80] sm:$0xff]  ;;  %v2472_v36 = vmax.f32 %v5284_v12, %v2471_v46  ;;  %v2463_v62 = vmax.f32 %v5157_v44, %v2462_v45  ;;  %v2502_v58 = vld [vmem:[#allocation3 + $0x110] sm:$0xff] }
 0x330   : > { %v2485_v25 = vmax.f32 %v2481_v3, %v2484_v50  ;;  %v2461_v3 = vsel %vm1851_vm3, %v2448_v38, -inf  ;;  %v2467_v15 = vmax.f32 %v2463_v62, %v2466_v18 }
 0x332   : > { %v1514_v59 = vpop.permute.xlu0 %1513  ;;  %v2486_v47 = vmax.f32 %v2485_v25, %v2483_v21  ;;  %v2470_v25 = vsel %vm1851_vm3, %v2449_v39, -inf }
 0x333   : > { %v1386_v4 = vpop.permute.xlu1 %1385 }
 0x334   : > { %2490 = vst.msk [vmem:[#allocation4 + $0x28] sm:$0xf] %vm2307_vm11, %v2486_v47  ;;  %v1974_v43 = vsel %vm1950_vm6, %v1941_v35, %v1386_v4 }
 0x335   : > { %v2007_v29 = vsel %vm1983_vm7, %v1974_v43, %v1514_v59  ;;  %v2475_v59 = vsel %vm1851_vm3, %v2458_v51, -inf }
 0x336   : > { %v2040_v11 = vsel %vm2016_vm8, %v2007_v29, %v1642_v40  ;;  %v2476_v47 = vmax.f32 %v2472_v36, %v2475_v59  ;;  %v2519_v28 = vmax.f32 %v2475_v59, %v2518_v32 }
 0x337   : > { %v2272_v23 = vpop.f32.mrf.mxu2 }
 0x338   : > { %v2273_v19 = vadd.f32 %v5533_v52, %v2272_v23 }
 0x33a   : > { %2388 = vst.msk [vmem:[#allocation3 + $0x12a] sm:$0xff] %vm1851_vm3, %v2273_v19  ;;  %v1654_v10 = vpop.permute.xlu0 %1653 }
 0x33b   : > { %v1526_v26 = vpop.permute.xlu1 %1525 }
 0x33c   : > { %v2013_v48 = vsel %vm1983_vm7, %v1980_v63, %v1526_v26  ;;  %v2520_v63 = vsel %vm1851_vm3, %v2502_v58, -inf }
 0x33d   : > { %v2046_v34 = vsel %vm2016_vm8, %v2013_v48, %v1654_v10  ;;  %v2510_v10 = vmax.f32 %v2466_v18, %v2509_v30 }
 0x33e   : > { %v2079_v13 = vsel %vm2049_vm9, %v2046_v34, %v1782_v0 }
 0x33f   : > { %3976 = vmatmul.msk.f32.gmra.mxu3 %vm2091_vm10, %v2079_v13 }
 0x340   : > { %v2287_v17 = vpop.f32.mrf.mxu3 }
 0x341   : > { %v2506_v53 = vld [vmem:[#allocation3 + $0x130] sm:$0xf]  ;;  %v2288_v41 = vadd.f32 %v5533_v52, %v2287_v17  ;;  %v2505_v55 = vld [vmem:[#allocation3 + $0x128] sm:$0xff] }
 0x342   : > { %v2531_v61 = vsel %vm2307_vm11, %v2506_v53, -inf  ;;  %v5814_v35 = vsel %vm1851_vm3, %v2505_v55, -inf }
 0x343   : > { %v2532_v54 = vmax.f32 %v2528_v1, %v2531_v61  ;;  %2393 = vst.msk [vmem:[#allocation3 + $0x16a] sm:$0xff] %vm1851_vm3, %v2288_v41  ;;  %v1770_v9 = vpop.permute.xlu1 %1769  ;;  %v2514_v1 = vmax.f32 %v2510_v10, %v5807_v2 }
 0x344   : > { %v2073_v6 = vsel %vm2049_vm9, %v2040_v11, %v1770_v9 }
 0x345   : > { %v2533_v60 = vmax.f32 %v2532_v54, %v2530_v33  ;;  %3970 = vmatmul.msk.f32.gmra.mxu2 %vm2091_vm10, %v2073_v6 }
 0x347   : > { %2537 = vst.msk [vmem:[#allocation4 + $0x40] sm:$0xf] %vm2307_vm11, %v2533_v60 }
 0x361   : > { %v2239_v5 = vpop.f32.mrf.mxu0 }
 0x362   : > { %v2240_v56 = vadd.f32 %v5533_v52, %v2239_v5 }
 0x364   : > { %2377 = vst.msk [vmem:[#allocation3 + $0xaa] sm:$0xff] %vm1851_vm3, %v2240_v56  ;;  %v2523_v56 = vmax.f32 %v2519_v28, %v5814_v35 }
 0x36a   : > { %v2251_v37 = vpop.f32.mrf.mxu1 }
 0x36b   : > { %v2454_v50 = vld [vmem:[#allocation3 + $0xa8] sm:$0xff]  ;;  %v2455_v21 = vld [vmem:[#allocation3 + $0xb0] sm:$0xff]  ;;  %v2252_v44 = vadd.f32 %v5533_v52, %v2251_v37 }
 0x36c   : > { %v2464_v16 = vsel %vm1851_vm3, %v2454_v50, -inf  ;;  %v2473_v23 = vsel %vm1851_vm3, %v2455_v21, -inf }
 0x36d   : > { %v2465_v40 = vmax.f32 %v2461_v3, %v2464_v16  ;;  %v2474_v12 = vmax.f32 %v2470_v25, %v2473_v23  ;;  %2381 = vst.msk [vmem:[#allocation3 + $0xda] sm:$0xff] %vm1851_vm3, %v2252_v44 }
 0x36f   : > { %v2468_v19 = vmax.f32 %v2467_v15, %v2465_v40  ;;  %v2477_v4 = vmax.f32 %v2476_v47, %v2474_v12  ;;  %v2290_v20 = vpop.f32.mrf.mxu3 }
 0x370   : > { %v2291_v27 = vadd.f32 %v5533_v52, %v2290_v20 }
 0x371   : > { %2488 = vst.msk [vmem:[#allocation4 + $0x18] sm:$0xff] %vm1851_vm3, %v2468_v19 }
 0x372   : > { %2489 = vst.msk [vmem:[#allocation4 + $0x20] sm:$0xff] %vm1851_vm3, %v2477_v4 }
 0x373   : > { %2394 = vst.msk [vmem:[#allocation3 + $0x172] sm:$0xff] %vm1851_vm3, %v2291_v27 }
 0x374   : > { %v2495_v54 = vld [vmem:[#allocation3 + $0xd8] sm:$0xff]  ;;  %v2496_v17 = vld [vmem:[#allocation3 + $0xe0] sm:$0xff] }
 0x375   : > { %v2508_v41 = vsel %vm1851_vm3, %v2495_v54, -inf  ;;  %v2517_v5 = vsel %vm1851_vm3, %v2496_v17, -inf }
 0x376   : > { %v2512_v6 = vmax.f32 %v2508_v41, %v2511_v14  ;;  %v2521_v46 = vmax.f32 %v2517_v5, %v2520_v63 }
 0x378   : > { %v2586_v26 = vld [vmem:[#allocation4 + $0x18] sm:$0x1f]  ;;  %v2515_v45 = vmax.f32 %v2514_v1, %v2512_v6  ;;  %v2524_v36 = vmax.f32 %v2523_v56, %v2521_v46 }
 0x379   : > { %v2597_v53 = vsel %vm2589_vm12, %v2586_v26, -inf  ;;  %v2624_v48 = vld [vmem:[#allocation4 + $0x1c] sm:$0x1f]  ;;  %v2696_v33 = vld [vmem:[#allocation4 + $0x24] sm:$0x1f] }
 0x37a   : > { %v2660_v0 = vld [vmem:[#allocation4 + $0x20] sm:$0x1f]  ;;  %v2598_v43 = vrot.slane %v2597_v53, 4  ;;  %v2634_v61 = vsel %vm2589_vm12, %v2624_v48, -inf  ;;  %v2706_v60 = vsel %vm2589_vm12, %v2696_v33, -inf  ;;  %2535 = vst.msk [vmem:[#allocation4 + $0x30] sm:$0xff] %vm1851_vm3, %v2515_v45 }
 0x37b   : > { %v2670_v34 = vsel %vm2589_vm12, %v2660_v0, -inf  ;;  %v2635_v13 = vrot.slane %v2634_v61, 4  ;;  %v2707_v9 = vrot.slane %v2706_v60, 4  ;;  %2536 = vst.msk [vmem:[#allocation4 + $0x38] sm:$0xff] %vm1851_vm3, %v2524_v36  ;;  %v2767_v46 = vld [vmem:[#allocation6 + $0x9] sm:$0xf] }
 0x37c   : > { %v2671_v29 = vrot.slane %v2670_v34, 4  ;;  %v2599_v11 = vmax.f32 %v2597_v53, %v2598_v43  ;;  %v2545_v36 = vld [vmem:[#allocation3 + $0x150] sm:$0xff] }
 0x37d   : > { %v2636_v24 = vmax.f32 %v2634_v61, %v2635_v13  ;;  %v2708_v38 = vmax.f32 %v2706_v60, %v2707_v9 }
 0x37e   : > { %v2672_v22 = vmax.f32 %v2670_v34, %v2671_v29  ;;  %v2600_v57 = vrot.slane %v2599_v11, 2 }
 0x37f   : > { %v2637_v39 = vrot.slane %v2636_v24, 2  ;;  %v2709_v3 = vrot.slane %v2708_v38, 2 }
 0x380   : > { %v2673_v51 = vrot.slane %v2672_v22, 2  ;;  %v2601_v18 = vmax.f32 %v2599_v11, %v2600_v57 }
 0x381   : > { %v2638_v62 = vmax.f32 %v2636_v24, %v2637_v39  ;;  %v2710_v25 = vmax.f32 %v2708_v38, %v2709_v3  ;;  %v2587_v19 = vld [vmem:[#allocation4 + $0x30] sm:$0x1f]  ;;  %v2771_v3 = vld [vmem:[#allocation6 + $0xa] sm:$0xf] }
 0x382   : > { %v2674_v50 = vmax.f32 %v2672_v22, %v2673_v51  ;;  %v2602_v21 = vrot.slane %v2601_v18, 1  ;;  %v2604_v4 = vsel %vm2589_vm12, %v2587_v19, -inf  ;;  %v2625_v37 = vld [vmem:[#allocation4 + $0x34] sm:$0x1f]  ;;  %v2697_v42 = vld [vmem:[#allocation4 + $0x3c] sm:$0x1f] }
 0x383   : > { %v2639_v59 = vrot.slane %v2638_v62, 1  ;;  %v2711_v15 = vrot.slane %v2710_v25, 1  ;;  %v2605_v20 = vrot.slane %v2604_v4, 4  ;;  %v2641_v44 = vsel %vm2589_vm12, %v2625_v37, -inf  ;;  %v2661_v27 = vld [vmem:[#allocation4 + $0x38] sm:$0x1f] }
 0x384   : > { %v2675_v16 = vrot.slane %v2674_v50, 1  ;;  %v2603_v23 = vmax.f32 %v2601_v18, %v2602_v21  ;;  %v2642_v31 = vrot.slane %v2641_v44, 4  ;;  %v2677_v8 = vsel %vm2589_vm12, %v2661_v27, -inf }
 0x385   : > { %v2640_v47 = vmax.f32 %v2638_v62, %v2639_v59  ;;  %v2712_v12 = vmax.f32 %v2710_v25, %v2711_v15  ;;  %v2606_v49 = vmax.f32 %v2604_v4, %v2605_v20  ;;  %v2678_v58 = vrot.slane %v2677_v8, 4  ;;  %v2548_v62 = vld [vmem:[#allocation3 + $0x168] sm:$0xff] }
 0x386   : > { %v2676_v40 = vmax.f32 %v2674_v50, %v2675_v16  ;;  %2620 = vst.msk [vmem:[#allocation5 + $0x4] sm:$0x1] %vm2618_vm13, %v2603_v23  ;;  %v2713_v30 = vsel %vm2589_vm12, %v2697_v42, -inf  ;;  %v2643_v55 = vmax.f32 %v2641_v44, %v2642_v31  ;;  %v2556_v50 = vsel %vm1851_vm3, %v2545_v36, -inf }
 0x387   : > { %2656 = vst.msk [vmem:[#allocation5 + $0x5] sm:$0x1] %vm2618_vm13, %v2640_v47  ;;  %v2714_v10 = vrot.slane %v2713_v30, 4  ;;  %v2607_v32 = vrot.slane %v2606_v49, 2  ;;  %v2679_v14 = vmax.f32 %v2677_v8, %v2678_v58  ;;  %v2557_v59 = vmax.f32 %v5807_v2, %v2556_v50 }
 0x388   : > { %2692 = vst.msk [vmem:[#allocation5 + $0x6] sm:$0x1] %vm2618_vm13, %v2676_v40  ;;  %v2644_v63 = vrot.slane %v2643_v55, 2  ;;  %v2558_v23 = vsel %vm1851_vm3, %v2548_v62, -inf }
 0x389   : > { %2728 = vst.msk [vmem:[#allocation5 + $0x7] sm:$0x1] %vm2618_vm13, %v2712_v12  ;;  %v2715_v26 = vmax.f32 %v2713_v30, %v2714_v10  ;;  %v2608_v1 = vmax.f32 %v2606_v49, %v2607_v32  ;;  %v2680_v53 = vrot.slane %v2679_v14, 2 }
 0x38a   : > { %v2645_v0 = vmax.f32 %v2643_v55, %v2644_v63 }
 0x38b   : > { %v2716_v28 = vrot.slane %v2715_v26, 2  ;;  %v2609_v61 = vrot.slane %v2608_v1, 1  ;;  %v2681_v34 = vmax.f32 %v2679_v14, %v2680_v53 }
 0x38c   : > { %v2646_v33 = vrot.slane %v2645_v0, 1 }
 0x38d   : > { %v2717_v54 = vmax.f32 %v2715_v26, %v2716_v28  ;;  %v2610_v13 = vmax.f32 %v2608_v1, %v2609_v61  ;;  %v2682_v29 = vrot.slane %v2681_v34, 1 }
 0x38e   : > { %v2647_v60 = vmax.f32 %v2645_v0, %v2646_v33 }
 0x38f   : > { %v2718_v17 = vrot.slane %v2717_v54, 1  ;;  %2621 = vst.msk [vmem:[#allocation5 + $0x8] sm:$0x1] %vm2618_vm13, %v2610_v13  ;;  %v2683_v41 = vmax.f32 %v2681_v34, %v2682_v29  ;;  %v4069_v34 = vld [vmem:[%s6329_s2] ss:$0 sm:$0xff]  ;;  %s6335_s2 = smov 48  }
 0x390   : > { %v5833_v48 = vld [vmem:[#allocation5 + $0x4] sm:$0xf]  ;;  %2657 = vst.msk [vmem:[#allocation5 + $0x9] sm:$0x1] %vm2618_vm13, %v2647_v60  ;;  %v3032_v60 = vld [vmem:[#allocation6] sm:$0xf] }
 0x391   : > { %v2743_v43 = vmax.f32 %v5833_v48, 0.0  ;;  %v2719_v11 = vmax.f32 %v2717_v54, %v2718_v17  ;;  %2693 = vst.msk [vmem:[#allocation5 + $0xa] sm:$0x1] %vm2618_vm13, %v2683_v41  ;;  %v2541_v17 = vld [vmem:[#allocation3 + $0x130] sm:$0xf] }
 0x393   : > { %2748 = vst.msk [vmem:[#allocation6 + $0x11] sm:$0xf] %vm2307_vm11, %v2743_v43 }
 0x394   : > { %2729 = vst.msk [vmem:[#allocation5 + $0xb] sm:$0x1] %vm2618_vm13, %v2719_v11  ;;  %v2546_v11 = vld [vmem:[#allocation3 + $0x158] sm:$0xff] }
 0x399   : > { %v2275_v5 = vpop.f32.mrf.mxu2 }
 0x39a   : > { %v2753_v9 = vld [vmem:[#allocation6 + $0x10] sm:$0xf]  ;;  %v2276_v24 = vadd.f32 %v5533_v52, %v2275_v5 }
 0x39b   : > { %v2764_v6 = vld [vmem:[#allocation6 + $0x10] sm:$0xf]  ;;  %2796 = vst [vmem:[#allocation1 + $0x10] ss:$2 sm:$0xff] %v2753_v9  ;;  %v5841_v56 = vld [vmem:[#allocation5 + $0x8] sm:$0xf] }
 0x39c   : > { %2847 = vst [vmem:[#allocation1 + $0x1] ss:$2 sm:$0xff] %v2764_v6  ;;  %v2744_v22 = vmax.f32 %v5841_v56, 0.0  ;;  %v2768_v45 = vld [vmem:[#allocation6 + $0x11] sm:$0xf]  ;;  %v2572_v6 = vsel %vm2307_vm11, %v2541_v17, -inf }
 0x39d   : > { %2389 = vst.msk [vmem:[#allocation3 + $0x13a] sm:$0xff] %vm1851_vm3, %v2276_v24  ;;  %v2772_v16 = vld [vmem:[#allocation6 + $0x12] sm:$0xf]  ;;  %v2983_v17 = vld [vmem:[%s6333_s3 + $0x40] sm:$0xff] }
 0x39e   : > { %2749 = vst.msk [vmem:[#allocation6 + $0x19] sm:$0xf] %vm2307_vm11, %v2744_v22  ;;  %v2757_v12 = vld [vmem:[#allocation6 + $0x11] sm:$0xf]  ;;  %v2549_v22 = vld [vmem:[#allocation3 + $0x170] sm:$0xff]  ;;  %3002 = vmatpush.msrb.mxu1 %v2983_v17 }
 0x39f   : > { %v2776_v2 = vld [vmem:[#allocation6 + $0x10] sm:$0xf]  ;;  %v2567_v62 = vsel %vm1851_vm3, %v2549_v22, -inf  ;;  %v2979_v22 = vld [vmem:[%s6333_s3 + $0x20] sm:$0xff] }
 0x3a0   : > { %v2293_v38 = vpop.f32.mrf.mxu3  ;;  %v2761_v27 = vld [vmem:[#allocation6 + $0x12] sm:$0xf] }
 0x3a1   : > { %v2294_v39 = vadd.f32 %v5533_v52, %v2293_v38  ;;  %v2780_v30 = vld [vmem:[#allocation6 + $0x11] sm:$0xf] }
 0x3a2   : > { %v2784_v28 = vld [vmem:[#allocation6 + $0x12] sm:$0xf] }
 0x3a3   : > { %v2852_v57 = vld.sshfl [vmem:[#allocation1] sm:$0xff pattern:$0x75316420]  ;;  %2395 = vst.msk [vmem:[#allocation3 + $0x182] sm:$0xff] %vm1851_vm3, %v2294_v39  ;;  %v2547_v9 = vld [vmem:[#allocation3 + $0x160] sm:$0xf] }
 0x3a4   : > { %2864 = vst [vmem:[#allocation1] ss:$2 sm:$0xff] %v2767_v46  ;;  %2854 = vrot.lane.b32.xlu2 %v2852_v57, %s6328_s25  ;;  %v2542_v18 = vld [vmem:[#allocation3 + $0x138] sm:$0xff]  ;;  %v2565_v57 = vsel %vm1851_vm3, %v2546_v11, -inf  ;;  %v2574_v38 = vsel %vm2307_vm11, %v2547_v9, -inf  ;;  %v2980_v9 = vld [vmem:[%s6333_s3 + $0x28] sm:$0xff] }
 0x3a5   : > { %2866 = vst [vmem:[#allocation1 + $0x1] ss:$2 sm:$0xff] %v2768_v45  ;;  %v2754_v51 = vld [vmem:[#allocation6 + $0x18] sm:$0xf]  ;;  %v2555_v25 = vsel %vm1851_vm3, %v2542_v18, -inf  ;;  %v2575_v36 = vmax.f32 %v2572_v6, %v2574_v38  ;;  %v2981_v11 = vld [vmem:[%s6333_s3 + $0x30] sm:$0xff] }
 0x3a6   : > { %2798 = vst [vmem:[#allocation1 + $0x11] ss:$2 sm:$0xff] %v2754_v51  ;;  %v2559_v47 = vmax.f32 %v2555_v25, %v2558_v23  ;;  %v2758_v37 = vld [vmem:[#allocation6 + $0x19] sm:$0xf]  ;;  %v2550_v46 = vld [vmem:[#allocation3 + $0x178] sm:$0xf]  ;;  %v2566_v51 = vmax.f32 %v5814_v35, %v2565_v57 }
 0x3a7   : > { %v2777_v44 = vld [vmem:[#allocation6 + $0x18] sm:$0xf]  ;;  %v2576_v50 = vsel %vm2307_vm11, %v2550_v46, -inf  ;;  %v2779_v6 = vld [vmem:[#allocation6 + $0x28] sm:$0xf]  ;;  %v2978_v46 = vld [vmem:[%s6333_s3 + $0x18] sm:$0xff] }
 0x3a8   : > { %v2762_v8 = vld [vmem:[#allocation6 + $0x1a] sm:$0xf]  ;;  %v2977_v57 = vld [vmem:[%s6333_s3 + $0x10] sm:$0xff]  ;;  %v2976_v38 = vld [vmem:[%s6333_s3 + $0x8] sm:$0xff] }
 0x3a9   : > { %v2781_v10 = vld [vmem:[#allocation6 + $0x19] sm:$0xf] }
 0x3aa   : > { %v2551_v52 = vld [vmem:[#allocation3 + $0x180] sm:$0xff]  ;;  %v2765_v63 = vld [vmem:[#allocation6 + $0x18] sm:$0xf] }
 0x3ab   : > { %v2560_v15 = vsel %vm1851_vm3, %v2551_v52, -inf  ;;  %v2785_v54 = vld [vmem:[#allocation6 + $0x1a] sm:$0xf] }
 0x3ac   : > { %v2871_v21 = vld.sshfl [vmem:[#allocation1] sm:$0xff pattern:$0x75316420]  ;;  %v2561_v40 = vmax.f32 %v2557_v59, %v2560_v15 }
 0x3ad   : > { %2883 = vst [vmem:[#allocation1] ss:$2 sm:$0xff] %v2771_v3  ;;  %2873 = vrot.lane.b32.xlu0 %v2871_v21, %s6332_s0  ;;  %v5856_v19 = vld.sshfl [vmem:[#allocation1 + $0x10] sm:$0xff pattern:$0x75316420] }
 0x3ae   : > { %2885 = vst [vmem:[#allocation1 + $0x1] ss:$2 sm:$0xff] %v2772_v16  ;;  %v2562_v4 = vmax.f32 %v2561_v40, %v2559_v47 }
 0x3af   : > { %2811 = vst [vmem:[#allocation1 + $0x10] ss:$2 sm:$0xff] %v2757_v12 }
 0x3b0   : > { %2813 = vst [vmem:[#allocation1 + $0x11] ss:$2 sm:$0xff] %v2758_v37 }
 0x3b1   : > { %2582 = vst.msk [vmem:[#allocation4 + $0x48] sm:$0xff] %vm1851_vm3, %v2562_v4 }
 0x3b5   : > { %v2890_v20 = vld.sshfl [vmem:[#allocation1] sm:$0xff pattern:$0x75316420] }
 0x3b6   : > { %2902 = vst [vmem:[#allocation1] ss:$2 sm:$0xff] %v2776_v2  ;;  %2892 = vrot.lane.b32.xlu1 %v2890_v20, %s6292_s16  ;;  %s6296_s16 = smov 64  }
 0x3b7   : > { %2904 = vst [vmem:[#allocation1 + $0x1] ss:$2 sm:$0xff] %v2777_v44  ;;  %v2815_v31 = vld.sshfl [vmem:[#allocation1 + $0x10] sm:$0xff pattern:$0x75316420] }
 0x3b8   : > { %2830 = vst [vmem:[#allocation1 + $0x10] ss:$2 sm:$0xff] %v2761_v27  ;;  %v2588_v42 = vld [vmem:[#allocation4 + $0x48] sm:$0x1f] }
 0x3b9   : > { %2832 = vst [vmem:[#allocation1 + $0x11] ss:$2 sm:$0xff] %v2762_v8  ;;  %v2611_v49 = vsel %vm2589_vm12, %v2588_v42, -inf }
 0x3ba   : > { %v2612_v58 = vrot.slane %v2611_v49, 4 }
 0x3bc   : > { %v2613_v32 = vmax.f32 %v2611_v49, %v2612_v58 }
 0x3be   : > { %v2909_v55 = vld.sshfl [vmem:[#allocation1] sm:$0xff pattern:$0x75316420]  ;;  %v2614_v14 = vrot.slane %v2613_v32, 2 }
 0x3bf   : > { %2921 = vst [vmem:[#allocation1] ss:$2 sm:$0xff] %v2780_v30  ;;  %2911 = vrot.lane.b32.xlu2 %v2909_v55, %s6294_s13  ;;  %s6298_s13 = smov 56  }
 0x3c0   : > { %2923 = vst [vmem:[#allocation1 + $0x1] ss:$2 sm:$0xff] %v2781_v10  ;;  %v2834_v26 = vld.sshfl [vmem:[#allocation1 + $0x10] sm:$0xff pattern:$0x75316420]  ;;  %v2615_v1 = vmax.f32 %v2613_v32, %v2614_v14 }
 0x3c1   : > { %2849 = vst [vmem:[#allocation1 + $0x10] ss:$2 sm:$0xff] %v2765_v63 }
 0x3c2   : > { %v2616_v53 = vrot.slane %v2615_v1, 1  ;;  %v2296_v0 = vpop.f32.mrf.mxu3 }
 0x3c3   : > { %v2297_v33 = vadd.f32 %v4069_v34, %v2296_v0 }
 0x3c4   : > { %v2617_v61 = vmax.f32 %v2615_v1, %v2616_v53 }
 0x3c5   : > { %2396 = vst.msk [vmem:[#allocation3 + $0x18a] sm:$0xff] %vm1851_vm3, %v2297_v33 }
 0x3c6   : > { %2622 = vst.msk [vmem:[#allocation5 + $0xc] sm:$0x1] %vm2618_vm13, %v2617_v61 }
 0x3c7   : > { %v2928_v43 = vld.sshfl [vmem:[#allocation1] sm:$0xff pattern:$0x75316420]  ;;  %2818 = vrot.lane.b32.xlu2 %v2815_v31, %s6324_s24 }
 0x3c8   : > { %2940 = vst [vmem:[#allocation1] ss:$2 sm:$0xff] %v2784_v28  ;;  %2930 = vrot.lane.b32.xlu0 %v2928_v43, %s6298_s13  ;;  %v2278_v13 = vpop.f32.mrf.mxu2 }
 0x3c9   : > { %2942 = vst [vmem:[#allocation1 + $0x1] ss:$2 sm:$0xff] %v2785_v54  ;;  %v2279_v29 = vadd.f32 %v4069_v34, %v2278_v13  ;;  %v2769_v34 = vld [vmem:[#allocation6 + $0x19] sm:$0xf] }
 0x3ca   : > { %v2773_v13 = vld [vmem:[#allocation6 + $0x1a] sm:$0xf] }
 0x3cb   : > { %2390 = vst.msk [vmem:[#allocation3 + $0x142] sm:$0xff] %vm1851_vm3, %v2279_v29 }
 0x3cc   : > { %v2552_v5 = vld [vmem:[#allocation3 + $0x188] sm:$0xff]  ;;  %v2553_v24 = vld [vmem:[#allocation3 + $0x190] sm:$0xf] }
 0x3cd   : > { %v2569_v45 = vsel %vm1851_vm3, %v2552_v5, -inf  ;;  %v2578_v39 = vsel %vm2307_vm11, %v2553_v24, -inf }
 0x3ce   : > { %v2570_v59 = vmax.f32 %v2566_v51, %v2569_v45  ;;  %v2579_v16 = vmax.f32 %v2575_v36, %v2578_v39  ;;  %v2783_v45 = vld [vmem:[#allocation6 + $0x29] sm:$0xf]  ;;  %v2975_v39 = vld [vmem:[%s6333_s3] sm:$0xff] }
 0x3d0   : > { %v2947_v41 = vld.sshfl [vmem:[#allocation1] sm:$0xff pattern:$0x75316420]  ;;  %2837 = vrot.lane.b32.xlu0 %v2834_v26, %s6326_s30 }
 0x3d1   : > { %3072 = vst [vmem:[#allocation1] ss:$2 sm:$0xff] %v3032_v60  ;;  %2949 = vrot.lane.b32.xlu1 %v2947_v41, %s6296_s16  ;;  %v2982_v41 = vld [vmem:[%s6333_s3 + $0x38] sm:$0xff]  ;;  %s377_s16 = sand.u32 1, %s4126_s18  }
 0x3d2   : > { %v2543_v18 = vld [vmem:[#allocation3 + $0x140] sm:$0xff]  ;;  %v2544_v3 = vld [vmem:[#allocation3 + $0x148] sm:$0xf]  ;;  %3003 = vmatpush.msrb.mxu1 %v2982_v41  ;;  %v3040_v41 = vld [vmem:[#allocation6 + $0x2] sm:$0xf] }
 0x3d3   : > { %v2564_v21 = vsel %vm1851_vm3, %v2543_v18, -inf  ;;  %v2573_v25 = vsel %vm2307_vm11, %v2544_v3, -inf  ;;  %v2787_v18 = vld [vmem:[#allocation6 + $0x2a] sm:$0xf]  ;;  %v2817_v3 = vpop.permute.xlu0 %2816 }
 0x3d4   : > { %v2568_v52 = vmax.f32 %v2564_v21, %v2567_v62  ;;  %v2577_v23 = vmax.f32 %v2573_v25, %v2576_v50  ;;  %3004 = vmatpush.msrb.mxu1 %v2981_v11  ;;  %v2836_v21 = vpop.permute.xlu1 %2835 }
 0x3d6   : > { %v2571_v15 = vmax.f32 %v2570_v59, %v2568_v52  ;;  %v2580_v47 = vmax.f32 %v2579_v16, %v2577_v23  ;;  %3005 = vmatpush.msrb.mxu1 %v2980_v9  ;;  %v2955_v52 = vsel %vm1851_vm3, %v5396_v7, %v2817_v3 }
 0x3d8   : > { %2583 = vst.msk [vmem:[#allocation4 + $0x50] sm:$0xff] %vm1851_vm3, %v2571_v15  ;;  %3006 = vmatpush.msrb.mxu1 %v2979_v22  ;;  %v2957_v15 = vsel %vm1917_vm5, %v2955_v52, %v2836_v21 }
 0x3d9   : > { %2584 = vst.msk [vmem:[#allocation4 + $0x58] sm:$0xf] %vm2307_vm11, %v2580_v47 }
 0x3da   : > { %3007 = vmatpush.msrb.mxu1 %v2978_v46 }
 0x3dc   : > { %3008 = vmatpush.msrb.mxu1 %v2977_v57 }
 0x3de   : > { %3009 = vmatpush.msrb.mxu1 %v2976_v38 }
 0x3df   : > { %v2626_v35 = vld [vmem:[#allocation4 + $0x4c] sm:$0x1f] }
 0x3e0   : > { %v2662_v40 = vld [vmem:[#allocation4 + $0x50] sm:$0x1f]  ;;  %v2648_v12 = vsel %vm2589_vm12, %v2626_v35, -inf  ;;  %3010 = vmatpush.msrb.mxu1 %v2975_v39 }
 0x3e1   : > { %v2684_v4 = vsel %vm2589_vm12, %v2662_v40, -inf  ;;  %v2698_v37 = vld [vmem:[#allocation4 + $0x54] sm:$0x1f]  ;;  %v2649_v2 = vrot.slane %v2648_v12, 4 }
 0x3e2   : > { %v2685_v20 = vrot.slane %v2684_v4, 4  ;;  %v2720_v44 = vsel %vm2589_vm12, %v2698_v37, -inf  ;;  %vm2972_vm12 = vcmask 523264  }
 0x3e3   : > { %v2721_v27 = vrot.slane %v2720_v44, 4  ;;  %v2650_v31 = vmax.f32 %v2648_v12, %v2649_v2 }
 0x3e4   : > { %v2686_v8 = vmax.f32 %v2684_v4, %v2685_v20 }
 0x3e5   : > { %v2722_v42 = vmax.f32 %v2720_v44, %v2721_v27  ;;  %v2651_v49 = vrot.slane %v2650_v31, 2 }
 0x3e6   : > { %v2687_v58 = vrot.slane %v2686_v8, 2 }
 0x3e7   : > { %v2723_v30 = vrot.slane %v2722_v42, 2  ;;  %v2652_v55 = vmax.f32 %v2650_v31, %v2651_v49 }
 0x3e8   : > { %v2688_v10 = vmax.f32 %v2686_v8, %v2687_v58 }
 0x3e9   : > { %v2724_v32 = vmax.f32 %v2722_v42, %v2723_v30  ;;  %v2653_v14 = vrot.slane %v2652_v55, 1 }
 0x3ea   : > { %v2689_v63 = vrot.slane %v2688_v10, 1 }
 0x3eb   : > { %v2725_v26 = vrot.slane %v2724_v32, 1  ;;  %v2654_v1 = vmax.f32 %v2652_v55, %v2653_v14 }
 0x3ec   : > { %v2690_v53 = vmax.f32 %v2688_v10, %v2689_v63 }
 0x3ed   : > { %v2726_v0 = vmax.f32 %v2724_v32, %v2725_v26  ;;  %2658 = vst.msk [vmem:[#allocation5 + $0xd] sm:$0x1] %vm2618_vm13, %v2654_v1 }
 0x3ee   : > { %2694 = vst.msk [vmem:[#allocation5 + $0xe] sm:$0x1] %vm2618_vm13, %v2690_v53 }
 0x3ef   : > { %2730 = vst.msk [vmem:[#allocation5 + $0xf] sm:$0x1] %vm2618_vm13, %v2726_v0  ;;  %vm2988_vm13 = vcmask 588800  }
 0x3f6   : > { %v5890_v28 = vld [vmem:[#allocation5 + $0xc] sm:$0xf] }
 0x3f7   : > { %v2745_v43 = vmax.f32 %v5890_v28, 0.0 }
 0x3f9   : > { %2750 = vst.msk [vmem:[#allocation6 + $0x21] sm:$0xf] %vm2307_vm11, %v2745_v43 }
 0x3fe   : > { %v2855_v16 = vpop.permute.xlu2 %2854 }
 0x3ff   : > { %v2959_v47 = vsel %vm1983_vm7, %v2957_v15, %v2855_v16 }
 0x400   : > { %v2766_v61 = vld [vmem:[#allocation6 + $0x20] sm:$0xf] }
 0x401   : > { %2851 = vst [vmem:[#allocation1 + $0x11] ss:$2 sm:$0xff] %v2766_v61  ;;  %v2770_v54 = vld [vmem:[#allocation6 + $0x21] sm:$0xf] }
 0x402   : > { %v2774_v60 = vld [vmem:[#allocation6 + $0x22] sm:$0xf] }
 0x403   : > { %v2778_v5 = vld [vmem:[#allocation6 + $0x20] sm:$0xf] }
 0x404   : > { %v2782_v51 = vld [vmem:[#allocation6 + $0x21] sm:$0xf] }
 0x405   : > { %v2786_v62 = vld [vmem:[#allocation6 + $0x22] sm:$0xf] }
 0x408   : > { %v2853_v33 = vld.sshfl [vmem:[#allocation1 + $0x10] sm:$0xff pattern:$0x75316420] }
 0x409   : > { %2868 = vst [vmem:[#allocation1 + $0x10] ss:$2 sm:$0xff] %v2769_v34  ;;  %2856 = vrot.lane.b32.xlu1 %v2853_v33, %s6328_s25 }
 0x40a   : > { %2870 = vst [vmem:[#allocation1 + $0x11] ss:$2 sm:$0xff] %v2770_v54 }
 0x411   : > { %v2872_v29 = vld.sshfl [vmem:[#allocation1 + $0x10] sm:$0xff pattern:$0x75316420] }
 0x412   : > { %2887 = vst [vmem:[#allocation1 + $0x10] ss:$2 sm:$0xff] %v2773_v13  ;;  %2875 = vrot.lane.b32.xlu2 %v2872_v29, %s6332_s0  ;;  %v3036_v29 = vld [vmem:[#allocation6 + $0x1] sm:$0xf] }
 0x413   : > { %2889 = vst [vmem:[#allocation1 + $0x11] ss:$2 sm:$0xff] %v2774_v60 }
 0x419   : > { %v2912_v4 = vpop.permute.xlu2 %2911 }
 0x41a   : > { %v2891_v24 = vld.sshfl [vmem:[#allocation1 + $0x10] sm:$0xff pattern:$0x75316420] }
 0x41b   : > { %2906 = vst [vmem:[#allocation1 + $0x10] ss:$2 sm:$0xff] %v2778_v5  ;;  %2894 = vrot.lane.b32.xlu0 %v2891_v24, %s6334_s1 }
 0x41c   : > { %2908 = vst [vmem:[#allocation1 + $0x11] ss:$2 sm:$0xff] %v2779_v6 }
 0x41f   : > { %v2874_v25 = vpop.permute.xlu0 %2873 }
 0x420   : > { %v2961_v35 = vsel %vm2049_vm9, %v2959_v47, %v2874_v25 }
 0x421   : > { %v2819_v44 = vpop.permute.xlu2 %2818 }
 0x422   : > { %v2956_v8 = vsel %vm1851_vm3, %v5856_v19, %v2819_v44  ;;  %v4063_v19 = vld [vmem:[%s6338_s4] ss:$0 sm:$0xff] }
 0x423   : > { %v2910_v36 = vld.sshfl [vmem:[#allocation1 + $0x10] sm:$0xff pattern:$0x75316420] }
 0x424   : > { %2925 = vst [vmem:[#allocation1 + $0x10] ss:$2 sm:$0xff] %v2782_v51  ;;  %2913 = vrot.lane.b32.xlu1 %v2910_v36, %s6335_s2 }
 0x425   : > { %2927 = vst [vmem:[#allocation1 + $0x11] ss:$2 sm:$0xff] %v2783_v45 }
 0x428   : > { %v2893_v23 = vpop.permute.xlu1 %2892 }
 0x429   : > { %v2964_v40 = vsel %vm2963_vm15, %v2961_v35, %v2893_v23 }
 0x42a   : > { %v2967_v37 = vsel %vm2966_vm1, %v2964_v40, %v2912_v4 }
 0x42c   : > { %v2929_v50 = vld.sshfl [vmem:[#allocation1 + $0x10] sm:$0xff pattern:$0x75316420] }
 0x42d   : > { %2944 = vst [vmem:[#allocation1 + $0x10] ss:$2 sm:$0xff] %v2786_v62  ;;  %2932 = vrot.lane.b32.xlu2 %v2929_v50, %s6336_s28 }
 0x42e   : > { %2946 = vst [vmem:[#allocation1 + $0x11] ss:$2 sm:$0xff] %v2787_v18 }
 0x435   : > { %v2948_v59 = vld.sshfl [vmem:[#allocation1 + $0x10] sm:$0xff pattern:$0x75316420] }
 0x436   : > { %2951 = vrot.lane.b32.xlu0 %v2948_v59, %s6337_s26 }
 0x43a   : > { %v2931_v12 = vpop.permute.xlu0 %2930 }
 0x43b   : > { %v2970_v7 = vsel %vm2969_vm2, %v2967_v37, %v2931_v12 }
 0x442   : > { %v2838_v27 = vpop.permute.xlu0 %2837 }
 0x443   : > { %v2950_v2 = vpop.permute.xlu1 %2949  ;;  %v2958_v42 = vsel %vm1917_vm5, %v2956_v8, %v2838_v27 }
 0x444   : > { %v2973_v20 = vsel %vm2972_vm12, %v2970_v7, %v2950_v2 }
 0x445   : > { %3979 = vmatmul.msk.f32.vlgmr.msrb.gmra.mxu1 %vm2988_vm13, %v2973_v20  ;;  %v3311_v20 = vld [vmem:[#allocation6] sm:$0xf] }
 0x46c   : > { %v2876_v49 = vpop.permute.xlu2 %2875 }
 0x47b   : > { %v2857_v31 = vpop.permute.xlu1 %2856 }
 0x47c   : > { %v2960_v58 = vsel %vm1983_vm7, %v2958_v42, %v2857_v31 }
 0x47d   : > { %v2962_v10 = vsel %vm2049_vm9, %v2960_v58, %v2876_v49 }
 0x487   : > { %v2933_v63 = vpop.permute.xlu2 %2932 }
 0x48d   : > { %v2895_v30 = vpop.permute.xlu0 %2894 }
 0x48e   : > { %v2965_v32 = vsel %vm2963_vm15, %v2962_v10, %v2895_v30 }
 0x496   : > { %v2914_v55 = vpop.permute.xlu1 %2913 }
 0x497   : > { %v2968_v14 = vsel %vm2966_vm1, %v2965_v32, %v2914_v55  ;;  %v3259_v32 = vld [vmem:[%s6269_s5 + $0x40] sm:$0xff] }
 0x498   : > { %v2971_v1 = vsel %vm2969_vm2, %v2968_v14, %v2933_v63  ;;  %v3258_v14 = vld [vmem:[%s6269_s5 + $0x38] sm:$0xff]  ;;  %3277 = vmatpush.msrb.mxu2 %v3259_v32  ;;  %v3257_v63 = vld [vmem:[%s6269_s5 + $0x30] sm:$0xff]  ;;  %v730_v32 = vld [vmem:[#allocation2 + $0x1a0] sm:$0xff] }
 0x49a   : > { %3278 = vmatpush.msrb.mxu2 %v3258_v14  ;;  %v665_v14 = vld [vmem:[#allocation2 + $0x189] sm:$0xff] }
 0x49c   : > { %3279 = vmatpush.msrb.mxu2 %v3257_v63  ;;  %v601_v63 = vld [vmem:[#allocation2 + $0x172] sm:$0xff] }
 0x4a8   : > { %v2952_v26 = vpop.permute.xlu0 %2951 }
 0x4a9   : > { %v2974_v53 = vsel %vm2972_vm12, %v2971_v1, %v2952_v26  ;;  %v3059_v26 = vld [vmem:[#allocation6 + $0x28] sm:$0xf] }
 0x4aa   : > { %3980 = vmatmul.msk.f32.gmra.mxu1 %vm2988_vm13, %v2974_v53 }
 0x4c2   : > { %v3012_v0 = vpop.f32.mrf.mxu1 }
 0x4c3   : > { %v3013_v43 = vadd.f32 %v4063_v19, %v3012_v0 }
 0x4c5   : > { %v3020_v61 = vrot.slane %v3013_v43, 4  ;;  %v3024_v34 = vmax.f32 %v3013_v43, 0.0 }
 0x4c7   : > { %v3025_v33 = vmax.f32 %v3020_v61, 0.0  ;;  %3028 = vst.msk [vmem:[#allocation6 + $0x9] sm:$0xf] %vm2307_vm11, %v3024_v34  ;;  %v3067_v61 = vld [vmem:[#allocation6 + $0x2a] sm:$0xf] }
 0x4c9   : > { %3029 = vst.msk [vmem:[#allocation6 + $0x11] sm:$0xf] %vm2307_vm11, %v3025_v33 }
 0x4ce   : > { %v3033_v54 = vld [vmem:[#allocation6 + $0x8] sm:$0xf] }
 0x4cf   : > { %3074 = vst [vmem:[#allocation1 + $0x1] ss:$2 sm:$0xff] %v3033_v54  ;;  %v3037_v17 = vld [vmem:[#allocation6 + $0x9] sm:$0xf] }
 0x4d0   : > { %v3034_v13 = vld [vmem:[#allocation6 + $0x10] sm:$0xf]  ;;  %v3041_v9 = vld [vmem:[#allocation6 + $0xa] sm:$0xf] }
 0x4d1   : > { %3076 = vst [vmem:[#allocation1 + $0x10] ss:$2 sm:$0xff] %v3034_v13  ;;  %v3044_v6 = vld [vmem:[#allocation6 + $0x8] sm:$0xf]  ;;  %v3045_v24 = vld [vmem:[#allocation6 + $0x10] sm:$0xf] }
 0x4d2   : > { %v3048_v22 = vld [vmem:[#allocation6 + $0x9] sm:$0xf]  ;;  %v3049_v57 = vld [vmem:[#allocation6 + $0x11] sm:$0xf]  ;;  %v3256_v13 = vld [vmem:[%s6269_s5 + $0x28] sm:$0xff] }
 0x4d3   : > { %v3052_v38 = vld [vmem:[#allocation6 + $0xa] sm:$0xf]  ;;  %v3053_v39 = vld [vmem:[#allocation6 + $0x12] sm:$0xf]  ;;  %3280 = vmatpush.msrb.mxu2 %v3256_v13 }
 0x4d4   : > { %v3056_v51 = vld [vmem:[#allocation6 + $0x10] sm:$0xf] }
 0x4d5   : > { %v3038_v16 = vld [vmem:[#allocation6 + $0x11] sm:$0xf] }
 0x4d6   : > { %v5952_v60 = vld.sshfl [vmem:[#allocation1] sm:$0xff pattern:$0x75316420]  ;;  %v3060_v47 = vld [vmem:[#allocation6 + $0x11] sm:$0xf] }
 0x4d7   : > { %3087 = vst [vmem:[#allocation1] ss:$2 sm:$0xff] %v3036_v29  ;;  %v3042_v40 = vld [vmem:[#allocation6 + $0x12] sm:$0xf]  ;;  %v3255_v29 = vld [vmem:[%s6269_s5 + $0x20] sm:$0xff] }
 0x4d8   : > { %3089 = vst [vmem:[#allocation1 + $0x1] ss:$2 sm:$0xff] %v3037_v17  ;;  %v3064_v4 = vld [vmem:[#allocation6 + $0x12] sm:$0xf]  ;;  %3281 = vmatpush.msrb.mxu2 %v3255_v29  ;;  %v794_v29 = vld [vmem:[#allocation2 + $0x1a2] sm:$0xff] }
 0x4d9   : > { %v3254_v17 = vld [vmem:[%s6269_s5 + $0x18] sm:$0xff] }
 0x4da   : > { %3282 = vmatpush.msrb.mxu2 %v3254_v17 }
 0x4df   : > { %v3094_v11 = vld.sshfl [vmem:[#allocation1] sm:$0xff pattern:$0x75316420] }
 0x4e0   : > { %3106 = vst [vmem:[#allocation1] ss:$2 sm:$0xff] %v3040_v41  ;;  %3096 = vrot.lane.b32.xlu1 %v3094_v11, %s6324_s24  ;;  %v3253_v41 = vld [vmem:[%s6269_s5 + $0x10] sm:$0xff]  ;;  %v3252_v11 = vld [vmem:[%s6269_s5 + $0x8] sm:$0xff] }
 0x4e1   : > { %3108 = vst [vmem:[#allocation1 + $0x1] ss:$2 sm:$0xff] %v3041_v9  ;;  %3283 = vmatpush.msrb.mxu2 %v3253_v41  ;;  %v3251_v9 = vld [vmem:[%s6269_s5] sm:$0xff] }
 0x4e3   : > { %3284 = vmatpush.msrb.mxu2 %v3252_v11 }
 0x4e5   : > { %3285 = vmatpush.msrb.mxu2 %v3251_v9 }
 0x4e8   : > { %v3113_v5 = vld.sshfl [vmem:[#allocation1] sm:$0xff pattern:$0x75316420] }
 0x4e9   : > { %3125 = vst [vmem:[#allocation1] ss:$2 sm:$0xff] %v3044_v6  ;;  %3115 = vrot.lane.b32.xlu2 %v3113_v5, %s6326_s30 }
 0x4ea   : > { %3127 = vst [vmem:[#allocation1 + $0x1] ss:$2 sm:$0xff] %v3045_v24 }
 0x4f1   : > { %v3132_v46 = vld.sshfl [vmem:[#allocation1] sm:$0xff pattern:$0x75316420] }
 0x4f2   : > { %3144 = vst [vmem:[#allocation1] ss:$2 sm:$0xff] %v3048_v22  ;;  %3134 = vrot.lane.b32.xlu0 %v3132_v46, %s6328_s25 }
 0x4f3   : > { %3146 = vst [vmem:[#allocation1 + $0x1] ss:$2 sm:$0xff] %v3049_v57 }
 0x4fa   : > { %v3151_v45 = vld.sshfl [vmem:[#allocation1] sm:$0xff pattern:$0x75316420] }
 0x4fb   : > { %3163 = vst [vmem:[#allocation1] ss:$2 sm:$0xff] %v3052_v38  ;;  %3153 = vrot.lane.b32.xlu1 %v3151_v45, %s6332_s0 }
 0x4fc   : > { %3165 = vst [vmem:[#allocation1 + $0x1] ss:$2 sm:$0xff] %v3053_v39 }
 0x503   : > { %v3170_v36 = vld.sshfl [vmem:[#allocation1] sm:$0xff pattern:$0x75316420] }
 0x504   : > { %3182 = vst [vmem:[#allocation1] ss:$2 sm:$0xff] %v3056_v51  ;;  %3172 = vrot.lane.b32.xlu2 %v3170_v36, %s6334_s1 }
 0x527   : > { %v3015_v18 = vpop.f32.mrf.mxu1 }
 0x528   : > { %v3016_v3 = vadd.f32 %v4063_v19, %v3015_v18  ;;  %v3063_v19 = vld [vmem:[#allocation6 + $0x29] sm:$0xf] }
 0x52a   : > { %v3021_v62 = vrot.slane %v3016_v3, 4  ;;  %v3026_v50 = vmax.f32 %v3016_v3, 0.0 }
 0x52c   : > { %v3027_v21 = vmax.f32 %v3021_v62, 0.0  ;;  %3030 = vst.msk [vmem:[#allocation6 + $0x19] sm:$0xf] %vm2307_vm11, %v3026_v50 }
 0x52e   : > { %3031 = vst.msk [vmem:[#allocation6 + $0x21] sm:$0xf] %vm2307_vm11, %v3027_v21 }
 0x533   : > { %v3035_v25 = vld [vmem:[#allocation6 + $0x18] sm:$0xf] }
 0x534   : > { %v3057_v59 = vld [vmem:[#allocation6 + $0x18] sm:$0xf]  ;;  %3078 = vst [vmem:[#allocation1 + $0x11] ss:$2 sm:$0xff] %v3035_v25 }
 0x535   : > { %3184 = vst [vmem:[#allocation1 + $0x1] ss:$2 sm:$0xff] %v3057_v59  ;;  %v3039_v52 = vld [vmem:[#allocation6 + $0x19] sm:$0xf]  ;;  %v3047_v31 = vld [vmem:[#allocation6 + $0x20] sm:$0xf] }
 0x536   : > { %v3061_v35 = vld [vmem:[#allocation6 + $0x19] sm:$0xf]  ;;  %v3051_v58 = vld [vmem:[#allocation6 + $0x21] sm:$0xf] }
 0x537   : > { %v3043_v37 = vld [vmem:[#allocation6 + $0x1a] sm:$0xf]  ;;  %v3055_v10 = vld [vmem:[#allocation6 + $0x22] sm:$0xf] }
 0x538   : > { %v3065_v2 = vld [vmem:[#allocation6 + $0x1a] sm:$0xf]  ;;  %v3058_v1 = vld [vmem:[#allocation6 + $0x20] sm:$0xf] }
 0x539   : > { %v3046_v44 = vld [vmem:[#allocation6 + $0x18] sm:$0xf]  ;;  %v3062_v0 = vld [vmem:[#allocation6 + $0x21] sm:$0xf] }
 0x53a   : > { %v3050_v42 = vld [vmem:[#allocation6 + $0x19] sm:$0xf]  ;;  %v3066_v34 = vld [vmem:[#allocation6 + $0x22] sm:$0xf] }
 0x53b   : > { %v5961_v23 = vld.sshfl [vmem:[#allocation1 + $0x10] sm:$0xff pattern:$0x75316420]  ;;  %v3054_v30 = vld [vmem:[#allocation6 + $0x1a] sm:$0xf] }
 0x53c   : > { %3091 = vst [vmem:[#allocation1 + $0x10] ss:$2 sm:$0xff] %v3038_v16  ;;  %v3189_v15 = vld.sshfl [vmem:[#allocation1] sm:$0xff pattern:$0x75316420] }
 0x53d   : > { %3093 = vst [vmem:[#allocation1 + $0x11] ss:$2 sm:$0xff] %v3039_v52  ;;  %v632_v52 = vld [vmem:[#allocation2 + $0x180] sm:$0xff] }
 0x53e   : > { %3201 = vst [vmem:[#allocation1] ss:$2 sm:$0xff] %v3060_v47  ;;  %v696_v47 = vld [vmem:[#allocation2 + $0x182] sm:$0xff] }
 0x53f   : > { %3203 = vst [vmem:[#allocation1 + $0x1] ss:$2 sm:$0xff] %v3061_v35 }
 0x543   : > { %v3116_v6 = vpop.permute.xlu2 %3115 }
 0x544   : > { %v3095_v12 = vld.sshfl [vmem:[#allocation1 + $0x10] sm:$0xff pattern:$0x75316420] }
 0x545   : > { %3110 = vst [vmem:[#allocation1 + $0x10] ss:$2 sm:$0xff] %v3042_v40  ;;  %3098 = vrot.lane.b32.xlu0 %v3095_v12, %s6324_s24 }
 0x546   : > { %3112 = vst [vmem:[#allocation1 + $0x11] ss:$2 sm:$0xff] %v3043_v37  ;;  %v3208_v7 = vld.sshfl [vmem:[#allocation1] sm:$0xff pattern:$0x75316420] }
 0x547   : > { %3220 = vst [vmem:[#allocation1] ss:$2 sm:$0xff] %v3064_v4 }
 0x548   : > { %3222 = vst [vmem:[#allocation1 + $0x1] ss:$2 sm:$0xff] %v3065_v2 }
 0x54d   : > { %v3114_v27 = vld.sshfl [vmem:[#allocation1 + $0x10] sm:$0xff pattern:$0x75316420]  ;;  %3191 = vrot.lane.b32.xlu0 %v3189_v15, %s6335_s2 }
 0x54e   : > { %3129 = vst [vmem:[#allocation1 + $0x10] ss:$2 sm:$0xff] %v3046_v44  ;;  %3117 = vrot.lane.b32.xlu1 %v3114_v27, %s6326_s30  ;;  %v568_v15 = vld [vmem:[#allocation2 + $0x169] sm:$0xff] }
 0x54f   : > { %3131 = vst [vmem:[#allocation1 + $0x11] ss:$2 sm:$0xff] %v3047_v31  ;;  %v3227_v8 = vld.sshfl [vmem:[#allocation1] sm:$0xff pattern:$0x75316420] }
 0x550   : > { %3351 = vst [vmem:[#allocation1] ss:$2 sm:$0xff] %v3311_v20 }
 0x552   : > { %v3097_v5 = vpop.permute.xlu1 %3096 }
 0x553   : > { %v3235_v38 = vsel %vm1851_vm3, %v5952_v60, %v3097_v5  ;;  %v600_v60 = vld [vmem:[#allocation2 + $0x16a] sm:$0xff] }
 0x554   : > { %v3237_v51 = vsel %vm1917_vm5, %v3235_v38, %v3116_v6  ;;  %v3319_v6 = vld [vmem:[#allocation6 + $0x2] sm:$0xf] }
 0x556   : > { %v3133_v49 = vld.sshfl [vmem:[#allocation1 + $0x10] sm:$0xff pattern:$0x75316420]  ;;  %3210 = vrot.lane.b32.xlu1 %v3208_v7, %s6336_s28 }
 0x557   : > { %3148 = vst [vmem:[#allocation1 + $0x10] ss:$2 sm:$0xff] %v3050_v42  ;;  %3136 = vrot.lane.b32.xlu2 %v3133_v49, %s6328_s25  ;;  %v729_v49 = vld [vmem:[#allocation2 + $0x198] sm:$0xff] }
 0x558   : > { %3150 = vst [vmem:[#allocation1 + $0x11] ss:$2 sm:$0xff] %v3051_v58  ;;  %v664_v58 = vld [vmem:[#allocation2 + $0x181] sm:$0xff] }
 0x55e   : > { %v3173_v22 = vpop.permute.xlu2 %3172 }
 0x55f   : > { %v3152_v55 = vld.sshfl [vmem:[#allocation1 + $0x10] sm:$0xff pattern:$0x75316420]  ;;  %3229 = vrot.lane.b32.xlu2 %v3227_v8, %s6337_s26 }
 0x560   : > { %3167 = vst [vmem:[#allocation1 + $0x10] ss:$2 sm:$0xff] %v3054_v30  ;;  %3155 = vrot.lane.b32.xlu0 %v3152_v55, %s6332_s0  ;;  %v633_v30 = vld [vmem:[#allocation2 + $0x188] sm:$0xff]  ;;  %v569_v55 = vld [vmem:[#allocation2 + $0x171] sm:$0xff] }
 0x561   : > { %3169 = vst [vmem:[#allocation1 + $0x11] ss:$2 sm:$0xff] %v3055_v10  ;;  %v761_v10 = vld [vmem:[#allocation2 + $0x199] sm:$0xff] }
 0x564   : > { %v3135_v24 = vpop.permute.xlu0 %3134 }
 0x565   : > { %v3239_v36 = vsel %vm1983_vm7, %v3237_v51, %v3135_v24 }
 0x568   : > { %v3171_v53 = vld.sshfl [vmem:[#allocation1 + $0x10] sm:$0xff pattern:$0x75316420] }
 0x569   : > { %3186 = vst [vmem:[#allocation1 + $0x10] ss:$2 sm:$0xff] %v3058_v1  ;;  %3174 = vrot.lane.b32.xlu1 %v3171_v53, %s6334_s1 }
 0x56a   : > { %3188 = vst [vmem:[#allocation1 + $0x11] ss:$2 sm:$0xff] %v3059_v26  ;;  %v4064_v26 = vld [vmem:[%s6270_s6] ss:$0 sm:$0xff] }
 0x56d   : > { %v3154_v46 = vpop.permute.xlu1 %3153 }
 0x56e   : > { %v3241_v18 = vsel %vm2049_vm9, %v3239_v36, %v3154_v46 }
 0x56f   : > { %v3243_v62 = vsel %vm2963_vm15, %v3241_v18, %v3173_v22 }
 0x571   : > { %v3190_v43 = vld.sshfl [vmem:[#allocation1 + $0x10] sm:$0xff pattern:$0x75316420] }
 0x572   : > { %3205 = vst [vmem:[#allocation1 + $0x10] ss:$2 sm:$0xff] %v3062_v0  ;;  %3193 = vrot.lane.b32.xlu2 %v3190_v43, %s6335_s2  ;;  %v4070_v0 = vld [vmem:[#allocation5] sm:$0xf] }
 0x573   : > { %3207 = vst [vmem:[#allocation1 + $0x11] ss:$2 sm:$0xff] %v3063_v19 }
 0x57a   : > { %v3209_v33 = vld.sshfl [vmem:[#allocation1 + $0x10] sm:$0xff pattern:$0x75316420]  ;;  %887 = vrot.lane.b32.xlu2 %v568_v15, %s6330_s29 }
 0x57b   : > { %3224 = vst [vmem:[#allocation1 + $0x10] ss:$2 sm:$0xff] %v3066_v34  ;;  %3212 = vrot.lane.b32.xlu0 %v3209_v33, %s6336_s28  ;;  %v697_v34 = vld [vmem:[#allocation2 + $0x18a] sm:$0xff] }
 0x57c   : > { %3226 = vst [vmem:[#allocation1 + $0x11] ss:$2 sm:$0xff] %v3067_v61  ;;  %v762_v61 = vld [vmem:[#allocation2 + $0x1a1] sm:$0xff] }
 0x582   : > { %1271 = vrot.lane.b32.xlu2 %v664_v58, %s6326_s30 }
 0x583   : > { %v3228_v54 = vld.sshfl [vmem:[#allocation1 + $0x10] sm:$0xff pattern:$0x75316420]  ;;  %1015 = vrot.lane.b32.xlu0 %v600_v60, %s6324_s24 }
 0x584   : > { %3231 = vrot.lane.b32.xlu1 %v3228_v54, %s6337_s26 }
 0x58a   : > { %1655 = vrot.lane.b32.xlu2 %v761_v10, %s6331_s14 }
 0x58b   : > { %1399 = vrot.lane.b32.xlu0 %v696_v47, %s6327_s22 }
 0x58c   : > { %1143 = vrot.lane.b32.xlu1 %v632_v52, %s6325_s15 }
 0x592   : > { %1017 = vrot.lane.b32.xlu2 %v601_v63, %s6324_s24  ;;  %v3338_v63 = vld [vmem:[#allocation6 + $0x28] sm:$0xf] }
 0x594   : > { %1527 = vrot.lane.b32.xlu1 %v729_v49, %s6328_s25 }
 0x59a   : > { %1401 = vrot.lane.b32.xlu2 %v697_v34, %s6327_s22 }
 0x59c   : > { %889 = vrot.lane.b32.xlu1 %v569_v55, %s6330_s29 }
 0x5a2   : > { %1785 = vrot.lane.b32.xlu2 %v794_v29, %s6332_s0 }
 0x5a4   : > { %1273 = vrot.lane.b32.xlu1 %v665_v14, %s6326_s30 }
 0x5ac   : > { %1657 = vrot.lane.b32.xlu1 %v762_v61, %s6331_s14 }
 0x5b1   : > { %v3137_v45 = vpop.permute.xlu2 %3136 }
 0x5b7   : > { %v3099_v57 = vpop.permute.xlu0 %3098 }
 0x5b8   : > { %v3236_v40 = vsel %vm1851_vm3, %v5961_v23, %v3099_v57  ;;  %v793_v23 = vld [vmem:[#allocation2 + $0x19a] sm:$0xff] }
 0x5b9   : > { %v3230_v25 = vpop.permute.xlu2 %3229  ;;  %1783 = vrot.lane.b32.xlu0 %v793_v23, %s6332_s0  ;;  %v3586_v23 = vld [vmem:[#allocation6] sm:$0xf] }
 0x5bf   : > { %v3192_v3 = vpop.permute.xlu0 %3191 }
 0x5c0   : > { %v3118_v39 = vpop.permute.xlu1 %3117  ;;  %v3245_v50 = vsel %vm2966_vm1, %v3243_v62, %v3192_v3 }
 0x5c1   : > { %v3238_v12 = vsel %vm1917_vm5, %v3236_v40, %v3118_v39  ;;  %1145 = vrot.lane.b32.xlu0 %v633_v30, %s6325_s15 }
 0x5c2   : > { %v3240_v37 = vsel %vm1983_vm7, %v3238_v12, %v3137_v45 }
 0x5c8   : > { %v3211_v21 = vpop.permute.xlu1 %3210 }
 0x5c9   : > { %v3247_v59 = vsel %vm2969_vm2, %v3245_v50, %v3211_v21  ;;  %1529 = vrot.lane.b32.xlu0 %v730_v32, %s6328_s25 }
 0x5ca   : > { %v3249_v16 = vsel %vm2972_vm12, %v3247_v59, %v3230_v25 }
 0x5cb   : > { %3981 = vmatmul.msk.f32.vlgmr.msrb.gmra.mxu2 %vm2988_vm13, %v3249_v16 }
 0x5cc   : > { %v3194_v44 = vpop.permute.xlu2 %3193 }
 0x5d2   : > { %v3156_v35 = vpop.permute.xlu0 %3155 }
 0x5d3   : > { %v3242_v7 = vsel %vm2049_vm9, %v3240_v37, %v3156_v35 }
 0x5db   : > { %v3175_v4 = vpop.permute.xlu1 %3174 }
 0x5dc   : > { %v3244_v2 = vsel %vm2963_vm15, %v3242_v7, %v3175_v4 }
 0x5dd   : > { %v3246_v27 = vsel %vm2966_vm1, %v3244_v2, %v3194_v44 }
 0x5ed   : > { %v3213_v20 = vpop.permute.xlu0 %3212 }
 0x5ee   : > { %v3248_v31 = vsel %vm2969_vm2, %v3246_v27, %v3213_v20 }
 0x5f6   : > { %v3232_v8 = vpop.permute.xlu1 %3231 }
 0x5f7   : > { %v3250_v42 = vsel %vm2972_vm12, %v3248_v31, %v3232_v8 }
 0x5f8   : > { %3982 = vmatmul.msk.f32.gmra.mxu2 %vm2988_vm13, %v3250_v42 }
 0x5fe   : > { %v1144_v34 = vpop.permute.xlu1 %1143 }
 0x64e   : > { %v3287_v1 = vpop.f32.mrf.mxu2 }
 0x64f   : > { %v3288_v53 = vadd.f32 %v4064_v26, %v3287_v1 }
 0x651   : > { %v3295_v19 = vrot.slane %v3288_v53, 4  ;;  %v6037_v43 = vadd.f32 %v4070_v0, %v3288_v53  ;;  %v1016_v0 = vpop.permute.xlu0 %1015 }
 0x653   : > { %v6040_v33 = vadd.f32 %v3295_v19, %v5833_v48  ;;  %v3303_v54 = vmax.f32 %v6037_v43, 0.0  ;;  %v3315_v48 = vld [vmem:[#allocation6 + $0x1] sm:$0xf]  ;;  %v536_v19 = vld [vmem:[#allocation2 + $0x168] sm:$0xff] }
 0x655   : > { %v3304_v13 = vmax.f32 %v6040_v33, 0.0  ;;  %3307 = vst.msk [vmem:[#allocation6 + $0x9] sm:$0xf] %vm2307_vm11, %v3303_v54  ;;  %v3342_v54 = vld [vmem:[#allocation6 + $0x29] sm:$0xf] }
 0x657   : > { %3308 = vst.msk [vmem:[#allocation6 + $0x11] sm:$0xf] %vm2307_vm11, %v3304_v13 }
 0x65c   : > { %v3312_v17 = vld [vmem:[#allocation6 + $0x8] sm:$0xf] }
 0x65d   : > { %3353 = vst [vmem:[#allocation1 + $0x1] ss:$2 sm:$0xff] %v3312_v17  ;;  %v3316_v9 = vld [vmem:[#allocation6 + $0x9] sm:$0xf] }
 0x65e   : > { %v3313_v41 = vld [vmem:[#allocation6 + $0x10] sm:$0xf]  ;;  %v3320_v5 = vld [vmem:[#allocation6 + $0xa] sm:$0xf] }
 0x65f   : > { %3355 = vst [vmem:[#allocation1 + $0x10] ss:$2 sm:$0xff] %v3313_v41  ;;  %v3323_v22 = vld [vmem:[#allocation6 + $0x8] sm:$0xf]  ;;  %v3324_v57 = vld [vmem:[#allocation6 + $0x10] sm:$0xf] }
 0x660   : > { %v3327_v50 = vld [vmem:[#allocation6 + $0x9] sm:$0xf]  ;;  %v3328_v21 = vld [vmem:[#allocation6 + $0x11] sm:$0xf] }
 0x661   : > { %v3331_v25 = vld [vmem:[#allocation6 + $0xa] sm:$0xf]  ;;  %v3332_v59 = vld [vmem:[#allocation6 + $0x12] sm:$0xf] }
 0x662   : > { %v3317_v16 = vld [vmem:[#allocation6 + $0x11] sm:$0xf] }
 0x663   : > { %v3335_v52 = vld [vmem:[#allocation6 + $0x10] sm:$0xf] }
 0x664   : > { %v6049_v11 = vld.sshfl [vmem:[#allocation1] sm:$0xff pattern:$0x75316420]  ;;  %v3321_v40 = vld [vmem:[#allocation6 + $0x12] sm:$0xf] }
 0x665   : > { %3366 = vst [vmem:[#allocation1] ss:$2 sm:$0xff] %v3315_v48  ;;  %v3339_v4 = vld [vmem:[#allocation6 + $0x11] sm:$0xf] }
 0x666   : > { %3368 = vst [vmem:[#allocation1 + $0x1] ss:$2 sm:$0xff] %v3316_v9  ;;  %v3343_v27 = vld [vmem:[#allocation6 + $0x12] sm:$0xf]  ;;  %v1400_v9 = vpop.permute.xlu0 %1399 }
 0x66d   : > { %v3373_v24 = vld.sshfl [vmem:[#allocation1] sm:$0xff pattern:$0x75316420] }
 0x66e   : > { %3387 = vst [vmem:[#allocation1 + $0x1] ss:$2 sm:$0xff] %v3320_v5  ;;  %3375 = vrot.lane.b32.xlu0 %v3373_v24, %s6324_s24  ;;  %v1528_v5 = vpop.permute.xlu1 %1527  ;;  %v3346_v24 = vld [vmem:[#allocation6 + $0x2a] sm:$0xf] }
 0x66f   : > { %3385 = vst [vmem:[#allocation1] ss:$2 sm:$0xff] %v3319_v6 }
 0x676   : > { %v3392_v46 = vld.sshfl [vmem:[#allocation1] sm:$0xff pattern:$0x75316420] }
 0x677   : > { %3394 = vrot.lane.b32.xlu1 %v3392_v46, %s6326_s30  ;;  %3404 = vst [vmem:[#allocation1] ss:$2 sm:$0xff] %v3323_v22 }
 0x678   : > { %3406 = vst [vmem:[#allocation1 + $0x1] ss:$2 sm:$0xff] %v3324_v57 }
 0x67b   : > { %v3290_v38 = vpop.f32.mrf.mxu2 }
 0x67c   : > { %v3291_v45 = vadd.f32 %v4064_v26, %v3290_v38  ;;  %v888_v26 = vpop.permute.xlu2 %887 }
 0x67d   : > { %v1849_v61 = vsel %vm385_vm0, %v536_v19, %v888_v26 }
 0x67e   : > { %v3296_v39 = vrot.slane %v3291_v45, 4  ;;  %v6054_v51 = vadd.f32 %v3291_v45, %v5841_v56  ;;  %v1882_v17 = vsel %vm1851_vm3, %v1849_v61, %v1016_v0 }
 0x67f   : > { %v3411_v62 = vld.sshfl [vmem:[#allocation1] sm:$0xff pattern:$0x75316420]  ;;  %v1915_v48 = vsel %vm1884_vm4, %v1882_v17, %v1144_v34 }
 0x680   : > { %v6057_v36 = vadd.f32 %v3296_v39, %v5890_v28  ;;  %v3305_v18 = vmax.f32 %v6054_v51, 0.0  ;;  %3413 = vrot.lane.b32.xlu2 %v3411_v62, %s6328_s25  ;;  %3423 = vst [vmem:[#allocation1] ss:$2 sm:$0xff] %v3327_v50  ;;  %v1784_v39 = vpop.permute.xlu0 %1783  ;;  %v537_v62 = vld [vmem:[#allocation2 + $0x170] sm:$0xff]  ;;  %v890_v50 = vpop.permute.xlu1 %889 }
 0x681   : > { %3425 = vst [vmem:[#allocation1 + $0x1] ss:$2 sm:$0xff] %v3328_v21 }
 0x682   : > { %v3306_v3 = vmax.f32 %v6057_v36, 0.0  ;;  %3309 = vst.msk [vmem:[#allocation6 + $0x19] sm:$0xf] %vm2307_vm11, %v3305_v18 }
 0x684   : > { %3310 = vst.msk [vmem:[#allocation6 + $0x21] sm:$0xf] %vm2307_vm11, %v3306_v3  ;;  %v1272_v29 = vpop.permute.xlu2 %1271 }
 0x685   : > { %v1948_v6 = vsel %vm1917_vm5, %v1915_v48, %v1272_v29 }
 0x686   : > { %v1981_v57 = vsel %vm1950_vm6, %v1948_v6, %v1400_v9 }
 0x687   : > { %v2014_v45 = vsel %vm1983_vm7, %v1981_v57, %v1528_v5 }
 0x688   : > { %v3430_v28 = vld.sshfl [vmem:[#allocation1] sm:$0xff pattern:$0x75316420] }
 0x689   : > { %v3314_v56 = vld [vmem:[#allocation6 + $0x18] sm:$0xf]  ;;  %3432 = vrot.lane.b32.xlu0 %v3430_v28, %s6332_s0  ;;  %3442 = vst [vmem:[#allocation1] ss:$2 sm:$0xff] %v3331_v25  ;;  %v1850_v25 = vsel %vm385_vm0, %v537_v62, %v890_v50 }
 0x68a   : > { %3357 = vst [vmem:[#allocation1 + $0x11] ss:$2 sm:$0xff] %v3314_v56  ;;  %v3318_v15 = vld [vmem:[#allocation6 + $0x19] sm:$0xf]  ;;  %v4065_v50 = vld [vmem:[%s6272_s8] ss:$0 sm:$0xff] }
 0x68b   : > { %3444 = vst [vmem:[#allocation1 + $0x1] ss:$2 sm:$0xff] %v3332_v59  ;;  %v3336_v35 = vld [vmem:[#allocation6 + $0x18] sm:$0xf]  ;;  %v3326_v31 = vld [vmem:[#allocation6 + $0x20] sm:$0xf] }
 0x68c   : > { %v3322_v37 = vld [vmem:[#allocation6 + $0x1a] sm:$0xf]  ;;  %v3330_v30 = vld [vmem:[#allocation6 + $0x21] sm:$0xf]  ;;  %v1656_v38 = vpop.permute.xlu2 %1655 }
 0x68d   : > { %v3340_v2 = vld [vmem:[#allocation6 + $0x19] sm:$0xf]  ;;  %v3334_v14 = vld [vmem:[#allocation6 + $0x22] sm:$0xf]  ;;  %v2047_v18 = vsel %vm2016_vm8, %v2014_v45, %v1656_v38 }
 0x68e   : > { %v3325_v20 = vld [vmem:[#allocation6 + $0x18] sm:$0xf]  ;;  %v3337_v1 = vld [vmem:[#allocation6 + $0x20] sm:$0xf]  ;;  %v2080_v3 = vsel %vm2049_vm9, %v2047_v18, %v1784_v39 }
 0x68f   : > { %v3344_v42 = vld [vmem:[#allocation6 + $0x1a] sm:$0xf]  ;;  %v3341_v13 = vld [vmem:[#allocation6 + $0x21] sm:$0xf]  ;;  %3977 = vmatmul.msk.f32.gmra.mxu3 %vm2091_vm10, %v2080_v3 }
 0x690   : > { %v3329_v49 = vld [vmem:[#allocation6 + $0x19] sm:$0xf]  ;;  %v3345_v22 = vld [vmem:[#allocation6 + $0x22] sm:$0xf] }
 0x691   : > { %v6065_v60 = vld.sshfl [vmem:[#allocation1 + $0x10] sm:$0xff pattern:$0x75316420]  ;;  %v3333_v10 = vld [vmem:[#allocation6 + $0x1a] sm:$0xf] }
 0x692   : > { %3370 = vst [vmem:[#allocation1 + $0x10] ss:$2 sm:$0xff] %v3317_v16  ;;  %v3449_v47 = vld.sshfl [vmem:[#allocation1] sm:$0xff pattern:$0x75316420]  ;;  %v1146_v16 = vpop.permute.xlu0 %1145 }
 0x693   : > { %3372 = vst [vmem:[#allocation1 + $0x11] ss:$2 sm:$0xff] %v3318_v15  ;;  %3451 = vrot.lane.b32.xlu1 %v3449_v47, %s6334_s1  ;;  %v3538_v59 = vld [vmem:[%s6271_s7 + $0x40] sm:$0xff]  ;;  %v1274_v15 = vpop.permute.xlu1 %1273 }
 0x694   : > { %3461 = vst [vmem:[#allocation1] ss:$2 sm:$0xff] %v3335_v52  ;;  %v1018_v56 = vpop.permute.xlu2 %1017  ;;  %3556 = vmatpush.msrb.mxu3 %v3538_v59 }
 0x695   : > { %3463 = vst [vmem:[#allocation1 + $0x1] ss:$2 sm:$0xff] %v3336_v35  ;;  %v1883_v28 = vsel %vm1851_vm3, %v1850_v25, %v1018_v56 }
 0x696   : > { %v1916_v52 = vsel %vm1884_vm4, %v1883_v28, %v1146_v16 }
 0x697   : > { %v1949_v47 = vsel %vm1917_vm5, %v1916_v52, %v1274_v15  ;;  %v3590_v15 = vld [vmem:[#allocation6 + $0x1] sm:$0xf] }
 0x69a   : > { %v3374_v12 = vld.sshfl [vmem:[#allocation1 + $0x10] sm:$0xff pattern:$0x75316420] }
 0x69b   : > { %3377 = vrot.lane.b32.xlu2 %v3374_v12, %s6324_s24  ;;  %3389 = vst [vmem:[#allocation1 + $0x10] ss:$2 sm:$0xff] %v3321_v40  ;;  %v3537_v12 = vld [vmem:[%s6271_s7 + $0x38] sm:$0xff] }
 0x69c   : > { %3391 = vst [vmem:[#allocation1 + $0x11] ss:$2 sm:$0xff] %v3322_v37  ;;  %v3468_v7 = vld.sshfl [vmem:[#allocation1] sm:$0xff pattern:$0x75316420]  ;;  %v1402_v35 = vpop.permute.xlu2 %1401  ;;  %3557 = vmatpush.msrb.mxu3 %v3537_v12 }
 0x69d   : > { %3480 = vst [vmem:[#allocation1] ss:$2 sm:$0xff] %v3339_v4  ;;  %v1982_v40 = vsel %vm1950_vm6, %v1949_v47, %v1402_v35  ;;  %v1530_v4 = vpop.permute.xlu0 %1529 }
 0x69e   : > { %3482 = vst [vmem:[#allocation1 + $0x1] ss:$2 sm:$0xff] %v3340_v2  ;;  %v2015_v37 = vsel %vm1983_vm7, %v1982_v40, %v1530_v4  ;;  %v3594_v40 = vld [vmem:[#allocation6 + $0x2] sm:$0xf] }
 0x6a3   : > { %v3393_v44 = vld.sshfl [vmem:[#allocation1 + $0x10] sm:$0xff pattern:$0x75316420]  ;;  %3470 = vrot.lane.b32.xlu2 %v3468_v7, %s6335_s2  ;;  %v1658_v7 = vpop.permute.xlu1 %1657 }
 0x6a4   : > { %3396 = vrot.lane.b32.xlu0 %v3393_v44, %s6326_s30  ;;  %3408 = vst [vmem:[#allocation1 + $0x10] ss:$2 sm:$0xff] %v3325_v20  ;;  %v2048_v2 = vsel %vm2016_vm8, %v2015_v37, %v1658_v7  ;;  %v1786_v20 = vpop.permute.xlu2 %1785  ;;  %v3536_v44 = vld [vmem:[%s6271_s7 + $0x30] sm:$0xff] }
 0x6a5   : > { %3410 = vst [vmem:[#allocation1 + $0x11] ss:$2 sm:$0xff] %v3326_v31  ;;  %v3487_v8 = vld.sshfl [vmem:[#allocation1] sm:$0xff pattern:$0x75316420]  ;;  %v3535_v31 = vld [vmem:[%s6271_s7 + $0x28] sm:$0xff]  ;;  %3558 = vmatpush.msrb.mxu3 %v3536_v44 }
 0x6a6   : > { %3499 = vst [vmem:[#allocation1] ss:$2 sm:$0xff] %v3343_v27  ;;  %v2081_v27 = vsel %vm2049_vm9, %v2048_v2, %v1786_v20 }
 0x6a7   : > { %3501 = vst [vmem:[#allocation1 + $0x1] ss:$2 sm:$0xff] %v3344_v42  ;;  %3978 = vmatmul.msk.f32.gmra.mxu3 %vm2091_vm10, %v2081_v27  ;;  %v3533_v42 = vld [vmem:[%s6271_s7 + $0x18] sm:$0xff] }
 0x6a8   : > { %3559 = vmatpush.msrb.mxu3 %v3535_v31 }
 0x6ac   : > { %v3412_v58 = vld.sshfl [vmem:[#allocation1 + $0x10] sm:$0xff pattern:$0x75316420]  ;;  %3489 = vrot.lane.b32.xlu0 %v3487_v8, %s6336_s28  ;;  %v3534_v8 = vld [vmem:[%s6271_s7 + $0x20] sm:$0xff] }
 0x6ad   : > { %3415 = vrot.lane.b32.xlu1 %v3412_v58, %s6328_s25  ;;  %3427 = vst [vmem:[#allocation1 + $0x10] ss:$2 sm:$0xff] %v3329_v49  ;;  %3560 = vmatpush.msrb.mxu3 %v3534_v8  ;;  %v3531_v49 = vld [vmem:[%s6271_s7 + $0x8] sm:$0xff] }
 0x6ae   : > { %3429 = vst [vmem:[#allocation1 + $0x11] ss:$2 sm:$0xff] %v3330_v30  ;;  %v3506_v55 = vld.sshfl [vmem:[#allocation1] sm:$0xff pattern:$0x75316420] }
 0x6af   : > { %3626 = vst [vmem:[#allocation1] ss:$2 sm:$0xff] %v3586_v23  ;;  %v3532_v23 = vld [vmem:[%s6271_s7 + $0x10] sm:$0xff]  ;;  %3561 = vmatpush.msrb.mxu3 %v3533_v42  ;;  %v3530_v30 = vld [vmem:[%s6271_s7] sm:$0xff] }
 0x6b1   : > { %3562 = vmatpush.msrb.mxu3 %v3532_v23 }
 0x6b3   : > { %3563 = vmatpush.msrb.mxu3 %v3531_v49 }
 0x6b5   : > { %v3431_v32 = vld.sshfl [vmem:[#allocation1 + $0x10] sm:$0xff pattern:$0x75316420]  ;;  %3508 = vrot.lane.b32.xlu1 %v3506_v55, %s6337_s26  ;;  %3564 = vmatpush.msrb.mxu3 %v3530_v30 }
 0x6b6   : > { %3434 = vrot.lane.b32.xlu2 %v3431_v32, %s6332_s0  ;;  %3446 = vst [vmem:[#allocation1 + $0x10] ss:$2 sm:$0xff] %v3333_v10 }
 0x6b7   : > { %3448 = vst [vmem:[#allocation1 + $0x11] ss:$2 sm:$0xff] %v3334_v14 }
 0x6be   : > { %v3450_v53 = vld.sshfl [vmem:[#allocation1 + $0x10] sm:$0xff pattern:$0x75316420] }
 0x6bf   : > { %3453 = vrot.lane.b32.xlu0 %v3450_v53, %s6334_s1  ;;  %3465 = vst [vmem:[#allocation1 + $0x10] ss:$2 sm:$0xff] %v3337_v1 }
 0x6c0   : > { %3467 = vst [vmem:[#allocation1 + $0x11] ss:$2 sm:$0xff] %v3338_v63 }
 0x6c7   : > { %v3469_v41 = vld.sshfl [vmem:[#allocation1 + $0x10] sm:$0xff pattern:$0x75316420] }
 0x6c8   : > { %3472 = vrot.lane.b32.xlu1 %v3469_v41, %s6335_s2  ;;  %3484 = vst [vmem:[#allocation1 + $0x10] ss:$2 sm:$0xff] %v3341_v13 }
 0x6c9   : > { %3486 = vst [vmem:[#allocation1 + $0x11] ss:$2 sm:$0xff] %v3342_v54 }
 0x6d0   : > { %v3488_v46 = vld.sshfl [vmem:[#allocation1 + $0x10] sm:$0xff pattern:$0x75316420] }
 0x6d1   : > { %3491 = vrot.lane.b32.xlu2 %v3488_v46, %s6336_s28  ;;  %3503 = vst [vmem:[#allocation1 + $0x10] ss:$2 sm:$0xff] %v3345_v22 }
 0x6d2   : > { %3505 = vst [vmem:[#allocation1 + $0x11] ss:$2 sm:$0xff] %v3346_v24 }
 0x6d9   : > { %v3507_v21 = vld.sshfl [vmem:[#allocation1 + $0x10] sm:$0xff pattern:$0x75316420] }
 0x6da   : > { %3510 = vrot.lane.b32.xlu0 %v3507_v21, %s6337_s26  ;;  %v3414_v32 = vpop.permute.xlu2 %3413 }
 0x6e0   : > { %v3376_v58 = vpop.permute.xlu0 %3375 }
 0x6e1   : > { %v3514_v1 = vsel %vm1851_vm3, %v6049_v11, %v3376_v58 }
 0x6e9   : > { %v3395_v55 = vpop.permute.xlu1 %3394 }
 0x6ea   : > { %v3516_v53 = vsel %vm1917_vm5, %v3514_v1, %v3395_v55 }
 0x6eb   : > { %v3518_v0 = vsel %vm1983_vm7, %v3516_v53, %v3414_v32 }
 0x6f5   : > { %v3378_v26 = vpop.permute.xlu2 %3377 }
 0x6f6   : > { %v3515_v11 = vsel %vm1851_vm3, %v6065_v60, %v3378_v26 }
 0x6fb   : > { %v3433_v10 = vpop.permute.xlu0 %3432 }
 0x6fc   : > { %v3520_v61 = vsel %vm2049_vm9, %v3518_v0, %v3433_v10 }
 0x6fd   : > { %v3471_v13 = vpop.permute.xlu2 %3470 }
 0x705   : > { %v3452_v14 = vpop.permute.xlu1 %3451 }
 0x706   : > { %v3522_v34 = vsel %vm2963_vm15, %v3520_v61, %v3452_v14 }
 0x707   : > { %v3524_v29 = vsel %vm2966_vm1, %v3522_v34, %v3471_v13 }
 0x710   : > { %v3435_v9 = vpop.permute.xlu2 %3434 }
 0x712   : > { %v2299_v60 = vpop.f32.mrf.mxu3 }
 0x716   : > { %v3397_v63 = vpop.permute.xlu0 %3396 }
 0x717   : > { %v3517_v6 = vsel %vm1917_vm5, %v3515_v11, %v3397_v63 }
 0x71e   : > { %v3490_v54 = vpop.permute.xlu0 %3489 }
 0x71f   : > { %v3416_v19 = vpop.permute.xlu1 %3415  ;;  %v3526_v17 = vsel %vm2969_vm2, %v3524_v29, %v3490_v54 }
 0x720   : > { %v3519_v5 = vsel %vm1983_vm7, %v3517_v6, %v3416_v19 }
 0x721   : > { %v3521_v46 = vsel %vm2049_vm9, %v3519_v5, %v3435_v9 }
 0x727   : > { %v3509_v41 = vpop.permute.xlu1 %3508 }
 0x728   : > { %v3528_v48 = vsel %vm2972_vm12, %v3526_v17, %v3509_v41 }
 0x729   : > { %3983 = vmatmul.msk.f32.vlgmr.msrb.gmra.mxu3 %vm2988_vm13, %v3528_v48 }
 0x72a   : > { %v2302_v62 = vpop.f32.mrf.mxu3 }
 0x72b   : > { %v3492_v45 = vpop.permute.xlu2 %3491 }
 0x731   : > { %v3454_v24 = vpop.permute.xlu0 %3453 }
 0x732   : > { %v3523_v57 = vsel %vm2963_vm15, %v3521_v46, %v3454_v24 }
 0x73a   : > { %v3473_v22 = vpop.permute.xlu1 %3472 }
 0x73b   : > { %v3525_v38 = vsel %vm2966_vm1, %v3523_v57, %v3473_v22 }
 0x73c   : > { %v3527_v18 = vsel %vm2969_vm2, %v3525_v38, %v3492_v45  ;;  %v3613_v45 = vld [vmem:[#allocation6 + $0x28] sm:$0xf] }
 0x74c   : > { %v3511_v39 = vpop.permute.xlu0 %3510 }
 0x74d   : > { %v3529_v3 = vsel %vm2972_vm12, %v3527_v18, %v3511_v39 }
 0x74e   : > { %3984 = vmatmul.msk.f32.gmra.mxu3 %vm2988_vm13, %v3529_v3  ;;  %v3617_v3 = vld [vmem:[#allocation6 + $0x29] sm:$0xf] }
 0x7ac   : > { %v3566_v21 = vpop.f32.mrf.mxu3 }
 0x7ad   : > { %v3567_v56 = vadd.f32 %v4065_v50, %v3566_v21 }
 0x7af   : > { %v3574_v25 = vrot.slane %v3567_v56, 4  ;;  %v3578_v28 = vmax.f32 %v3567_v56, 0.0 }
 0x7b1   : > { %v3579_v59 = vmax.f32 %v3574_v25, 0.0  ;;  %3582 = vst.msk [vmem:[#allocation6 + $0x9] sm:$0xf] %vm2307_vm11, %v3578_v28  ;;  %v3813_v28 = vld [vmem:[%s6273_s9 + $0x40] sm:$0xff] }
 0x7b2   : > { %3831 = vmatpush.msra.mxu1 %v3813_v28 }
 0x7b3   : > { %3583 = vst.msk [vmem:[#allocation6 + $0x11] sm:$0xf] %vm2307_vm11, %v3579_v59  ;;  %v3812_v59 = vld [vmem:[%s6273_s9 + $0x38] sm:$0xff] }
 0x7b4   : > { %3832 = vmatpush.msra.mxu1 %v3812_v59 }
 0x7b8   : > { %v3587_v16 = vld [vmem:[#allocation6 + $0x8] sm:$0xf] }
 0x7b9   : > { %3628 = vst [vmem:[#allocation1 + $0x1] ss:$2 sm:$0xff] %v3587_v16  ;;  %v3591_v35 = vld [vmem:[#allocation6 + $0x9] sm:$0xf] }
 0x7ba   : > { %v3588_v52 = vld [vmem:[#allocation6 + $0x10] sm:$0xf]  ;;  %v3595_v4 = vld [vmem:[#allocation6 + $0xa] sm:$0xf] }
 0x7bb   : > { %3630 = vst [vmem:[#allocation1 + $0x10] ss:$2 sm:$0xff] %v3588_v52  ;;  %v3598_v2 = vld [vmem:[#allocation6 + $0x8] sm:$0xf]  ;;  %v3599_v31 = vld [vmem:[#allocation6 + $0x10] sm:$0xf] }
 0x7bc   : > { %v3602_v42 = vld [vmem:[#allocation6 + $0x9] sm:$0xf]  ;;  %v3603_v58 = vld [vmem:[#allocation6 + $0x11] sm:$0xf]  ;;  %v3810_v52 = vld [vmem:[%s6273_s9 + $0x28] sm:$0xff] }
 0x7bd   : > { %v3592_v30 = vld [vmem:[#allocation6 + $0x11] sm:$0xf]  ;;  %v3606_v32 = vld [vmem:[#allocation6 + $0xa] sm:$0xf] }
 0x7be   : > { %v3607_v63 = vld [vmem:[#allocation6 + $0x12] sm:$0xf]  ;;  %v3811_v16 = vld [vmem:[%s6273_s9 + $0x30] sm:$0xff] }
 0x7bf   : > { %v3596_v1 = vld [vmem:[#allocation6 + $0x12] sm:$0xf]  ;;  %3833 = vmatpush.msra.mxu1 %v3811_v16 }
 0x7c0   : > { %v6149_v47 = vld.sshfl [vmem:[#allocation1] sm:$0xff pattern:$0x75316420]  ;;  %v3610_v0 = vld [vmem:[#allocation6 + $0x10] sm:$0xf] }
 0x7c1   : > { %3641 = vst [vmem:[#allocation1] ss:$2 sm:$0xff] %v3590_v15  ;;  %v3614_v17 = vld [vmem:[#allocation6 + $0x11] sm:$0xf]  ;;  %3834 = vmatpush.msra.mxu1 %v3810_v52  ;;  %v3809_v15 = vld [vmem:[%s6273_s9 + $0x20] sm:$0xff] }
 0x7c2   : > { %3643 = vst [vmem:[#allocation1 + $0x1] ss:$2 sm:$0xff] %v3591_v35  ;;  %v3618_v5 = vld [vmem:[#allocation6 + $0x12] sm:$0xf] }
 0x7c3   : > { %v3808_v35 = vld [vmem:[%s6273_s9 + $0x18] sm:$0xff]  ;;  %3835 = vmatpush.msra.mxu1 %v3809_v15 }
 0x7c5   : > { %3836 = vmatpush.msra.mxu1 %v3808_v35 }
 0x7c9   : > { %v3648_v12 = vld.sshfl [vmem:[#allocation1] sm:$0xff pattern:$0x75316420] }
 0x7ca   : > { %3650 = vrot.lane.b32.xlu1 %v3648_v12, %s6324_s24  ;;  %3660 = vst [vmem:[#allocation1] ss:$2 sm:$0xff] %v3594_v40  ;;  %v3807_v40 = vld [vmem:[%s6273_s9 + $0x10] sm:$0xff]  ;;  %v3806_v12 = vld [vmem:[%s6273_s9 + $0x8] sm:$0xff] }
 0x7cb   : > { %3662 = vst [vmem:[#allocation1 + $0x1] ss:$2 sm:$0xff] %v3595_v4  ;;  %3837 = vmatpush.msra.mxu1 %v3807_v40  ;;  %v3805_v4 = vld [vmem:[%s6273_s9] sm:$0xff] }
 0x7cd   : > { %3838 = vmatpush.msra.mxu1 %v3806_v12 }
 0x7cf   : > { %3839 = vmatpush.msra.mxu1 %v3805_v4 }
 0x7d1   : > { %v3569_v37 = vpop.f32.mrf.mxu3 }
 0x7d2   : > { %v3570_v7 = vadd.f32 %v4065_v50, %v3569_v37  ;;  %v3667_v20 = vld.sshfl [vmem:[#allocation1] sm:$0xff pattern:$0x75316420]  ;;  %v3621_v50 = vld [vmem:[#allocation6 + $0x2a] sm:$0xf] }
 0x7d3   : > { %3669 = vrot.lane.b32.xlu2 %v3667_v20, %s6326_s30  ;;  %3679 = vst [vmem:[#allocation1] ss:$2 sm:$0xff] %v3598_v2 }
 0x7d4   : > { %v3575_v44 = vrot.slane %v3570_v7, 4  ;;  %v3580_v27 = vmax.f32 %v3570_v7, 0.0  ;;  %3681 = vst [vmem:[#allocation1 + $0x1] ss:$2 sm:$0xff] %v3599_v31 }
 0x7d6   : > { %v3581_v8 = vmax.f32 %v3575_v44, 0.0  ;;  %3584 = vst.msk [vmem:[#allocation6 + $0x19] sm:$0xf] %vm2307_vm11, %v3580_v27 }
 0x7d8   : > { %3585 = vst.msk [vmem:[#allocation6 + $0x21] sm:$0xf] %vm2307_vm11, %v3581_v8 }
 0x7db   : > { %v3686_v23 = vld.sshfl [vmem:[#allocation1] sm:$0xff pattern:$0x75316420] }
 0x7dc   : > { %3688 = vrot.lane.b32.xlu0 %v3686_v23, %s6328_s25  ;;  %3698 = vst [vmem:[#allocation1] ss:$2 sm:$0xff] %v3602_v42 }
 0x7dd   : > { %v3589_v49 = vld [vmem:[#allocation6 + $0x18] sm:$0xf]  ;;  %3700 = vst [vmem:[#allocation1 + $0x1] ss:$2 sm:$0xff] %v3603_v58 }
 0x7de   : > { %3632 = vst [vmem:[#allocation1 + $0x11] ss:$2 sm:$0xff] %v3589_v49  ;;  %v3593_v10 = vld [vmem:[#allocation6 + $0x19] sm:$0xf] }
 0x7df   : > { %v3597_v53 = vld [vmem:[#allocation6 + $0x1a] sm:$0xf]  ;;  %v3601_v34 = vld [vmem:[#allocation6 + $0x20] sm:$0xf] }
 0x7e0   : > { %v3611_v61 = vld [vmem:[#allocation6 + $0x18] sm:$0xf]  ;;  %v3605_v48 = vld [vmem:[#allocation6 + $0x21] sm:$0xf] }
 0x7e1   : > { %v3600_v13 = vld [vmem:[#allocation6 + $0x18] sm:$0xf]  ;;  %v3609_v22 = vld [vmem:[#allocation6 + $0x22] sm:$0xf] }
 0x7e2   : > { %v3615_v41 = vld [vmem:[#allocation6 + $0x19] sm:$0xf]  ;;  %v3612_v39 = vld [vmem:[#allocation6 + $0x20] sm:$0xf] }
 0x7e3   : > { %v3604_v9 = vld [vmem:[#allocation6 + $0x19] sm:$0xf]  ;;  %v3616_v60 = vld [vmem:[#allocation6 + $0x21] sm:$0xf] }
 0x7e4   : > { %v3705_v14 = vld.sshfl [vmem:[#allocation1] sm:$0xff pattern:$0x75316420]  ;;  %v3620_v21 = vld [vmem:[#allocation6 + $0x22] sm:$0xf] }
 0x7e5   : > { %v6156_v55 = vld.sshfl [vmem:[#allocation1 + $0x10] sm:$0xff pattern:$0x75316420]  ;;  %3707 = vrot.lane.b32.xlu1 %v3705_v14, %s6332_s0  ;;  %3717 = vst [vmem:[#allocation1] ss:$2 sm:$0xff] %v3606_v32 }
 0x7e6   : > { %3645 = vst [vmem:[#allocation1 + $0x10] ss:$2 sm:$0xff] %v3592_v30  ;;  %v3619_v24 = vld [vmem:[#allocation6 + $0x1a] sm:$0xf] }
 0x7e7   : > { %3647 = vst [vmem:[#allocation1 + $0x11] ss:$2 sm:$0xff] %v3593_v10  ;;  %v3608_v57 = vld [vmem:[#allocation6 + $0x1a] sm:$0xf] }
 0x7e8   : > { %3719 = vst [vmem:[#allocation1 + $0x1] ss:$2 sm:$0xff] %v3607_v63 }
 0x7ee   : > { %v3649_v26 = vld.sshfl [vmem:[#allocation1 + $0x10] sm:$0xff pattern:$0x75316420] }
 0x7ef   : > { %3652 = vrot.lane.b32.xlu0 %v3649_v26, %s6324_s24  ;;  %3664 = vst [vmem:[#allocation1 + $0x10] ss:$2 sm:$0xff] %v3596_v1  ;;  %v3724_v19 = vld.sshfl [vmem:[#allocation1] sm:$0xff pattern:$0x75316420]  ;;  %s3943_s24 = sshll.u32 %s377_s16, 4 }
 0x7f0   : > { %3666 = vst [vmem:[#allocation1 + $0x11] ss:$2 sm:$0xff] %v3597_v53  ;;  %3726 = vrot.lane.b32.xlu2 %v3724_v19, %s6334_s1 }
 0x7f1   : > { %3736 = vst [vmem:[#allocation1] ss:$2 sm:$0xff] %v3610_v0 }
 0x7f2   : > { %3738 = vst [vmem:[#allocation1 + $0x1] ss:$2 sm:$0xff] %v3611_v61 }
 0x7f7   : > { %v3668_v54 = vld.sshfl [vmem:[#allocation1 + $0x10] sm:$0xff pattern:$0x75316420] }
 0x7f8   : > { %3671 = vrot.lane.b32.xlu1 %v3668_v54, %s6326_s30  ;;  %3685 = vst [vmem:[#allocation1 + $0x11] ss:$2 sm:$0xff] %v3601_v34  ;;  %s379_s30 = scalar_lea.vmem [#allocation7], %s3943_s24 }
 0x7f9   : > { %3683 = vst [vmem:[#allocation1 + $0x10] ss:$2 sm:$0xff] %v3600_v13  ;;  %v3743_v29 = vld.sshfl [vmem:[#allocation1] sm:$0xff pattern:$0x75316420]  ;;  %s3874_s23 = sshll.u32 %s379_s30, 4  ;;  %s3875_s23 = int_to_ptr.vmem [resolvable:$true] %s3874_s23 }
 0x7fa   : > { %3745 = vrot.lane.b32.xlu0 %v3743_v29, %s6335_s2  ;;  %3755 = vst [vmem:[#allocation1] ss:$2 sm:$0xff] %v3614_v17 }
 0x7fb   : > { %3757 = vst [vmem:[#allocation1 + $0x1] ss:$2 sm:$0xff] %v3615_v41 }
 0x800   : > { %v3687_v11 = vld.sshfl [vmem:[#allocation1 + $0x10] sm:$0xff pattern:$0x75316420] }
 0x801   : > { %3690 = vrot.lane.b32.xlu2 %v3687_v11, %s6328_s25  ;;  %3704 = vst [vmem:[#allocation1 + $0x11] ss:$2 sm:$0xff] %v3605_v48  ;;  %s3993_s25 = sshll.u32 %s4231_s21, 4  ;;  %s3862_s21 = scalar_lea.sflag [#allocation8], %s377_s16 }
 0x802   : > { %3702 = vst [vmem:[#allocation1 + $0x10] ss:$2 sm:$0xff] %v3604_v9  ;;  %v3762_v6 = vld.sshfl [vmem:[#allocation1] sm:$0xff pattern:$0x75316420] }
 0x803   : > { %3764 = vrot.lane.b32.xlu1 %v3762_v6, %s6336_s28  ;;  %3774 = vst [vmem:[#allocation1] ss:$2 sm:$0xff] %v3618_v5 }
 0x804   : > { %3776 = vst [vmem:[#allocation1 + $0x1] ss:$2 sm:$0xff] %v3619_v24 }
 0x809   : > { %v3706_v46 = vld.sshfl [vmem:[#allocation1 + $0x10] sm:$0xff pattern:$0x75316420] }
 0x80a   : > { %3709 = vrot.lane.b32.xlu0 %v3706_v46, %s6332_s0  ;;  %3723 = vst [vmem:[#allocation1 + $0x11] ss:$2 sm:$0xff] %v3609_v22 }
 0x80b   : > { %3721 = vst [vmem:[#allocation1 + $0x10] ss:$2 sm:$0xff] %v3608_v57  ;;  %v3781_v38 = vld.sshfl [vmem:[#allocation1] sm:$0xff pattern:$0x75316420] }
 0x80c   : > { %3783 = vrot.lane.b32.xlu2 %v3781_v38, %s6337_s26 }
 0x812   : > { %v3725_v18 = vld.sshfl [vmem:[#allocation1 + $0x10] sm:$0xff pattern:$0x75316420] }
 0x813   : > { %3728 = vrot.lane.b32.xlu1 %v3725_v18, %s6334_s1  ;;  %3740 = vst [vmem:[#allocation1 + $0x10] ss:$2 sm:$0xff] %v3612_v39 }
 0x814   : > { %3742 = vst [vmem:[#allocation1 + $0x11] ss:$2 sm:$0xff] %v3613_v45 }
 0x81b   : > { %v3744_v62 = vld.sshfl [vmem:[#allocation1 + $0x10] sm:$0xff pattern:$0x75316420] }
 0x81c   : > { %3747 = vrot.lane.b32.xlu2 %v3744_v62, %s6335_s2  ;;  %3759 = vst [vmem:[#allocation1 + $0x10] ss:$2 sm:$0xff] %v3616_v60 }
 0x81d   : > { %3761 = vst [vmem:[#allocation1 + $0x11] ss:$2 sm:$0xff] %v3617_v3 }
 0x824   : > { %v3763_v56 = vld.sshfl [vmem:[#allocation1 + $0x10] sm:$0xff pattern:$0x75316420] }
 0x825   : > { %3766 = vrot.lane.b32.xlu0 %v3763_v56, %s6336_s28  ;;  %3778 = vst [vmem:[#allocation1 + $0x10] ss:$2 sm:$0xff] %v3620_v21  ;;  %s3873_s28 = scalar_lea.hbm %s6275_s11, %s3993_s25 }
 0x826   : > { %3780 = vst [vmem:[#allocation1 + $0x11] ss:$2 sm:$0xff] %v3621_v50  ;;  %s3876_s3 = sshll.u32 %s3873_s28, 4  ;;  %s3877_s3 = int_to_ptr.hbm [resolvable:$true] %s3876_s3 }
 0x827   : > { %s4086_s13 = sshra.s32 %s3877_s3, 4  ;;  %s4087_s13 = int_to_ptr.hbm [resolvable:$true] %s4086_s13 }
 0x828   : > { %s4088_s4 = scalar_lea.hbm %s4087_s13, 16  ;;  %p4093_p0 = scmp.lt.s32.totalorder %s4087_s13, %s6275_s11 }
 0x829   : > { %p4089_p11 = scmp.ne.s32.totalorder %s4087_s13, %s4088_s4  ;;  %p4094_p1 = scmp.lt.s32.totalorder %s4092_s27, %s4088_s4 }
 0x82b   : > { %p4090_p12 = pnand %p4089_p11, %p4248_p5  ;;  %p4095_p2 = por %p4094_p1, %p4093_p0 }
 0x82d   : > { %v3782_v25 = vld.sshfl [vmem:[#allocation1 + $0x10] sm:$0xff pattern:$0x75316420]  ;;  %v3670_v7 = vpop.permute.xlu2 %3669  ;;  %p4091_p13 = pneg %p4090_p12 }
 0x82e   : > { %3785 = vrot.lane.b32.xlu1 %v3782_v25, %s6337_s26 }
 0x82f   : > { %p4096_p3 = pnand %p4095_p2, %p4091_p13 }
 0x83c   : > { %v3651_v37 = vpop.permute.xlu1 %3650 }
 0x83d   : > { %v3789_v8 = vsel %vm1851_vm3, %v6149_v47, %v3651_v37 }
 0x83e   : > { %v3791_v23 = vsel %vm1917_vm5, %v3789_v8, %v3670_v7 }
 0x84a   : > { %v3727_v44 = vpop.permute.xlu2 %3726 }
 0x84e   : > { %v3689_v2 = vpop.permute.xlu0 %3688 }
 0x84f   : > { %v3793_v49 = vsel %vm1983_vm7, %v3791_v23, %v3689_v2 }
 0x857   : > { %v3708_v20 = vpop.permute.xlu1 %3707 }
 0x858   : > { %v3795_v58 = vsel %vm2049_vm9, %v3793_v49, %v3708_v20 }
 0x859   : > { %v3797_v10 = vsel %vm2963_vm15, %v3795_v58, %v3727_v44 }
 0x85b   : > { %v3691_v42 = vpop.permute.xlu2 %3690 }
 0x861   : > { %v3653_v27 = vpop.permute.xlu0 %3652 }
 0x862   : > { %v3790_v53 = vsel %vm1851_vm3, %v6156_v55, %v3653_v27  ;;  %v4066_v55 = vld [vmem:[%s6274_s10] ss:$0 sm:$0xff] }
 0x866   : > { %v3784_v63 = vpop.permute.xlu2 %3783 }
 0x86a   : > { %v3672_v31 = vpop.permute.xlu1 %3671 }
 0x86b   : > { %v3792_v19 = vsel %vm1917_vm5, %v3790_v53, %v3672_v31 }
 0x86c   : > { %v3746_v30 = vpop.permute.xlu0 %3745  ;;  %v3794_v61 = vsel %vm1983_vm7, %v3792_v19, %v3691_v42 }
 0x86d   : > { %v3799_v32 = vsel %vm2966_vm1, %v3797_v10, %v3746_v30 }
 0x875   : > { %v3765_v14 = vpop.permute.xlu1 %3764 }
 0x876   : > { %v3801_v26 = vsel %vm2969_vm2, %v3799_v32, %v3765_v14  ;;  %v3748_v29 = vpop.permute.xlu2 %3747 }
 0x877   : > { %v3803_v1 = vsel %vm2972_vm12, %v3801_v26, %v3784_v63 }
 0x878   : > { %3985 = vmatmul.msk.f32.vlgmr.msra.gmra.mxu1 %vm2988_vm13, %v3803_v1 }
 0x87c   : > { %v3710_v47 = vpop.permute.xlu0 %3709 }
 0x87d   : > { %v3796_v34 = vsel %vm2049_vm9, %v3794_v61, %v3710_v47 }
 0x885   : > { %v3729_v0 = vpop.permute.xlu1 %3728 }
 0x886   : > { %v3798_v54 = vsel %vm2963_vm15, %v3796_v34, %v3729_v0 }
 0x887   : > { %v3800_v17 = vsel %vm2966_vm1, %v3798_v54, %v3748_v29 }
 0x897   : > { %v3767_v13 = vpop.permute.xlu0 %3766 }
 0x898   : > { %v3802_v41 = vsel %vm2969_vm2, %v3800_v17, %v3767_v13 }
 0x8a0   : > { %v3786_v48 = vpop.permute.xlu1 %3785 }
 0x8a1   : > { %v3804_v11 = vsel %vm2972_vm12, %v3802_v41, %v3786_v48 }
 0x8a2   : > { %3986 = vmatmul.msk.f32.gmra.mxu1 %vm2988_vm13, %v3804_v11 }
 0x8f5   : > { %v3841_v9 = vpop.f32.mrf.mxu1 }
 0x8f6   : > { %v3842_v6 = vadd.f32 %v4066_v55, %v3841_v9 }
 0x8f8   : > { %v3849_v5 = vrot.slane %v3842_v6, 4  ;;  %v3853_v24 = vadd.f32 %v3842_v6, %v6037_v43 }
 0x8fa   : > { %v3854_v22 = vadd.f32 %v3849_v5, %v6040_v33  ;;  %3857 = vst.msk [vmem:[%s379_s30] sm:$0xf] %vm2307_vm11, %v3853_v24 }
 0x8fc   : > { %3858 = vst.msk [vmem:[%s379_s30 + $0x4] sm:$0xf] %vm2307_vm11, %v3854_v22 }
 0x91f   : > { %v3844_v46 = vpop.f32.mrf.mxu1 }
 0x920   : > { %v3845_v57 = vadd.f32 %v4066_v55, %v3844_v46 }
 0x922   : > { %v3850_v38 = vrot.slane %v3845_v57, 4  ;;  %v3855_v43 = vadd.f32 %v3845_v57, %v6054_v51 }
 0x924   : > { %v3856_v33 = vadd.f32 %v3850_v38, %v6057_v36  ;;  %3859 = vst.msk [vmem:[%s379_s30 + $0x8] sm:$0xf] %vm2307_vm11, %v3855_v43 }
 0x926   : > { %3860 = vst.msk [vmem:[%s379_s30 + $0xc] sm:$0xf] %vm2307_vm11, %v3856_v33 }
 0x927   : > { %4099 = shalt.err (!%p4096_p3)
}
 0x928   : > { %4009 = dma.vmem_to_hbm [thread:$0]  (%p4248_p5), %s3875_s23, 256, %s3877_s3, %s3862_s21, %s6337_s26, %s6337_s26, %s6330_s29  }
 0x929 PF: > { %s6340_s22 = sld [smem:[#allocation12_spill]] }
 0x92a   : > { %s6341_s16 = sld [smem:[#allocation10_spill]] }
 0x92f   : > { %p4015_p4 = scmp.ge.s32.totalorder %s6340_s22, 2 }
 0x930   : > { %s3891_s0 = sand.u32 1, %s6341_s16  }
 0x931   : > { %p4012_p7 = pnand %p4015_p4, %p4252_p6  ;;  %s3892_s24 = scalar_lea.sflag [#allocation8], %s3891_s0 }
 0x933   : > { %p4013_p8 = pneg %p4012_p7 }
 0x935   : > { %4117 = dma.done.wait (%p4013_p8), %s3892_s24, 256  }
 0x936   : > { %4119 = vsyncadd (%p4013_p8), %s3892_s24, 4294967040  ;;  %s6343_s20 = sld [smem:[#allocation13_spill]]  ;;  %s6346_s17 = smov %s4126_s18 }
 0x937   : > { %s6344_s30 = sld [smem:[#allocation11_spill]] }
 0x938   : > { %s6345_s19 = sld [smem:[#allocation14_spill]] }
 0x93c   : > { %p21_p9 = scmp.ge.s32.totalorder %s6343_s20, 4  }
 0x93d   : > { %s6347_s18 = smov %s6344_s30 }
 0x93e   :  { %23 = sbr.rel (!%p21_p9) target bundleno = 9 (0x9), region = 218 }
 0x943   :  { %3898 = vsyncpa [#allocation8], 1 }
 0x944   :  { %3900 = vsyncpa [#allocation8 + $0x1], 1 }

</bundles_post_ra>
